<compile_context>
chip_gen: v7x
topology: tpu7x:2x2x1
jax: 0.10.0
libtpu: 0.0.40
codegen_flags: <defaults>
</compile_context>

<pallas_src>
import numpy as np
import jax
import jax.numpy as jnp
from jax.experimental import pallas as pl
from jax.experimental.pallas import tpu as pltpu


# ----------------------------------------------------------------------------
# hparams (small, tile-friendly sizes)
# ----------------------------------------------------------------------------
class HParamsNRMS:
    embedded_dimension = 128      # E   (lane-aligned)
    head_num = 4                  # NH  -> head_dim = 32
    attention_hidden_dim = 128    # D
    history_size = 8              # H
    dropout = 0.2                 # identity at inference


hparams_nrms = HParamsNRMS()
NUM_USERS = 8                     # U  -> all_news = U * H = 64


# ----------------------------------------------------------------------------
# Pallas kernel
# ----------------------------------------------------------------------------
def _make_user_encoder_kernel(history_size, head_num):
    H = history_size
    NH = head_num

    def kernel(x_ref, wqkv_ref, bqkv_ref, wtail_ref, btail_ref, attq_ref,
               out_ref):
        # x_ref:     (U*H, E)  bf16  natural user-major rows (row = u*H + h)
        # wqkv_ref:  (E, 3E)   bf16  [Wq*scale | Wk | Wv] (torch in_proj, transposed)
        # bqkv_ref:  (1, 3E)   f32   [bq*scale | bk | bv]
        # wtail_ref: (E, E+D)  bf16  [Wo | Wo @ Watt]       (folded in f32 at init)
        # btail_ref: (1, E+D)  f32   [bo | bo @ Watt + batt]
        # attq_ref:  (1, D)    f32   AttLayer2 query vector
        # out_ref:   (U, E)    f32
        UH, E = x_ref.shape
        U = UH // H
        HD = E // NH
        D = btail_ref.shape[1] - E

        # ---- fused QKV projection: ONE bf16 MXU matmul, f32 accumulation ----
        qkv = jnp.dot(x_ref[...], wqkv_ref[...],
                      preferred_element_type=jnp.float32) + bqkv_ref[...]   # (UH, 3E)

        # ---- user-major -> history-major relayout, once, on-chip (f32) ------
        # Leading-dim permute: row u*H+h  ->  [h, u, :].
        qkv_h = pltpu.einshape("uhe->hue", qkv.reshape(U, H, 3 * E))        # (H, U, 3E)

        # ---- single bf16 cast; all Q/K/V head views are slices of this ------
        qkv_hb = qkv_h.astype(jnp.bfloat16)
        q3 = qkv_hb[:, :, 0 * E:1 * E]    # (H, U, E)  1/sqrt(HD) already folded in
        k3 = qkv_hb[:, :, 1 * E:2 * E]
        v3 = qkv_hb[:, :, 2 * E:3 * E]

        # ---- multi-head attention over users, batched over history ----------
        # Per-head contexts stay in registers and are lane-concatenated
        # (no VMEM scratch, no masked partial stores).
        ctxs = []
        for n in range(NH):
            sl = slice(n * HD, (n + 1) * HD)
            s = jnp.einsum('hud,hvd->huv', q3[:, :, sl], k3[:, :, sl],
                           preferred_element_type=jnp.float32)              # (H, U, U)
            s = s - jnp.max(s, axis=-1, keepdims=True)
            p = jnp.exp(s)
            p = p * pl.reciprocal(jnp.sum(p, axis=-1, keepdims=True),
                                  approx=True)
            ctx = jnp.einsum('huv,hvd->hud', p.astype(jnp.bfloat16),
                             v3[:, :, sl],
                             preferred_element_type=jnp.float32)            # (H, U, HD)
            ctxs.append(ctx.astype(jnp.bfloat16))
        ctx_bf = jnp.concatenate(ctxs, axis=-1).reshape(UH, E)              # (UH, E) bf16

        # ---- fused tail: out_proj + AttLayer2 projection in ONE matmul ------
        # (UH,128) @ (128,256): N = E + D = 256 fills the v6e/v7x MXU pass.
        tail = jnp.dot(ctx_bf, wtail_ref[...],
                       preferred_element_type=jnp.float32) + btail_ref[...] # (UH, E+D)
        y = tail[:, :E]                   # MHA output rows (row = h*U + u)

        # TODO(synk): nn.Dropout is identity at inference; training-mode
        # dropout is not modeled.

        # ---- AttLayer2: additive attention, softmax over history ------------
        a = jnp.tanh(tail[:, E:E + D])                                      # (UH, D)
        sc = jnp.sum(a * attq_ref[...], axis=-1, keepdims=True)             # (UH, 1)
        sc3 = sc.reshape(H, U, 1)
        sc3 = sc3 - jnp.max(sc3, axis=0, keepdims=True)
        w = jnp.exp(sc3)
        w = w * pl.reciprocal(jnp.sum(w, axis=0, keepdims=True), approx=True)

        y3 = y.reshape(H, U, E)
        out_ref[...] = jnp.sum(y3 * w, axis=0)                              # (U, E)

    return kernel


def user_encoder_forward(encoded_news, params, *, history_size, head_num):
    """Pallas forward. encoded_news: (all_news, E) user-major -> (num_users, E)."""
    all_news, E = encoded_news.shape
    H = history_size
    U = all_news // H
    NH = head_num
    HD = E // NH
    D = params['btail'].shape[1] - E

    # Input is only ever an MXU operand: ship it bf16 (halves the input DMA).
    x_bf16 = encoded_news.astype(jnp.bfloat16)

    kernel = _make_user_encoder_kernel(H, NH)
    vmem = pl.BlockSpec(memory_space=pltpu.MemorySpace.VMEM)

    flops = int(2 * all_news * E * 3 * E             # fused QKV projection
                + 4 * NH * H * U * U * HD            # scores + ctx, all heads
                + 2 * all_news * E * (E + D)         # fused tail projection
                + 2 * all_news * D)                  # attq reduction
    transcendentals = int(NH * H * U * U + all_news * D + H * U)
    bytes_accessed = int(2 * all_news * E + 4 * U * E
                         + 2 * (E * 3 * E + E * (E + D))
                         + 4 * (3 * E + (E + D) + D))

    out = pl.pallas_call(
        kernel,
        out_shape=jax.ShapeDtypeStruct((U, E), jnp.float32),
        in_specs=[vmem] * 6,
        out_specs=vmem,
        compiler_params=pltpu.CompilerParams(vmem_limit_bytes=32 * 1024 * 1024),
        cost_estimate=pl.CostEstimate(flops=flops,
                                      transcendentals=transcendentals,
                                      bytes_accessed=bytes_accessed),
    )(x_bf16, params['wqkv'], params['bqkv'], params['wtail'],
      params['btail'], params['attq'])
    return out


# ----------------------------------------------------------------------------
# Pure-JAX reference (mirrors PyTorch semantics exactly, all f32)
# ----------------------------------------------------------------------------
def reference_forward(encoded_news, params, *, history_size, head_num):
    all_news, E = encoded_news.shape
    U = all_news // history_size
    H = history_size
    HD = E // head_num

    x = encoded_news.reshape(U, H, E)            # (L=U, N=H, E)
    q = x @ params['wq'] + params['bqkv'][0]
    k = x @ params['wk'] + params['bqkv'][1]
    v = x @ params['wv'] + params['bqkv'][2]

    def heads(t):
        return t.reshape(U, H * head_num, HD).transpose(1, 0, 2)   # (N*nh, L, HD)

    qh = heads(q) * (HD ** -0.5)
    kh = heads(k)
    vh = heads(v)
    s = jnp.einsum('bud,bvd->buv', qh, kh)
    p = jax.nn.softmax(s, axis=-1)
    ctx = jnp.einsum('buv,bvd->bud', p, vh)
    ctx = ctx.transpose(1, 0, 2).reshape(U, H, E)
    y = ctx @ params['wo'] + params['bo'][0]

    a = jnp.tanh(y @ params['attw'] + params['attb'][0])
    sc = jnp.einsum('uhd,d->uh', a, params['attq'][0])
    w = jax.nn.softmax(sc, axis=1)
    return jnp.sum(y * w[:, :, None], axis=1)


# ----------------------------------------------------------------------------
# Deterministic parameter init (xavier-uniform like, zero biases)
# ----------------------------------------------------------------------------
def _xavier(key, shape):
    fan_out, fan_in = shape[0], shape[1]
    bound = float(np.sqrt(6.0 / (fan_in + fan_out)))
    return jax.random.uniform(key, shape, jnp.float32, -bound, bound)


def init_params(key, E, D, head_num):
    k1, k2, k3, k4 = jax.random.split(key, 4)
    in_proj_w = _xavier(k1, (3 * E, E))          # torch in_proj_weight (3E, E)
    out_proj_w = _xavier(k2, (E, E))             # torch out_proj.weight (E, E)
    attw = _xavier(k3, (E, D))                   # AttLayer2 W
    attq = _xavier(k4, (D, 1))                   # AttLayer2 query

    HD = E // head_num
    scale = 1.0 / float(np.sqrt(HD))

    wq = in_proj_w[:E].T                         # (E, E)
    wk = in_proj_w[E:2 * E].T
    wv = in_proj_w[2 * E:].T
    wo = out_proj_w.T                            # y = ctx @ wo + bo

    in_proj_b = jnp.zeros((3 * E,), jnp.float32)  # torch zero-init biases
    bo = jnp.zeros((E,), jnp.float32)
    attb = jnp.zeros((D,), jnp.float32)

    # Fused QKV weight/bias: 1/sqrt(head_dim) folded into BOTH the Q weight
    # columns and the Q slice of the bias (correct for any checkpoint).
    wqkv = jnp.concatenate([wq * scale, wk, wv], axis=1)                  # (E, 3E)
    bqkv = jnp.concatenate([in_proj_b[:E] * scale,
                            in_proj_b[E:2 * E], in_proj_b[2 * E:]])       # (3E,)

    # Fused tail weight/bias: [Wo | Wo @ Watt], [bo | bo @ Watt + batt].
    # Folded in f32, cast to bf16 once -> rounding stays close to the
    # two-matmul reference.
    wtail = jnp.concatenate([wo, wo @ attw], axis=1)                      # (E, E+D)
    btail = jnp.concatenate([bo, bo @ attw + attb])                       # (E+D,)

    kernel_params = {
        'wqkv': wqkv.astype(jnp.bfloat16),
        'bqkv': bqkv.reshape(1, 3 * E).astype(jnp.float32),
        'wtail': wtail.astype(jnp.bfloat16),
        'btail': btail.reshape(1, E + D).astype(jnp.float32),
        'attq': attq.T.astype(jnp.float32),      # (1, D)
    }
    # Reference params: plain f32, PyTorch-shaped.
    ref_params = {
        'wq': wq, 'wk': wk, 'wv': wv,
        'bqkv': in_proj_b.reshape(3, E),
        'wo': wo,
        'bo': bo.reshape(1, E),
        'attw': attw,
        'attb': attb.reshape(1, D),
        'attq': attq.T,
    }
    return kernel_params, ref_params


# ----------------------------------------------------------------------------
if __name__ == "__main__":
    E = hparams_nrms.embedded_dimension
    H = hparams_nrms.history_size
    NH = hparams_nrms.head_num
    D = hparams_nrms.attention_hidden_dim
    U = NUM_USERS
    all_news = U * H

    key = jax.random.PRNGKey(0)
    k_x, k_p = jax.random.split(key)
    encoded_news = jax.random.normal(k_x, (all_news, E), jnp.float32)
    kernel_params, ref_params = init_params(k_p, E, D, NH)

    out = user_encoder_forward(encoded_news, kernel_params,
                               history_size=H, head_num=NH)
    out = jax.block_until_ready(out)

    ref = reference_forward(encoded_news, ref_params,
                            history_size=H, head_num=NH)
    ref = jax.block_until_ready(ref)

    # bf16 MXU operands + approx reciprocals + f32-folded tail weight
    # -> inference-grade tolerance vs the all-f32 reference.
    np.testing.assert_allclose(np.asarray(out), np.asarray(ref),
                               rtol=2e-2, atol=3e-2)
    assert out.shape == (U, E)
    print("KERNEL_OK")
</pallas_src>

<mosaic_0001>
module attributes {stable_mosaic.version = 11 : i64} {
  func.func @kernel(%arg0: memref<64x128xbf16, #tpu.memory_space<vmem>>, %arg1: memref<128x384xbf16, #tpu.memory_space<vmem>>, %arg2: memref<1x384xf32, #tpu.memory_space<vmem>>, %arg3: memref<128x256xbf16, #tpu.memory_space<vmem>>, %arg4: memref<1x256xf32, #tpu.memory_space<vmem>>, %arg5: memref<1x128xf32, #tpu.memory_space<vmem>>, %arg6: memref<8x128xf32, #tpu.memory_space<vmem>>) attributes {dimension_semantics = [], scalar_prefetch = 0 : i64, scratch_operands = 0 : i64, tpu.core_type = #tpu.core_type<tc>} {
    %c0 = arith.constant 0 : index
    %c0_0 = arith.constant 0 : index
    %0 = vector.load %arg0[%c0, %c0_0] : memref<64x128xbf16, #tpu.memory_space<vmem>>, vector<64x128xbf16>
    %c0_1 = arith.constant 0 : index
    %c0_2 = arith.constant 0 : index
    %1 = vector.load %arg1[%c0_1, %c0_2] : memref<128x384xbf16, #tpu.memory_space<vmem>>, vector<128x384xbf16>
    %cst = arith.constant dense<0.000000e+00> : vector<64x384xf32>
    %2 = tpu.matmul %0, %1, %cst {dimension_numbers = #tpu.dot_dimension_numbers<[1], [0], [0], [1], [0, 0, 1, 1], [], []>} : vector<64x128xbf16>, vector<128x384xbf16>, vector<64x384xf32> -> vector<64x384xf32>
    %c0_3 = arith.constant 0 : index
    %c0_4 = arith.constant 0 : index
    %3 = vector.load %arg2[%c0_3, %c0_4] : memref<1x384xf32, #tpu.memory_space<vmem>>, vector<1x384xf32>
    %4 = vector.broadcast %3 : vector<1x384xf32> to vector<64x384xf32>
    %5 = arith.addf %2, %4 : vector<64x384xf32>
    %6 = vector.shape_cast %5 : vector<64x384xf32> to vector<8x8x384xf32>
    %7 = tpu.transpose %6, [1, 0, 2] : vector<8x8x384xf32> -> vector<8x8x384xf32>
    %8 = arith.truncf %7 : vector<8x8x384xf32> to vector<8x8x384xbf16>
    %9 = vector.extract_strided_slice %8 {offsets = [0, 0, 0], sizes = [8, 8, 128], strides = [1, 1, 1]} : vector<8x8x384xbf16> to vector<8x8x128xbf16>
    %10 = vector.extract_strided_slice %8 {offsets = [0, 0, 128], sizes = [8, 8, 128], strides = [1, 1, 1]} : vector<8x8x384xbf16> to vector<8x8x128xbf16>
    %11 = vector.extract_strided_slice %8 {offsets = [0, 0, 256], sizes = [8, 8, 128], strides = [1, 1, 1]} : vector<8x8x384xbf16> to vector<8x8x128xbf16>
    %12 = vector.extract_strided_slice %9 {offsets = [0, 0, 0], sizes = [8, 8, 32], strides = [1, 1, 1]} : vector<8x8x128xbf16> to vector<8x8x32xbf16>
    %13 = vector.extract_strided_slice %10 {offsets = [0, 0, 0], sizes = [8, 8, 32], strides = [1, 1, 1]} : vector<8x8x128xbf16> to vector<8x8x32xbf16>
    "tpu.trace_start"() <{level = 10 : i32, message = "hud,hvd->huv"}> : () -> ()
    %cst_5 = arith.constant dense<0.000000e+00> : vector<8x8x8xf32>
    %14 = tpu.matmul %12, %13, %cst_5 {dimension_numbers = #tpu.dot_dimension_numbers<[2], [2], [1], [1], [0, 0, 0, 1, 1, 1], [0], [0]>} : vector<8x8x32xbf16>, vector<8x8x32xbf16>, vector<8x8x8xf32> -> vector<8x8x8xf32>
    "tpu.trace_stop"() : () -> ()
    %cst_6 = arith.constant dense<0xFF800000> : vector<8x8xf32>
    %15 = vector.multi_reduction <maximumf>, %14, %cst_6 [2] : vector<8x8x8xf32> to vector<8x8xf32>
    %16 = vector.shape_cast %15 : vector<8x8xf32> to vector<8x8x1xf32>
    %17 = vector.broadcast %16 : vector<8x8x1xf32> to vector<8x8x8xf32>
    %18 = arith.subf %14, %17 : vector<8x8x8xf32>
    %19 = math.exp %18 : vector<8x8x8xf32>
    %cst_7 = arith.constant dense<0.000000e+00> : vector<8x8xf32>
    %20 = vector.multi_reduction <add>, %19, %cst_7 [2] : vector<8x8x8xf32> to vector<8x8xf32>
    %21 = vector.shape_cast %20 : vector<8x8xf32> to vector<8x8x1xf32>
    %22 = tpu.reciprocal %21 {approx = true} : vector<8x8x1xf32> -> vector<8x8x1xf32>
    %23 = vector.broadcast %22 : vector<8x8x1xf32> to vector<8x8x8xf32>
    %24 = arith.mulf %19, %23 : vector<8x8x8xf32>
    %25 = arith.truncf %24 : vector<8x8x8xf32> to vector<8x8x8xbf16>
    %26 = vector.extract_strided_slice %11 {offsets = [0, 0, 0], sizes = [8, 8, 32], strides = [1, 1, 1]} : vector<8x8x128xbf16> to vector<8x8x32xbf16>
    "tpu.trace_start"() <{level = 10 : i32, message = "huv,hvd->hud"}> : () -> ()
    %cst_8 = arith.constant dense<0.000000e+00> : vector<8x8x32xf32>
    %27 = tpu.matmul %25, %26, %cst_8 {dimension_numbers = #tpu.dot_dimension_numbers<[2], [1], [1], [2], [0, 0, 0, 1, 1, 2], [0], [0]>} : vector<8x8x8xbf16>, vector<8x8x32xbf16>, vector<8x8x32xf32> -> vector<8x8x32xf32>
    "tpu.trace_stop"() : () -> ()
    %28 = arith.truncf %27 : vector<8x8x32xf32> to vector<8x8x32xbf16>
    %29 = vector.extract_strided_slice %9 {offsets = [0, 0, 32], sizes = [8, 8, 32], strides = [1, 1, 1]} : vector<8x8x128xbf16> to vector<8x8x32xbf16>
    %30 = vector.extract_strided_slice %10 {offsets = [0, 0, 32], sizes = [8, 8, 32], strides = [1, 1, 1]} : vector<8x8x128xbf16> to vector<8x8x32xbf16>
    "tpu.trace_start"() <{level = 10 : i32, message = "hud,hvd->huv"}> : () -> ()
    %cst_9 = arith.constant dense<0.000000e+00> : vector<8x8x8xf32>
    %31 = tpu.matmul %29, %30, %cst_9 {dimension_numbers = #tpu.dot_dimension_numbers<[2], [2], [1], [1], [0, 0, 0, 1, 1, 1], [0], [0]>} : vector<8x8x32xbf16>, vector<8x8x32xbf16>, vector<8x8x8xf32> -> vector<8x8x8xf32>
    "tpu.trace_stop"() : () -> ()
    %cst_10 = arith.constant dense<0xFF800000> : vector<8x8xf32>
    %32 = vector.multi_reduction <maximumf>, %31, %cst_10 [2] : vector<8x8x8xf32> to vector<8x8xf32>
    %33 = vector.shape_cast %32 : vector<8x8xf32> to vector<8x8x1xf32>
    %34 = vector.broadcast %33 : vector<8x8x1xf32> to vector<8x8x8xf32>
    %35 = arith.subf %31, %34 : vector<8x8x8xf32>
    %36 = math.exp %35 : vector<8x8x8xf32>
    %cst_11 = arith.constant dense<0.000000e+00> : vector<8x8xf32>
    %37 = vector.multi_reduction <add>, %36, %cst_11 [2] : vector<8x8x8xf32> to vector<8x8xf32>
    %38 = vector.shape_cast %37 : vector<8x8xf32> to vector<8x8x1xf32>
    %39 = tpu.reciprocal %38 {approx = true} : vector<8x8x1xf32> -> vector<8x8x1xf32>
    %40 = vector.broadcast %39 : vector<8x8x1xf32> to vector<8x8x8xf32>
    %41 = arith.mulf %36, %40 : vector<8x8x8xf32>
    %42 = arith.truncf %41 : vector<8x8x8xf32> to vector<8x8x8xbf16>
    %43 = vector.extract_strided_slice %11 {offsets = [0, 0, 32], sizes = [8, 8, 32], strides = [1, 1, 1]} : vector<8x8x128xbf16> to vector<8x8x32xbf16>
    "tpu.trace_start"() <{level = 10 : i32, message = "huv,hvd->hud"}> : () -> ()
    %cst_12 = arith.constant dense<0.000000e+00> : vector<8x8x32xf32>
    %44 = tpu.matmul %42, %43, %cst_12 {dimension_numbers = #tpu.dot_dimension_numbers<[2], [1], [1], [2], [0, 0, 0, 1, 1, 2], [0], [0]>} : vector<8x8x8xbf16>, vector<8x8x32xbf16>, vector<8x8x32xf32> -> vector<8x8x32xf32>
    "tpu.trace_stop"() : () -> ()
    %45 = arith.truncf %44 : vector<8x8x32xf32> to vector<8x8x32xbf16>
    %46 = vector.extract_strided_slice %9 {offsets = [0, 0, 64], sizes = [8, 8, 32], strides = [1, 1, 1]} : vector<8x8x128xbf16> to vector<8x8x32xbf16>
    %47 = vector.extract_strided_slice %10 {offsets = [0, 0, 64], sizes = [8, 8, 32], strides = [1, 1, 1]} : vector<8x8x128xbf16> to vector<8x8x32xbf16>
    "tpu.trace_start"() <{level = 10 : i32, message = "hud,hvd->huv"}> : () -> ()
    %cst_13 = arith.constant dense<0.000000e+00> : vector<8x8x8xf32>
    %48 = tpu.matmul %46, %47, %cst_13 {dimension_numbers = #tpu.dot_dimension_numbers<[2], [2], [1], [1], [0, 0, 0, 1, 1, 1], [0], [0]>} : vector<8x8x32xbf16>, vector<8x8x32xbf16>, vector<8x8x8xf32> -> vector<8x8x8xf32>
    "tpu.trace_stop"() : () -> ()
    %cst_14 = arith.constant dense<0xFF800000> : vector<8x8xf32>
    %49 = vector.multi_reduction <maximumf>, %48, %cst_14 [2] : vector<8x8x8xf32> to vector<8x8xf32>
    %50 = vector.shape_cast %49 : vector<8x8xf32> to vector<8x8x1xf32>
    %51 = vector.broadcast %50 : vector<8x8x1xf32> to vector<8x8x8xf32>
    %52 = arith.subf %48, %51 : vector<8x8x8xf32>
    %53 = math.exp %52 : vector<8x8x8xf32>
    %cst_15 = arith.constant dense<0.000000e+00> : vector<8x8xf32>
    %54 = vector.multi_reduction <add>, %53, %cst_15 [2] : vector<8x8x8xf32> to vector<8x8xf32>
    %55 = vector.shape_cast %54 : vector<8x8xf32> to vector<8x8x1xf32>
    %56 = tpu.reciprocal %55 {approx = true} : vector<8x8x1xf32> -> vector<8x8x1xf32>
    %57 = vector.broadcast %56 : vector<8x8x1xf32> to vector<8x8x8xf32>
    %58 = arith.mulf %53, %57 : vector<8x8x8xf32>
    %59 = arith.truncf %58 : vector<8x8x8xf32> to vector<8x8x8xbf16>
    %60 = vector.extract_strided_slice %11 {offsets = [0, 0, 64], sizes = [8, 8, 32], strides = [1, 1, 1]} : vector<8x8x128xbf16> to vector<8x8x32xbf16>
    "tpu.trace_start"() <{level = 10 : i32, message = "huv,hvd->hud"}> : () -> ()
    %cst_16 = arith.constant dense<0.000000e+00> : vector<8x8x32xf32>
    %61 = tpu.matmul %59, %60, %cst_16 {dimension_numbers = #tpu.dot_dimension_numbers<[2], [1], [1], [2], [0, 0, 0, 1, 1, 2], [0], [0]>} : vector<8x8x8xbf16>, vector<8x8x32xbf16>, vector<8x8x32xf32> -> vector<8x8x32xf32>
    "tpu.trace_stop"() : () -> ()
    %62 = arith.truncf %61 : vector<8x8x32xf32> to vector<8x8x32xbf16>
    %63 = vector.extract_strided_slice %9 {offsets = [0, 0, 96], sizes = [8, 8, 32], strides = [1, 1, 1]} : vector<8x8x128xbf16> to vector<8x8x32xbf16>
    %64 = vector.extract_strided_slice %10 {offsets = [0, 0, 96], sizes = [8, 8, 32], strides = [1, 1, 1]} : vector<8x8x128xbf16> to vector<8x8x32xbf16>
    "tpu.trace_start"() <{level = 10 : i32, message = "hud,hvd->huv"}> : () -> ()
    %cst_17 = arith.constant dense<0.000000e+00> : vector<8x8x8xf32>
    %65 = tpu.matmul %63, %64, %cst_17 {dimension_numbers = #tpu.dot_dimension_numbers<[2], [2], [1], [1], [0, 0, 0, 1, 1, 1], [0], [0]>} : vector<8x8x32xbf16>, vector<8x8x32xbf16>, vector<8x8x8xf32> -> vector<8x8x8xf32>
    "tpu.trace_stop"() : () -> ()
    %cst_18 = arith.constant dense<0xFF800000> : vector<8x8xf32>
    %66 = vector.multi_reduction <maximumf>, %65, %cst_18 [2] : vector<8x8x8xf32> to vector<8x8xf32>
    %67 = vector.shape_cast %66 : vector<8x8xf32> to vector<8x8x1xf32>
    %68 = vector.broadcast %67 : vector<8x8x1xf32> to vector<8x8x8xf32>
    %69 = arith.subf %65, %68 : vector<8x8x8xf32>
    %70 = math.exp %69 : vector<8x8x8xf32>
    %cst_19 = arith.constant dense<0.000000e+00> : vector<8x8xf32>
    %71 = vector.multi_reduction <add>, %70, %cst_19 [2] : vector<8x8x8xf32> to vector<8x8xf32>
    %72 = vector.shape_cast %71 : vector<8x8xf32> to vector<8x8x1xf32>
    %73 = tpu.reciprocal %72 {approx = true} : vector<8x8x1xf32> -> vector<8x8x1xf32>
    %74 = vector.broadcast %73 : vector<8x8x1xf32> to vector<8x8x8xf32>
    %75 = arith.mulf %70, %74 : vector<8x8x8xf32>
    %76 = arith.truncf %75 : vector<8x8x8xf32> to vector<8x8x8xbf16>
    %77 = vector.extract_strided_slice %11 {offsets = [0, 0, 96], sizes = [8, 8, 32], strides = [1, 1, 1]} : vector<8x8x128xbf16> to vector<8x8x32xbf16>
    "tpu.trace_start"() <{level = 10 : i32, message = "huv,hvd->hud"}> : () -> ()
    %cst_20 = arith.constant dense<0.000000e+00> : vector<8x8x32xf32>
    %78 = tpu.matmul %76, %77, %cst_20 {dimension_numbers = #tpu.dot_dimension_numbers<[2], [1], [1], [2], [0, 0, 0, 1, 1, 2], [0], [0]>} : vector<8x8x8xbf16>, vector<8x8x32xbf16>, vector<8x8x32xf32> -> vector<8x8x32xf32>
    "tpu.trace_stop"() : () -> ()
    %79 = arith.truncf %78 : vector<8x8x32xf32> to vector<8x8x32xbf16>
    %80 = tpu.concatenate %28, %45, %62, %79 in 2 : vector<8x8x32xbf16>, vector<8x8x32xbf16>, vector<8x8x32xbf16>, vector<8x8x32xbf16> -> vector<8x8x128xbf16>
    %81 = vector.shape_cast %80 : vector<8x8x128xbf16> to vector<64x128xbf16>
    %c0_21 = arith.constant 0 : index
    %c0_22 = arith.constant 0 : index
    %82 = vector.load %arg3[%c0_21, %c0_22] : memref<128x256xbf16, #tpu.memory_space<vmem>>, vector<128x256xbf16>
    %cst_23 = arith.constant dense<0.000000e+00> : vector<64x256xf32>
    %83 = tpu.matmul %81, %82, %cst_23 {dimension_numbers = #tpu.dot_dimension_numbers<[1], [0], [0], [1], [0, 0, 1, 1], [], []>} : vector<64x128xbf16>, vector<128x256xbf16>, vector<64x256xf32> -> vector<64x256xf32>
    %c0_24 = arith.constant 0 : index
    %c0_25 = arith.constant 0 : index
    %84 = vector.load %arg4[%c0_24, %c0_25] : memref<1x256xf32, #tpu.memory_space<vmem>>, vector<1x256xf32>
    %85 = vector.broadcast %84 : vector<1x256xf32> to vector<64x256xf32>
    %86 = arith.addf %83, %85 : vector<64x256xf32>
    %87 = vector.extract_strided_slice %86 {offsets = [0, 0], sizes = [64, 128], strides = [1, 1]} : vector<64x256xf32> to vector<64x128xf32>
    %88 = vector.extract_strided_slice %86 {offsets = [0, 128], sizes = [64, 128], strides = [1, 1]} : vector<64x256xf32> to vector<64x128xf32>
    %89 = math.tanh %88 : vector<64x128xf32>
    %c0_26 = arith.constant 0 : index
    %c0_27 = arith.constant 0 : index
    %90 = vector.load %arg5[%c0_26, %c0_27] : memref<1x128xf32, #tpu.memory_space<vmem>>, vector<1x128xf32>
    %91 = vector.broadcast %90 : vector<1x128xf32> to vector<64x128xf32>
    %92 = arith.mulf %89, %91 : vector<64x128xf32>
    %cst_28 = arith.constant dense<0.000000e+00> : vector<64xf32>
    %93 = vector.multi_reduction <add>, %92, %cst_28 [1] : vector<64x128xf32> to vector<64xf32>
    %94 = vector.shape_cast %93 : vector<64xf32> to vector<64x1xf32>
    %95 = vector.shape_cast %94 : vector<64x1xf32> to vector<8x8x1xf32>
    %cst_29 = arith.constant dense<0xFF800000> : vector<8x1xf32>
    %96 = vector.multi_reduction <maximumf>, %95, %cst_29 [0] : vector<8x8x1xf32> to vector<8x1xf32>
    %97 = vector.shape_cast %96 : vector<8x1xf32> to vector<1x8x1xf32>
    %98 = vector.broadcast %97 : vector<1x8x1xf32> to vector<8x8x1xf32>
    %99 = arith.subf %95, %98 : vector<8x8x1xf32>
    %100 = math.exp %99 : vector<8x8x1xf32>
    %cst_30 = arith.constant dense<0.000000e+00> : vector<8x1xf32>
    %101 = vector.multi_reduction <add>, %100, %cst_30 [0] : vector<8x8x1xf32> to vector<8x1xf32>
    %102 = vector.shape_cast %101 : vector<8x1xf32> to vector<1x8x1xf32>
    %103 = tpu.reciprocal %102 {approx = true} : vector<1x8x1xf32> -> vector<1x8x1xf32>
    %104 = vector.broadcast %103 : vector<1x8x1xf32> to vector<8x8x1xf32>
    %105 = arith.mulf %100, %104 : vector<8x8x1xf32>
    %106 = vector.shape_cast %87 : vector<64x128xf32> to vector<8x8x128xf32>
    %107 = vector.broadcast %105 : vector<8x8x1xf32> to vector<8x8x128xf32>
    %108 = arith.mulf %106, %107 : vector<8x8x128xf32>
    %cst_31 = arith.constant dense<0.000000e+00> : vector<8x128xf32>
    %109 = vector.multi_reduction <add>, %108, %cst_31 [0] : vector<8x8x128xf32> to vector<8x128xf32>
    %c0_32 = arith.constant 0 : index
    %c0_33 = arith.constant 0 : index
    %110 = vector.load %arg6[%c0_32, %c0_33] : memref<8x128xf32, #tpu.memory_space<vmem>>, vector<8x128xf32>
    tpu.vector_store %arg6[%c0_32, %c0_33], %109 {strides = array<i32>} : memref<8x128xf32, #tpu.memory_space<vmem>>, vector<8x128xf32>,
    return
  }
}

</mosaic_0001>

<bundles_post_ra>
// kernel: tpu_custom_call.1
= control target key start
LH: loop header
LB: loop body
LE: loop exit
PB: predicated region body
PF: predicated region fallthrough
CT: control target
= control target key end

     0   :  { %11 = vsyncpa [#allocation3], 0  ;;  %s7030_s0 = inlined_call_operand.hbm [shape: bf16[64,128], index: 0, kind: input, shape index: {}]   ;;  %s7031_s1 = inlined_call_operand.hbm [shape: bf16[128,384], index: 1, kind: input, shape index: {}]   ;;  %s7032_s2 = inlined_call_operand.vmem [shape: f32[1,384], index: 2, kind: input, shape index: {}]   ;;  %s7033_s3 = inlined_call_operand.hbm [shape: bf16[128,256], index: 3, kind: input, shape index: {}]   ;;  %s7034_s4 = inlined_call_operand.vmem [shape: f32[1,256], index: 4, kind: input, shape index: {}]   ;;  %s7035_s5 = inlined_call_operand.vmem [shape: f32[1,128], index: 5, kind: input, shape index: {}]   ;;  %s7036_s6 = inlined_call_operand.hbm [shape: f32[8,128], index: 6, kind: output, shape index: {}]  }
   0x1   :  { %12 = vsyncpa [#allocation6], 0 }
   0x2   :  { %13 = vsyncpa [#allocation4], 0  ;;  %s5823_s21 = smov [#allocation5]   ;;  %s5729_s25 = scalar_lea.hbm %s7031_s1, 3072 }
   0x3   :  { %s31_s22 = sshll.u32 %s5823_s21, 4  ;;  %p5730_p0 = scmp.ne.s32.totalorder %s7031_s1, %s5729_s25  ;;  %s32_s22 = int_to_ptr.vmem [resolvable:$true] %s31_s22 }
   0x4   :  { %p5733_p1 = scmp.lt.u32.totalorder %s5729_s25, %s7031_s1 }
   0x6   :  { %p5735_p2 = pnand %p5733_p1, %p5730_p0 }
   0x8   :  { %5738 = shalt.err (!%p5735_p2)
}
   0x9   :  { %s5739_s30 = scalar_lea.vmem %s32_s22, 3072  ;;  %p5744_p4 = scmp.lt.s32.totalorder %s32_s22, %s32_s22 }
   0xa   :  { %p5740_p3 = scmp.ne.s32.totalorder %s32_s22, %s5739_s30  ;;  %p5745_p5 = scmp.lt.s32.totalorder %s5739_s30, %s5739_s30 }
   0xc   :  { %p5746_p6 = por %p5745_p5, %p5744_p4 }
   0xe   :  { %p5747_p7 = pnand %p5746_p6, %p5740_p3 }
  0x10   :  { %5750 = shalt.err (!%p5747_p7)
}
  0x11   :  { %s5824_s7 = smov 192   ;;  %s5825_s8 = smov 12  }
  0x12   :  { %37 = dma.hbm_to_vmem [thread:$0]  %s7031_s1, 3072, %s32_s22, [#allocation6], %s5824_s7, %s5824_s7, %s5825_s8  }
  0x13   :  { %s5826_s11 = smov [#allocation2]   ;;  %s5751_s15 = scalar_lea.hbm %s7030_s0, 512 }
  0x14   :  { %s19_s12 = sshll.u32 %s5826_s11, 4  ;;  %p5752_p8 = scmp.ne.s32.totalorder %s7030_s0, %s5751_s15  ;;  %s20_s12 = int_to_ptr.vmem [resolvable:$true] %s19_s12 }
  0x15   :  { %p5755_p9 = scmp.lt.u32.totalorder %s5751_s15, %s7030_s0 }
  0x17   :  { %p5757_p10 = pnand %p5755_p9, %p5752_p8 }
  0x19   :  { %5760 = shalt.err (!%p5757_p10)
}
  0x1a   :  { %s5761_s20 = scalar_lea.vmem %s20_s12, 512  ;;  %p5766_p12 = scmp.lt.s32.totalorder %s20_s12, %s20_s12 }
  0x1b   :  { %p5762_p11 = scmp.ne.s32.totalorder %s20_s12, %s5761_s20  ;;  %p5767_p13 = scmp.lt.s32.totalorder %s5761_s20, %s5761_s20 }
  0x1d   :  { %p5768_p0 = por %p5767_p13, %p5766_p12 }
  0x1f   :  { %p5769_p1 = pnand %p5768_p0, %p5762_p11 }
  0x21   :  { %5772 = shalt.err (!%p5769_p1)
}
  0x22   :  { %s5827_s1 = smov 64   ;;  %s5828_s21 = smov 4  }
  0x23   :  { %25 = dma.hbm_to_vmem [thread:$0]  %s7030_s0, 512, %s20_s12, [#allocation3], %s5827_s1, %s5827_s1, %s5828_s21  }
  0x24   :  { %s5829_s24 = smov [#allocation7]   ;;  %s5773_s28 = scalar_lea.hbm %s7033_s3, 2048 }
  0x25   :  { %s45_s25 = sshll.u32 %s5829_s24, 4  ;;  %p5774_p2 = scmp.ne.s32.totalorder %s7033_s3, %s5773_s28  ;;  %s46_s25 = int_to_ptr.vmem [resolvable:$true] %s45_s25 }
  0x26   :  { %p5777_p3 = scmp.lt.u32.totalorder %s5773_s28, %s7033_s3 }
  0x28   :  { %p5779_p4 = pnand %p5777_p3, %p5774_p2 }
  0x2a   :  { %5782 = shalt.err (!%p5779_p4)
}
  0x2b   :  { %s5783_s9 = scalar_lea.vmem %s46_s25, 2048  ;;  %p5788_p6 = scmp.lt.s32.totalorder %s46_s25, %s46_s25 }
  0x2c   :  { %p5784_p5 = scmp.ne.s32.totalorder %s46_s25, %s5783_s9  ;;  %p5789_p7 = scmp.lt.s32.totalorder %s5783_s9, %s5783_s9 }
  0x2e   :  { %p5790_p8 = por %p5789_p7, %p5788_p6 }
  0x30   :  { %p5791_p9 = pnand %p5790_p8, %p5784_p5 }
  0x32   :  { %5794 = shalt.err (!%p5791_p9)
}
  0x33   :  { %s5830_s0 = smov 128   ;;  %s5831_s10 = smov 8  }
  0x34   :  { %51 = dma.hbm_to_vmem [thread:$0]  %s7033_s3, 2048, %s46_s25, [#allocation6], %s5830_s0, %s5830_s0, %s5831_s10  }
  0x35   :  { %5817 = dma.done.wait [#allocation3], 512  }
  0x36   :  { %5818 = vsyncadd [#allocation3], 4294966784 }
  0x37   :  { %5819 = dma.done.wait [#allocation6], 5120  }
  0x38   :  { %5820 = vsyncadd [#allocation6], 4294962176  ;;  %v7039_v0 = vmov 0   ;;  %v5507_v1 = vld [vmem:[#allocation5 + $0x4] ss:$12 sps:$4 sm:$0xff]   ;;  %v5532_v18 = vld [vmem:[#allocation2 + $0x8] sm:$0xff]   ;;  %v108_v30 = vlaneseq }
  0x39   :  { %307 = vmatprep.mubr.bf16.mxu1 %v7039_v0  ;;  %v5509_v2 = vld [vmem:[#allocation5] ss:$12 sps:$4 sm:$0xff]   ;;  %275 = vmatprep.subr.bf16.mxu1 %v5507_v1  ;;  %v5510_v3 = vld [vmem:[#allocation5 + $0x1c] ss:$12 sps:$4 sm:$0xff]   ;;  %v5512_v4 = vld [vmem:[#allocation5 + $0x18] ss:$12 sps:$4 sm:$0xff]  }
  0x3a   :  { %276 = vmatpush1.bf16.msra.mxu1 %v5509_v2  ;;  %v5513_v5 = vld [vmem:[#allocation5 + $0x34] ss:$12 sps:$4 sm:$0xff]   ;;  %v5515_v6 = vld [vmem:[#allocation5 + $0x30] ss:$12 sps:$4 sm:$0xff]   ;;  %v5516_v7 = vld [vmem:[#allocation5 + $0x4c] ss:$12 sps:$4 sm:$0xff]  }
  0x3b   :  { %277 = vmatprep.subr.bf16.mxu1 %v5510_v3  ;;  %v5518_v8 = vld [vmem:[#allocation5 + $0x48] ss:$12 sps:$4 sm:$0xff]   ;;  %v5519_v9 = vld [vmem:[#allocation5 + $0x64] ss:$12 sps:$4 sm:$0xff]   ;;  %v5521_v10 = vld [vmem:[#allocation5 + $0x60] ss:$12 sps:$4 sm:$0xff]  }
  0x3c   :  { %v5522_v11 = vld [vmem:[#allocation5 + $0x7c] ss:$12 sps:$4 sm:$0xff]   ;;  %v5524_v12 = vld [vmem:[#allocation5 + $0x78] ss:$12 sps:$4 sm:$0xff]   ;;  %v5525_v13 = vld [vmem:[#allocation5 + $0x94] ss:$12 sps:$4 sm:$0xff]  }
  0x3d   :  { %v5527_v14 = vld [vmem:[#allocation5 + $0x90] ss:$12 sps:$4 sm:$0xff]   ;;  %v5528_v15 = vld [vmem:[#allocation5 + $0xac] ss:$12 sps:$4 sm:$0xff]   ;;  %v5530_v16 = vld [vmem:[#allocation5 + $0xa8] ss:$12 sps:$4 sm:$0xff]  }
  0x3e   :  { %278 = vmatpush1.bf16.msra.mxu1 %v5512_v4  ;;  %v5531_v17 = vld [vmem:[#allocation2] sm:$0xff]   ;;  %v5533_v19 = vld [vmem:[#allocation2 + $0x10] sm:$0xff]   ;;  %v5534_v20 = vld [vmem:[#allocation2 + $0x18] sm:$0xff]   ;;  %v5833_v29 = vmov 0.0   ;;  %vm5834_vm0 = vmmov 0   ;;  %v5923_v31 = vshrl.u32 %v108_v30, 7 }
  0x3f   :  { %279 = vmatprep.subr.bf16.mxu1 %v5513_v5  ;;  %v5535_v21 = vld [vmem:[#allocation5 + $0x8] ss:$12 sps:$4 sm:$0xff]   ;;  %v5536_v22 = vld [vmem:[#allocation5 + $0x20] ss:$12 sps:$4 sm:$0xff]   ;;  %v5537_v23 = vld [vmem:[#allocation5 + $0x38] ss:$12 sps:$4 sm:$0xff]   ;;  %5106 = vmatprep.subr.bf16.mxu0 %v5833_v29 }
  0x40   :  { %v5538_v24 = vld [vmem:[#allocation5 + $0x50] ss:$12 sps:$4 sm:$0xff]   ;;  %v5539_v25 = vld [vmem:[#allocation5 + $0x68] ss:$12 sps:$4 sm:$0xff]   ;;  %v5540_v26 = vld [vmem:[#allocation5 + $0x80] ss:$12 sps:$4 sm:$0xff]   ;;  %5108 = vmatprep.mubr.msk.bf16.mxu0 %vm5834_vm0, %v5833_v29 }
  0x41   :  { %v5541_v27 = vld [vmem:[#allocation5 + $0x98] ss:$12 sps:$4 sm:$0xff]   ;;  %v5542_v28 = vld [vmem:[#allocation5 + $0xb0] ss:$12 sps:$4 sm:$0xff]   ;;  %v7037_v33 = vsub.s32 0, %v5923_v31  ;;  %v7038_v38 = vsub.s32 1, %v5923_v31 }
  0x42   :  { %280 = vmatpush1.bf16.msra.mxu1 %v5515_v6  ;;  %v5929_v35 = vld [vmem:[%s7032_s2] sm:$0x7]  ;;  %v5835_v36 = vmov 1983009808   ;;  %v5836_v49 = vmov 1934713408  }
  0x43   :  { %281 = vmatprep.subr.bf16.mxu1 %v5516_v7  ;;  %v416_v37 = vunpack.c.l.s4 %v5835_v36  ;;  %v111_v41 = vrot.slane %v5929_v35, %v7037_v33  ;;  %v5938_v43 = vrot.slane %v5929_v35, %v7038_v38  ;;  %v480_v50 = vunpack.c.l.s4 %v5836_v49  ;;  %s5837_s2 = smov 96   ;;  %s5838_s14 = smov 32  }
  0x44   :  { %vm845_vm1 = vcmask 261120   ;;  %vm1314_vm2 = vcmask 1043456   ;;  %vm1214_vm3 = vcmask 64512   ;;  %vm4472_vm4 = vcmask 523264  }
  0x45   :  { %v417_v42 = vunpack.c.0.s8 %v416_v37  ;;  %v481_v2 = vunpack.c.0.s8 %v480_v50  ;;  %vm4489_vm5 = vcmask 785408  }
  0x46   :  { %282 = vmatpush1.bf16.msra.mxu1 %v5518_v8 }
  0x47   :  { %283 = vmatprep.subr.bf16.mxu1 %v5519_v9  ;;  %v5941_v48 = vsub.s32 %v417_v42, %v5923_v31 }
  0x4a   :  { %284 = vmatpush1.bf16.msra.mxu1 %v5521_v10 }
  0x4b   :  { %285 = vmatprep.subr.bf16.mxu1 %v5522_v11 }
  0x4e   :  { %286 = vmatpush1.bf16.msra.mxu1 %v5524_v12 }
  0x4f   :  { %287 = vmatprep.subr.bf16.mxu1 %v5525_v13 }
  0x52   :  { %288 = vmatpush1.bf16.msra.mxu1 %v5527_v14 }
  0x53   :  { %289 = vmatprep.subr.bf16.mxu1 %v5528_v15 }
  0x56   :  { %290 = vmatpush1.bf16.msra.mxu1 %v5530_v16 }
  0x57   :  { %5082 = vmatprep.subr.bf16.mxu1 %v5535_v21 }
  0x59   :  { %308 = vmatmul.mubr.bf16.vlgmr.msra.gmra.mrb[0].mxu1 %v5531_v17 }
  0x5a   :  { %317 = vmatprep.mubr.bf16.mxu1 %v7039_v0  ;;  %5083 = vmatpush3.bf16.msra.mxu1 %v5535_v21 }
  0x5b   :  { %5084 = vmatprep.subr.bf16.mxu1 %v5536_v22 }
  0x5e   :  { %5085 = vmatpush3.bf16.msra.mxu1 %v5536_v22 }
  0x5f   :  { %5086 = vmatprep.subr.bf16.mxu1 %v5537_v23 }
  0x61   :  { %318 = vmatmul.mubr.bf16.gmra.mrb[4].mxu1 %v5532_v18 }
  0x62   :  { %327 = vmatprep.mubr.bf16.mxu1 %v7039_v0  ;;  %5087 = vmatpush3.bf16.msra.mxu1 %v5537_v23 }
  0x63   :  { %5088 = vmatprep.subr.bf16.mxu1 %v5538_v24 }
  0x66   :  { %5089 = vmatpush3.bf16.msra.mxu1 %v5538_v24 }
  0x67   :  { %5090 = vmatprep.subr.bf16.mxu1 %v5539_v25 }
  0x69   :  { %328 = vmatmul.mubr.bf16.gmra.mrb[8].mxu1 %v5533_v19 }
  0x6a   :  { %337 = vmatprep.mubr.bf16.mxu1 %v7039_v0  ;;  %5091 = vmatpush3.bf16.msra.mxu1 %v5539_v25  ;;  %v5964_v25 = vsub.s32 %v481_v2, %v5923_v31 }
  0x6b   :  { %5092 = vmatprep.subr.bf16.mxu1 %v5540_v26 }
  0x6e   :  { %5093 = vmatpush3.bf16.msra.mxu1 %v5540_v26 }
  0x6f   :  { %5094 = vmatprep.subr.bf16.mxu1 %v5541_v27 }
  0x71   :  { %338 = vmatmul.mubr.bf16.gmra.mrb[12].mxu1 %v5534_v20 }
  0x72   :  { %5098 = vmatprep.mubr.bf16.mxu1 %v5531_v17  ;;  %5095 = vmatpush3.bf16.msra.mxu1 %v5541_v27 }
  0x73   :  { %5096 = vmatprep.subr.bf16.mxu1 %v5542_v28 }
  0x76   :  { %5097 = vmatpush3.bf16.msra.mxu1 %v5542_v28 }
  0x77   :  { %5124 = vmatprep.subr.bf16.mxu1 %v5833_v29 }
  0x79   :  { %5099 = vmatmul.mubr.bf16.vlgmr.msra.gmra.mrb[16].mxu1 %v5532_v18 }
  0x7a   :  { %5102 = vmatprep.mubr.bf16.mxu1 %v5533_v19 }
  0x81   :  { %5103 = vmatmul.mubr.bf16.gmra.mrb[20].mxu1 %v5534_v20 }
  0x82   :  { %5126 = vmatprep.mubr.msk.bf16.mxu1 %vm5834_vm0, %v5833_v29 }
 0x12c   :  { %v309_v32 = vpop.f32.mrb[0].mxu1 }
 0x12d   :  { %v311_v34 = vpop.f32.mrb[1].mxu1  ;;  %v310_v45 = vadd.f32 %v309_v32, %v111_v41 }
 0x12e   :  { %v313_v39 = vpop.f32.mrb[2].mxu1  ;;  %v312_v51 = vadd.f32 %v311_v34, %v5938_v43 }
 0x12f   :  { %v315_v40 = vpop.f32.mrb[3].mxu1  ;;  %v314_v54 = vadd.f32 %v313_v39, %v111_v41 }
 0x130   :  { %v316_v59 = vadd.f32 %v315_v40, %v5938_v43 }
 0x134   :  { %v319_v44 = vpop.f32.mrb[4].mxu1 }
 0x135   :  { %v320_v46 = vadd.f32 %v319_v44, %v111_v41  ;;  %v321_v47 = vpop.f32.mrb[5].mxu1 }
 0x136   :  { %v322_v52 = vadd.f32 %v321_v47, %v5938_v43  ;;  %v323_v53 = vpop.f32.mrb[6].mxu1 }
 0x137   :  { %v413_v55 = vcombine.low %v310_v45, %v320_v46  ;;  %v414_v56 = vcombine.high %v310_v45, %v320_v46  ;;  %v324_v57 = vadd.f32 %v323_v53, %v111_v41  ;;  %v325_v58 = vpop.f32.mrb[7].mxu1 }
 0x138   :  { %v549_v60 = vcombine.low %v312_v51, %v322_v52  ;;  %v550_v61 = vcombine.high %v312_v51, %v322_v52  ;;  %v326_v62 = vadd.f32 %v325_v58, %v5938_v43 }
 0x139   :  { %v429_v63 = vcombine.low %v314_v54, %v324_v57  ;;  %v430_v1 = vcombine.high %v314_v54, %v324_v57  ;;  %v421_v5 = vrot.slane %v413_v55, %v5941_v48  ;;  %v428_v6 = vrot.slane %v414_v56, %v5941_v48 }
 0x13a   :  { %v565_v3 = vcombine.low %v316_v59, %v326_v62  ;;  %v566_v4 = vcombine.high %v316_v59, %v326_v62  ;;  %v557_v9 = vrot.slane %v549_v60, %v5941_v48  ;;  %v5953_v10 = vrot.slane %v550_v61, %v5941_v48 }
 0x13b   :  { %v437_v7 = vrot.slane %v429_v63, %v5941_v48  ;;  %v444_v8 = vrot.slane %v430_v1, %v5941_v48 }
 0x13c   :  { %v573_v11 = vrot.slane %v565_v3, %v5941_v48  ;;  %v5957_v12 = vrot.slane %v566_v4, %v5941_v48  ;;  %v329_v13 = vpop.f32.mrb[8].mxu1 }
 0x13d   :  { %v477_v14 = vcombine.low %v421_v5, %v437_v7  ;;  %v478_v15 = vcombine.high %v421_v5, %v437_v7  ;;  %v493_v16 = vcombine.low %v428_v6, %v444_v8  ;;  %v494_v17 = vcombine.high %v428_v6, %v444_v8  ;;  %v331_v18 = vpop.f32.mrb[9].mxu1 }
 0x13e   :  { %v613_v19 = vcombine.low %v557_v9, %v573_v11  ;;  %v614_v20 = vcombine.high %v557_v9, %v573_v11  ;;  %v629_v21 = vcombine.low %v5953_v10, %v5957_v12  ;;  %v630_v22 = vcombine.high %v5953_v10, %v5957_v12  ;;  %v333_v23 = vpop.f32.mrb[10].mxu1 }
 0x13f   :  { %v335_v24 = vpop.f32.mrb[11].mxu1  ;;  %v330_v27 = vadd.f32 %v329_v13, %v111_v41  ;;  %v5967_v32 = vrot.slane %v477_v14, %v5964_v25  ;;  %v492_v34 = vrot.slane %v478_v15, %v5964_v25  ;;  %v332_v36 = vadd.f32 %v331_v18, %v5938_v43 }
 0x140   :  { %v334_v40 = vadd.f32 %v333_v23, %v111_v41  ;;  %v336_v47 = vadd.f32 %v335_v24, %v5938_v43  ;;  %v501_v52 = vrot.slane %v493_v16, %v5964_v25  ;;  %v508_v53 = vrot.slane %v494_v17, %v5964_v25 }
 0x141   :  { %v621_v56 = vrot.slane %v613_v19, %v5964_v25  ;;  %v628_v57 = vrot.slane %v614_v20, %v5964_v25 }
 0x144   :  { %v339_v26 = vpop.f32.mrb[12].mxu1 }
 0x145   :  { %v340_v28 = vadd.f32 %v339_v26, %v111_v41  ;;  %v341_v30 = vpop.f32.mrb[13].mxu1 }
 0x146   :  { %v342_v37 = vadd.f32 %v341_v30, %v5938_v43  ;;  %v343_v39 = vpop.f32.mrb[14].mxu1 }
 0x147   :  { %v445_v42 = vcombine.low %v330_v27, %v340_v28  ;;  %v446_v44 = vcombine.high %v330_v27, %v340_v28  ;;  %v344_v45 = vadd.f32 %v343_v39, %v111_v41  ;;  %v345_v46 = vpop.f32.mrb[15].mxu1  ;;  %v637_v39 = vrot.slane %v629_v21, %v5964_v25 }
 0x148   :  { %v581_v49 = vcombine.low %v332_v36, %v342_v37  ;;  %v582_v50 = vcombine.high %v332_v36, %v342_v37  ;;  %v346_v51 = vadd.f32 %v345_v46, %v5938_v43 }
 0x149   :  { %v461_v54 = vcombine.low %v334_v40, %v344_v45  ;;  %v462_v55 = vcombine.high %v334_v40, %v344_v45  ;;  %v453_v41 = vrot.slane %v445_v42, %v5941_v48  ;;  %v460_v60 = vrot.slane %v446_v44, %v5941_v48 }
 0x14a   :  { %v597_v58 = vcombine.low %v336_v47, %v346_v51  ;;  %v598_v59 = vcombine.high %v336_v47, %v346_v51  ;;  %v589_v62 = vrot.slane %v581_v49, %v5941_v48  ;;  %v596_v63 = vrot.slane %v582_v50, %v5941_v48 }
 0x14b   :  { %v469_v61 = vrot.slane %v461_v54, %v5941_v48  ;;  %v476_v43 = vrot.slane %v462_v55, %v5941_v48  ;;  %v644_v40 = vrot.slane %v630_v22, %v5964_v25 }
 0x14c   :  { %v605_v1 = vrot.slane %v597_v58, %v5941_v48  ;;  %v612_v2 = vrot.slane %v598_v59, %v5941_v48 }
 0x14d   :  { %v509_v3 = vcombine.low %v453_v41, %v469_v61  ;;  %v510_v4 = vcombine.high %v453_v41, %v469_v61  ;;  %v525_v5 = vcombine.low %v460_v60, %v476_v43  ;;  %v526_v6 = vcombine.high %v460_v60, %v476_v43 }
 0x14e   :  { %v645_v7 = vcombine.low %v589_v62, %v605_v1  ;;  %v646_v8 = vcombine.high %v589_v62, %v605_v1  ;;  %v661_v9 = vcombine.low %v596_v63, %v612_v2  ;;  %v662_v11 = vcombine.high %v596_v63, %v612_v2 }
 0x14f   :  { %v517_v13 = vrot.slane %v509_v3, %v5964_v25  ;;  %v524_v14 = vrot.slane %v510_v4, %v5964_v25  ;;  %v533_v15 = vrot.slane %v525_v5, %v5964_v25  ;;  %v540_v16 = vrot.slane %v526_v6, %v5964_v25 }
 0x150   :  { %v653_v17 = vrot.slane %v645_v7, %v5964_v25  ;;  %v660_v18 = vrot.slane %v646_v8, %v5964_v25  ;;  %v669_v19 = vrot.slane %v661_v9, %v5964_v25  ;;  %v676_v20 = vrot.slane %v662_v11, %v5964_v25  ;;  %v5100_v7 = vpop.f32.mrb[16].mxu1 }
 0x151   :  { %v542_v23 = vcombine.high %v5967_v32, %v517_v13  ;;  %v543_v24 = vcombine.low %v492_v34, %v524_v14  ;;  %v544_v26 = vcombine.high %v492_v34, %v524_v14  ;;  %v5995_v27 = vcombine.low %v501_v52, %v533_v15  ;;  %v382_v9 = vpop.f32.mrb[17].mxu1 }
 0x152   :  { %v546_v28 = vcombine.high %v501_v52, %v533_v15  ;;  %v5997_v30 = vcombine.low %v508_v53, %v540_v16  ;;  %v548_v36 = vcombine.high %v508_v53, %v540_v16  ;;  %v678_v37 = vcombine.high %v621_v56, %v653_v17 }
 0x153   :  { %v679_v42 = vcombine.low %v628_v57, %v660_v18  ;;  %v680_v44 = vcombine.high %v628_v57, %v660_v18  ;;  %v681_v34 = vcombine.low %v637_v39, %v669_v19  ;;  %v682_v45 = vcombine.high %v637_v39, %v669_v19 }
 0x154   :  { %v683_v46 = vcombine.low %v644_v40, %v676_v20  ;;  %v684_v47 = vcombine.high %v644_v40, %v676_v20  ;;  %v677_v49 = vcombine.low %v621_v56, %v653_v17  ;;  %v541_v52 = vcombine.low %v5967_v32, %v517_v13  ;;  %v5101_v13 = vpop.f32.mrb[18].mxu1 }
 0x155   :  { %v6007_v50 = vpack.c.bf16 %v680_v44, %v680_v44  ;;  %v6018_v12 = vpack.c.bf16 %v682_v45, %v682_v45  ;;  %v6020_v22 = vpack.c.bf16 %v678_v37, %v678_v37  ;;  %v6022_v53 = vpack.c.bf16 %v544_v26, %v544_v26  ;;  %v385_v15 = vpop.f32.mrb[19].mxu1 }
 0x156   :  { %v6009_v51 = vpack.c.bf16 %v677_v49, %v677_v49  ;;  %v6024_v54 = vpack.c.bf16 %v541_v52, %v541_v52  ;;  %v6039_v56 = vpack.c.bf16 %v684_v47, %v684_v47  ;;  %v6042_v57 = vpack.c.bf16 %v679_v42, %v679_v42 }
 0x157   :  { %v988_v21 = vsel %vm845_vm1, %v6007_v50, 0  ;;  %v1080_v32 = vsel %vm845_vm1, %v6018_v12, 0  ;;  %v896_v55 = vsel %vm845_vm1, %v6020_v22, 0  ;;  %v6044_v58 = vpack.c.bf16 %v546_v28, %v546_v28 }
 0x158   :  { %v850_v10 = vsel %vm845_vm1, %v6009_v51, 0  ;;  %5125 = vmatpush3.bf16.xpose.msra.mxu1 %v988_v21  ;;  %v6046_v59 = vpack.c.bf16 %v542_v23, %v542_v23  ;;  %v1172_v41 = vsel %vm845_vm1, %v6039_v56, 0  ;;  %v942_v60 = vsel %vm845_vm1, %v6042_v57, 0 }
 0x159   :  { %5107 = vmatpush3.bf16.xpose.msra.mxu0 %v850_v10  ;;  %5136 = vmatprep.subr.bf16.mxu1 %v5833_v29  ;;  %v6062_v61 = vpack.c.bf16 %v681_v34, %v681_v34  ;;  %v6064_v43 = vpack.c.bf16 %v548_v36, %v548_v36  ;;  %v6066_v62 = vpack.c.bf16 %v543_v24, %v543_v24  ;;  %v118_v5 = vsub.s32 2, %v5923_v31 }
 0x15a   :  { %5112 = vmatprep.subr.bf16.mxu0 %v5833_v29  ;;  %v6079_v1 = vpack.c.bf16 %v683_v46, %v683_v46  ;;  %v6083_v2 = vpack.c.bf16 %v5995_v27, %v5995_v27  ;;  %v6094_v4 = vpack.c.bf16 %v5997_v30, %v5997_v30  ;;  %v5104_v27 = vpop.f32.mrb[20].mxu1 }
 0x15b   :  { %v1034_v63 = vsel %vm845_vm1, %v6062_v61, 0  ;;  %v119_v6 = vrot.slane %v5929_v35, %v118_v5  ;;  %v398_v30 = vpop.f32.mrb[21].mxu1 }
 0x15c   :  { %v1126_v3 = vsel %vm845_vm1, %v6079_v1, 0  ;;  %v5105_v42 = vpop.f32.mrb[22].mxu1 }
 0x15d   :  { %v391_v8 = vadd.f32 %v5100_v7, %v119_v6  ;;  %v383_v11 = vadd.f32 %v382_v9, %v119_v6  ;;  %v394_v14 = vadd.f32 %v5101_v13, %v119_v6  ;;  %v386_v18 = vadd.f32 %v385_v15, %v119_v6  ;;  %v401_v45 = vpop.f32.mrb[23].mxu1 }
 0x15e   :  { %v407_v28 = vadd.f32 %v5104_v27, %v119_v6  ;;  %v399_v44 = vadd.f32 %v398_v30, %v119_v6  ;;  %v410_v34 = vadd.f32 %v5105_v42, %v119_v6  ;;  %v402_v49 = vadd.f32 %v401_v45, %v119_v6 }
 0x15f   :  { %5127 = vmatmul.mubr.msk.bf16.vlgmr.msra.gmra.mrb[24].mxu1 %vm845_vm1, %v6022_v53  ;;  %v685_v16 = vcombine.low %v383_v11, %v391_v8  ;;  %v686_v17 = vcombine.high %v383_v11, %v391_v8  ;;  %v701_v23 = vcombine.low %v386_v18, %v394_v14  ;;  %v702_v24 = vcombine.high %v386_v18, %v394_v14 }
 0x160   :  { %5109 = vmatmul.mubr.msk.bf16.vlgmr.msra.gmra.mrb[0].mxu0 %vm845_vm1, %v6024_v54  ;;  %5137 = vmatpush3.bf16.xpose.msra.mxu1 %v1080_v32  ;;  %v717_v46 = vcombine.low %v399_v44, %v407_v28  ;;  %v718_v47 = vcombine.high %v399_v44, %v407_v28  ;;  %v733_v10 = vcombine.low %v402_v49, %v410_v34 }
 0x161   :  { %5113 = vmatpush3.bf16.xpose.msra.mxu0 %v896_v55  ;;  %5114 = vmatprep.mubr.msk.bf16.mxu0 %vm5834_vm0, %v5833_v29  ;;  %v693_v19 = vrot.slane %v685_v16, %v5941_v48  ;;  %v700_v20 = vrot.slane %v686_v17, %v5941_v48  ;;  %v709_v26 = vrot.slane %v701_v23, %v5941_v48 }
 0x162   :  { %5138 = vmatprep.mubr.msk.bf16.mxu1 %vm5834_vm0, %v5833_v29  ;;  %5118 = vmatprep.subr.bf16.mxu0 %v5833_v29  ;;  %v716_v35 = vrot.slane %v702_v24, %v5941_v48  ;;  %v725_v52 = vrot.slane %v717_v46, %v5941_v48  ;;  %v732_v21 = vrot.slane %v718_v47, %v5941_v48 }
 0x163   :  { %5148 = vmatprep.subr.bf16.mxu1 %v5833_v29  ;;  %v749_v36 = vcombine.low %v693_v19, %v709_v26  ;;  %v750_v37 = vcombine.high %v693_v19, %v709_v26  ;;  %v734_v32 = vcombine.high %v402_v49, %v410_v34  ;;  %v741_v55 = vrot.slane %v733_v10, %v5941_v48 }
 0x164   :  { %v765_v39 = vcombine.low %v700_v20, %v716_v35  ;;  %v766_v40 = vcombine.high %v700_v20, %v716_v35 }
 0x165   :  { %v782_v5 = vcombine.high %v725_v52, %v741_v55  ;;  %v764_v19 = vrot.slane %v750_v37, %v5964_v25 }
 0x166   :  { %v780_v6 = vrot.slane %v766_v40, %v5964_v25 }
 0x167   :  { %5139 = vmatmul.mubr.msk.bf16.vlgmr.msra.gmra.mrb[28].mxu1 %vm845_vm1, %v6044_v58  ;;  %v796_v20 = vrot.slane %v782_v5, %v5964_v25 }
 0x168   :  { %5115 = vmatmul.mubr.msk.bf16.vlgmr.msra.gmra.mrb[4].mxu0 %vm845_vm1, %v6046_v59  ;;  %5149 = vmatpush3.bf16.xpose.msra.mxu1 %v1172_v41  ;;  %v748_v41 = vrot.slane %v734_v32, %v5941_v48 }
 0x169   :  { %5119 = vmatpush3.bf16.xpose.msra.mxu0 %v942_v60  ;;  %5120 = vmatprep.mubr.msk.bf16.mxu0 %vm5834_vm0, %v5833_v29  ;;  %v757_v60 = vrot.slane %v749_v36, %v5964_v25  ;;  %v6130_v26 = vcombine.low %v764_v19, %v796_v20  ;;  %v6132_v35 = vcombine.high %v764_v19, %v796_v20 }
 0x16a   :  { %5150 = vmatprep.mubr.msk.bf16.mxu1 %vm5834_vm0, %v5833_v29  ;;  %5130 = vmatprep.subr.bf16.mxu0 %v5833_v29  ;;  %v797_v7 = vcombine.low %v732_v21, %v748_v41  ;;  %v798_v8 = vcombine.high %v732_v21, %v748_v41 }
 0x16b   :  { %5160 = vmatprep.subr.bf16.mxu1 %v5833_v29 }
 0x16c   :  { %v805_v11 = vrot.slane %v797_v7, %v5964_v25  ;;  %v812_v13 = vrot.slane %v798_v8, %v5964_v25 }
 0x16e   :  { %v6120_v17 = vcombine.low %v780_v6, %v812_v13  ;;  %v6122_v18 = vcombine.high %v780_v6, %v812_v13 }
 0x16f   :  { %5151 = vmatmul.mubr.msk.bf16.vlgmr.msra.gmra.mrb[32].mxu1 %vm845_vm1, %v6064_v43 }
 0x170   :  { %5121 = vmatmul.mubr.msk.bf16.vlgmr.msra.gmra.mrb[8].mxu0 %vm845_vm1, %v6066_v62  ;;  %5162 = vmatprep.mubr.msk.bf16.mxu1 %vm5834_vm0, %v5833_v29 }
 0x171   :  { %5131 = vmatpush3.bf16.xpose.msra.mxu0 %v1034_v63  ;;  %5132 = vmatprep.mubr.msk.bf16.mxu0 %vm5834_vm0, %v5833_v29  ;;  %v773_v63 = vrot.slane %v765_v39, %v5964_v25 }
 0x172   :  { %5142 = vmatprep.subr.bf16.mxu0 %v5833_v29 }
 0x173   :  { %v6116_v16 = vcombine.low %v773_v63, %v805_v11  ;;  %v6118_v48 = vcombine.high %v773_v63, %v805_v11 }
 0x178   :  { %5133 = vmatmul.mubr.msk.bf16.vlgmr.msra.gmra.mrb[12].mxu0 %vm845_vm1, %v6083_v2 }
 0x179   :  { %5143 = vmatpush3.bf16.xpose.msra.mxu0 %v1126_v3  ;;  %5144 = vmatprep.mubr.msk.bf16.mxu0 %vm5834_vm0, %v5833_v29  ;;  %v781_v3 = vcombine.low %v725_v52, %v741_v55 }
 0x17a   :  { %5154 = vmatprep.subr.bf16.mxu0 %v5833_v29 }
 0x17b   :  { %v789_v9 = vrot.slane %v781_v3, %v5964_v25 }
 0x17d   :  { %v813_v14 = vcombine.low %v757_v60, %v789_v9  ;;  %v814_v15 = vcombine.high %v757_v60, %v789_v9 }
 0x17f   :  { %v6126_v23 = vpack.c.bf16 %v813_v14, %v813_v14  ;;  %v6128_v24 = vpack.c.bf16 %v814_v15, %v814_v15 }
 0x180   :  { %5145 = vmatmul.mubr.msk.bf16.vlgmr.msra.gmra.mrb[16].mxu0 %vm845_vm1, %v6094_v4 }
 0x181   :  { %5156 = vmatprep.mubr.msk.bf16.mxu0 %vm5834_vm0, %v5833_v29  ;;  %v1316_v27 = vsel %vm1314_vm2, %v6126_v23, 0  ;;  %v1362_v28 = vsel %vm1314_vm2, %v6128_v24, 0 }
 0x182   :  { %5155 = vmatpush3.bf16.msra.mxu0 %v1316_v27  ;;  %5161 = vmatpush3.bf16.msra.mxu1 %v1362_v28 }
 0x183   :  { %5166 = vmatprep.subr.bf16.mxu0 %v5833_v29  ;;  %5172 = vmatprep.subr.bf16.mxu1 %v5833_v29 }
 0x232   :  { %v6140_v25 = vpop.f32.mrb[24].mxu1 }
 0x233   :  { %v886_v30 = vpop.f32.mrb[0].mxu0  ;;  %v5128_v36 = vpop.f32.mrb[25].mxu1  ;;  %v1224_v11 = vsel %vm1214_vm3, %v6140_v25, -inf }
 0x234   :  { %v5110_v37 = vpop.f32.mrb[1].mxu0  ;;  %v1027_v39 = vpop.f32.mrb[26].mxu1  ;;  %v1215_v40 = vsel %vm1214_vm3, %v886_v30, -inf }
 0x235   :  { %1216 = vmax.xlane.f32.xlu0 %v1215_v40  ;;  %v889_v42 = vpop.f32.mrb[2].mxu0  ;;  %v5129_v44 = vpop.f32.mrb[27].mxu1 }
 0x236   :  { %v5111_v34 = vpop.f32.mrb[3].mxu0 }
 0x23a   :  { %v6143_v45 = vpop.f32.mrb[28].mxu1 }
 0x23b   :  { %v932_v46 = vpop.f32.mrb[4].mxu0  ;;  %v5140_v47 = vpop.f32.mrb[29].mxu1  ;;  %v1230_v15 = vsel %vm1214_vm3, %v6143_v45, -inf }
 0x23c   :  { %v5116_v49 = vpop.f32.mrb[5].mxu0  ;;  %v1119_v52 = vpop.f32.mrb[30].mxu1  ;;  %v1218_v21 = vsel %vm1214_vm3, %v932_v46, -inf }
 0x23d   :  { %1219 = vmax.xlane.f32.xlu0 %v1218_v21  ;;  %v935_v10 = vpop.f32.mrb[6].mxu0  ;;  %v5141_v32 = vpop.f32.mrb[31].mxu1 }
 0x23e   :  { %v5117_v55 = vpop.f32.mrb[7].mxu0 }
 0x242   :  { %v1208_v41 = vpop.f32.mrb[32].mxu1 }
 0x243   :  { %v978_v60 = vpop.f32.mrb[8].mxu0  ;;  %v5152_v63 = vpop.f32.mrb[33].mxu1  ;;  %v1236_v28 = vsel %vm1214_vm3, %v1208_v41, -inf }
 0x244   :  { %v5122_v3 = vpop.f32.mrb[9].mxu0  ;;  %v1211_v5 = vpop.f32.mrb[34].mxu1  ;;  %v1221_v7 = vsel %vm1214_vm3, %v978_v60, -inf }
 0x245   :  { %1222 = vmax.xlane.f32.xlu1 %v1221_v7  ;;  %v981_v8 = vpop.f32.mrb[10].mxu0  ;;  %v5153_v6 = vpop.f32.mrb[35].mxu1 }
 0x246   :  { %v5123_v9 = vpop.f32.mrb[11].mxu0 }
 0x249   :  { %1225 = vmax.xlane.f32.xlu1 %v1224_v11 }
 0x24b   :  { %v1070_v13 = vpop.f32.mrb[12].mxu0 }
 0x24c   :  { %v5134_v14 = vpop.f32.mrb[13].mxu0  ;;  %v1227_v19 = vsel %vm1214_vm3, %v1070_v13, -inf }
 0x24d   :  { %1231 = vmax.xlane.f32.xlu1 %v1230_v15  ;;  %1228 = vmax.xlane.f32.xlu0 %v1227_v19  ;;  %v1073_v20 = vpop.f32.mrb[14].mxu0 }
 0x24e   :  { %v5135_v27 = vpop.f32.mrb[15].mxu0 }
 0x251   :  { %1237 = vmax.xlane.f32.xlu1 %v1236_v28 }
 0x253   :  { %v1162_v36 = vpop.f32.mrb[16].mxu0 }
 0x254   :  { %v5146_v37 = vpop.f32.mrb[17].mxu0  ;;  %v1233_v39 = vsel %vm1214_vm3, %v1162_v36, -inf }
 0x255   :  { %1234 = vmax.xlane.f32.xlu0 %v1233_v39  ;;  %v1165_v40 = vpop.f32.mrb[18].mxu0 }
 0x256   :  { %v5147_v42 = vpop.f32.mrb[19].mxu0 }
 0x2c2   :  { %v1217_v44 = vpop.xlane.xlu0 %1216 }
 0x2c3   :  { %v1239_v34 = vsub.f32 %v886_v30, %v1217_v44 }
 0x2c5   :  { %v1247_v47 = vmul.f32 1.442695, %v1239_v34 }
 0x2c7   :  { %5567 = vpow2.f32 %v1247_v47 }
 0x2ca   :  { %v1220_v49 = vpop.xlane.xlu0 %1219 }
 0x2cb   :  { %v1240_v52 = vsub.f32 %v932_v46, %v1220_v49 }
 0x2cd   :  { %v1249_v21 = vmul.f32 1.442695, %v1240_v52 }
 0x2cf   :  { %5569 = vpow2.f32 %v1249_v21  ;;  %v6226_v21 = vpack.c.bf16 %v6130_v26, %v6130_v26 }
 0x2d1   :  { %v6154_v10 = vpop.eup %5567  ;;  %v1408_v26 = vsel %vm1314_vm2, %v6226_v21, 0 }
 0x2d2   :  { %v1223_v32 = vpop.xlane.xlu1 %1222  ;;  %v1263_v55 = vsel %vm1214_vm3, %v6154_v10, 0.0 }
 0x2d3   :  { %v1241_v63 = vsub.f32 %v978_v60, %v1223_v32  ;;  %1264 = vadd.xlane.f32.xlu0 %v1263_v55  ;;  %v6232_v32 = vpack.c.bf16 %v6132_v35, %v6132_v35 }
 0x2d5   :  { %v1251_v3 = vmul.f32 1.442695, %v1241_v63 }
 0x2d6   :  { %v1226_v5 = vpop.xlane.xlu1 %1225 }
 0x2d7   :  { %5571 = vpow2.f32 %v1251_v3  ;;  %v1242_v7 = vsub.f32 %v6140_v25, %v1226_v5 }
 0x2d9   :  { %v6159_v30 = vpop.eup %5569  ;;  %v1253_v8 = vmul.f32 1.442695, %v1242_v7 }
 0x2da   :  { %v1232_v6 = vpop.xlane.xlu1 %1231  ;;  %v1229_v46 = vpop.xlane.xlu0 %1228  ;;  %v1266_v9 = vsel %vm1214_vm3, %v6159_v30, 0.0 }
 0x2db   :  { %5573 = vpow2.f32 %v1253_v8  ;;  %v1244_v11 = vsub.f32 %v6143_v45, %v1232_v6  ;;  %v1243_v14 = vsub.f32 %v1070_v13, %v1229_v46  ;;  %1267 = vadd.xlane.f32.xlu1 %v1266_v9  ;;  %v1454_v9 = vsel %vm1314_vm2, %v6232_v32, 0 }
 0x2dd   :  { %v1257_v60 = vmul.f32 1.442695, %v1244_v11  ;;  %v1255_v15 = vmul.f32 1.442695, %v1243_v14 }
 0x2de   :  { %v1238_v19 = vpop.xlane.xlu1 %1237 }
 0x2df   :  { %5575 = vpow2.f32 %v1257_v60  ;;  %v1246_v20 = vsub.f32 %v1208_v41, %v1238_v19 }
 0x2e0   :  { %5577 = vpow2.f32 %v1255_v15 }
 0x2e1   :  { %v6164_v25 = vpop.eup %5571  ;;  %v1261_v27 = vmul.f32 1.442695, %v1246_v20 }
 0x2e2   :  { %v1235_v28 = vpop.xlane.xlu0 %1234  ;;  %v1269_v37 = vsel %vm1214_vm3, %v6164_v25, 0.0 }
 0x2e3   :  { %5579 = vpow2.f32 %v1261_v27  ;;  %v1245_v39 = vsub.f32 %v1162_v36, %v1235_v28  ;;  %1270 = vadd.xlane.f32.xlu0 %v1269_v37  ;;  %v6257_v28 = vpack.c.bf16 %v6118_v48, %v6118_v48 }
 0x2e5   :  { %v6168_v40 = vpop.eup %5573  ;;  %v1259_v45 = vmul.f32 1.442695, %v1245_v39 }
 0x2e6   :  { %v1272_v13 = vsel %vm1214_vm3, %v6168_v40, 0.0 }
 0x2e7   :  { %5581 = vpow2.f32 %v1259_v45  ;;  %1273 = vadd.xlane.f32.xlu1 %v1272_v13 }
 0x2e9   :  { %v6172_v41 = vpop.eup %5575 }
 0x2ea   :  { %v6174_v42 = vpop.eup %5577  ;;  %v1278_v44 = vsel %vm1214_vm3, %v6172_v41, 0.0 }
 0x2eb   :  { %1279 = vadd.xlane.f32.xlu1 %v1278_v44  ;;  %v1275_v36 = vsel %vm1214_vm3, %v6174_v42, 0.0  ;;  %v1546_v44 = vsel %vm1314_vm2, %v6257_v28, 0 }
 0x2ec   :  { %1276 = vadd.xlane.f32.xlu0 %v1275_v36 }
 0x2ed   :  { %v6180_v34 = vpop.eup %5579 }
 0x2ee   :  { %v1284_v47 = vsel %vm1214_vm3, %v6180_v34, 0.0 }
 0x2ef   :  { %1285 = vadd.xlane.f32.xlu1 %v1284_v47  ;;  %v6271_v47 = vpack.c.bf16 %v6120_v17, %v6120_v17 }
 0x2f1   :  { %v6184_v49 = vpop.eup %5581  ;;  %v1592_v17 = vsel %vm1314_vm2, %v6271_v47, 0 }
 0x2f2   :  { %v1281_v52 = vsel %vm1214_vm3, %v6184_v49, 0.0 }
 0x2f3   :  { %1282 = vadd.xlane.f32.xlu0 %v1281_v52 }
 0x300   :  { %1744 = vrot.lane.b32.xlu1 %v6020_v22, %s5837_s2 }
 0x304   :  { %1689 = vrot.lane.b32.xlu1 %v6024_v54, %s5837_s2 }
 0x308   :  { %1741 = vrot.lane.b32.xlu1 %v6046_v59, %s5837_s2 }
 0x309   :  { %1692 = vrot.lane.b32.xlu0 %v6009_v51, %s5837_s2 }
 0x30c   :  { %1848 = vrot.lane.b32.xlu1 %v6007_v50, %s5837_s2 }
 0x30d   :  { %1796 = vrot.lane.b32.xlu0 %v6042_v57, %s5837_s2 }
 0x310   :  { %1845 = vrot.lane.b32.xlu1 %v6022_v53, %s5837_s2 }
 0x311   :  { %1793 = vrot.lane.b32.xlu0 %v6066_v62, %s5837_s2 }
 0x314   :  { %1952 = vrot.lane.b32.xlu1 %v6018_v12, %s5837_s2 }
 0x315   :  { %1900 = vrot.lane.b32.xlu0 %v6062_v61, %s5837_s2 }
 0x318   :  { %1949 = vrot.lane.b32.xlu1 %v6044_v58, %s5837_s2 }
 0x319   :  { %1897 = vrot.lane.b32.xlu0 %v6083_v2, %s5837_s2 }
 0x31c   :  { %2056 = vrot.lane.b32.xlu1 %v6039_v56, %s5837_s2 }
 0x31d   :  { %2004 = vrot.lane.b32.xlu0 %v6079_v1, %s5837_s2 }
 0x320   :  { %2053 = vrot.lane.b32.xlu1 %v6064_v43, %s5837_s2 }
 0x321   :  { %2001 = vrot.lane.b32.xlu0 %v6094_v4, %s5837_s2 }
 0x324   :  { %2250 = vrot.lane.b32.xlu1 %v6128_v24, %s5837_s2 }
 0x325   :  { %2201 = vrot.lane.b32.xlu0 %v6126_v23, %s5837_s2 }
 0x328   :  { %2299 = vrot.lane.b32.xlu1 %v6226_v21, %s5837_s2 }
 0x32c   :  { %2348 = vrot.lane.b32.xlu1 %v6232_v32, %s5837_s2 }
 0x360   :  { %v1265_v55 = vpop.xlane.xlu0 %1264 }
 0x361   :  { %5583 = vrcp.f32 %v1265_v55 }
 0x368   :  { %v1268_v63 = vpop.xlane.xlu1 %1267 }
 0x369   :  { %5585 = vrcp.f32 %v1268_v63 }
 0x36b   :  { %v5584_v3 = vpop.eup %5583 }
 0x36c   :  { %v1295_v5 = vmul.f32 %v5584_v3, %v6154_v10  ;;  %v6280_v3 = vpack.c.bf16 %v6122_v18, %v6122_v18 }
 0x36e   :  { %v1303_v7 = vpack.c.bf16 %v1295_v5, %v1295_v5  ;;  %v1638_v18 = vsel %vm1314_vm2, %v6280_v3, 0 }
 0x370   :  { %5157 = vmatmul.mubr.msk.bf16.vlgmr.msra.gmra.mrb[20].mxu0 %vm1214_vm3, %v1303_v7  ;;  %v1271_v8 = vpop.xlane.xlu0 %1270 }
 0x371   :  { %5167 = vmatpush3.bf16.msra.mxu0 %v1408_v26  ;;  %5587 = vrcp.f32 %v1271_v8  ;;  %5168 = vmatprep.mubr.msk.bf16.mxu0 %vm5834_vm0, %v5833_v29 }
 0x372   :  { %5178 = vmatprep.subr.bf16.mxu0 %v5833_v29 }
 0x373   :  { %v5586_v35 = vpop.eup %5585 }
 0x374   :  { %v1274_v6 = vpop.xlane.xlu1 %1273  ;;  %v1296_v46 = vmul.f32 %v5586_v35, %v6159_v30  ;;  %v6252_v30 = vpack.c.bf16 %v6116_v16, %v6116_v16 }
 0x375   :  { %5589 = vrcp.f32 %v1274_v6 }
 0x376   :  { %v1304_v10 = vpack.c.bf16 %v1296_v46, %v1296_v46  ;;  %v1500_v39 = vsel %vm1314_vm2, %v6252_v30, 0 }
 0x378   :  { %5163 = vmatmul.mubr.msk.bf16.vlgmr.msra.gmra.mrb[36].mxu1 %vm1214_vm3, %v1304_v10  ;;  %v1280_v11 = vpop.xlane.xlu1 %1279 }
 0x379   :  { %5173 = vmatpush3.bf16.msra.mxu1 %v1454_v9  ;;  %5591 = vrcp.f32 %v1280_v11  ;;  %v1277_v14 = vpop.xlane.xlu0 %1276  ;;  %5174 = vmatprep.mubr.msk.bf16.mxu1 %vm5834_vm0, %v5833_v29 }
 0x37a   :  { %5593 = vrcp.f32 %v1277_v14  ;;  %5184 = vmatprep.subr.bf16.mxu1 %v5833_v29 }
 0x37b   :  { %v5588_v60 = vpop.eup %5587 }
 0x37c   :  { %v1286_v15 = vpop.xlane.xlu1 %1285  ;;  %v1297_v19 = vmul.f32 %v5588_v60, %v6164_v25 }
 0x37d   :  { %5595 = vrcp.f32 %v1286_v15 }
 0x37e   :  { %v1305_v20 = vpack.c.bf16 %v1297_v19, %v1297_v19 }
 0x37f   :  { %v5590_v27 = vpop.eup %5589 }
 0x380   :  { %v1745_v37 = vpop.permute.xlu1 %1744  ;;  %5169 = vmatmul.mubr.msk.bf16.vlgmr.msra.gmra.mrb[24].mxu0 %vm1214_vm3, %v1305_v20  ;;  %v1283_v45 = vpop.xlane.xlu0 %1282  ;;  %v1298_v16 = vmul.f32 %v5590_v27, %v6168_v40 }
 0x381   :  { %5179 = vmatpush3.bf16.msra.mxu0 %v1500_v39  ;;  %5597 = vrcp.f32 %v1283_v45  ;;  %5180 = vmatprep.mubr.msk.bf16.mxu0 %vm5834_vm0, %v5833_v29  ;;  %v1750_v14 = vsel %vm845_vm1, %v1745_v37, 0 }
 0x382   :  { %v1306_v25 = vpack.c.bf16 %v1298_v16, %v1298_v16  ;;  %5190 = vmatprep.subr.bf16.mxu0 %v5833_v29 }
 0x383   :  { %v5592_v48 = vpop.eup %5591 }
 0x384   :  { %v5594_v13 = vpop.eup %5593  ;;  %5175 = vmatmul.mubr.msk.bf16.vlgmr.msra.gmra.mrb[40].mxu1 %vm1214_vm3, %v1306_v25  ;;  %v1690_v36 = vpop.permute.xlu1 %1689  ;;  %v1300_v55 = vmul.f32 %v5592_v48, %v6172_v41 }
 0x385   :  { %5185 = vmatpush3.bf16.msra.mxu1 %v1546_v44  ;;  %v1693_v40 = vpop.permute.xlu0 %1692  ;;  %v1299_v52 = vmul.f32 %v5594_v13, %v6174_v42  ;;  %5186 = vmatprep.mubr.msk.bf16.mxu1 %vm5834_vm0, %v5833_v29 }
 0x386   :  { %5196 = vmatprep.subr.bf16.mxu1 %v5833_v29  ;;  %v1308_v42 = vpack.c.bf16 %v1300_v55, %v1300_v55  ;;  %v1698_v9 = vsel %vm845_vm1, %v1693_v40, 0 }
 0x387   :  { %v1307_v63 = vpack.c.bf16 %v1299_v52, %v1299_v52  ;;  %v5596_v7 = vpop.eup %5595 }
 0x388   :  { %v1742_v5 = vpop.permute.xlu1 %1741  ;;  %v1302_v46 = vmul.f32 %v5596_v7, %v6180_v34 }
 0x389   :  { %5181 = vmatmul.mubr.msk.bf16.vlgmr.msra.gmra.mrb[28].mxu0 %vm1214_vm3, %v1307_v63  ;;  %v1797_v8 = vpop.permute.xlu0 %1796 }
 0x38a   :  { %5191 = vmatpush3.bf16.msra.mxu0 %v1592_v17  ;;  %5192 = vmatprep.mubr.msk.bf16.mxu0 %vm5834_vm0, %v5833_v29  ;;  %v1310_v11 = vpack.c.bf16 %v1302_v46, %v1302_v46  ;;  %v1802_v60 = vsel %vm845_vm1, %v1797_v8, 0 }
 0x38b   :  { %v5598_v26 = vpop.eup %5597  ;;  %5202 = vmatprep.subr.bf16.mxu0 %v5833_v29 }
 0x38c   :  { %5187 = vmatmul.mubr.msk.bf16.vlgmr.msra.gmra.mrb[44].mxu1 %vm1214_vm3, %v1308_v42  ;;  %v1301_v41 = vmul.f32 %v5598_v26, %v6184_v49  ;;  %v1849_v35 = vpop.permute.xlu1 %1848 }
 0x38d   :  { %5197 = vmatpush3.bf16.msra.mxu1 %v1638_v18  ;;  %5198 = vmatprep.mubr.msk.bf16.mxu1 %vm5834_vm0, %v5833_v29  ;;  %v1794_v10 = vpop.permute.xlu0 %1793  ;;  %v1854_v19 = vsel %vm845_vm1, %v1849_v35, 0 }
 0x38e   :  { %v1309_v6 = vpack.c.bf16 %v1301_v41, %v1301_v41  ;;  %5208 = vmatprep.subr.bf16.mxu1 %v5833_v29 }
 0x390   :  { %v1846_v49 = vpop.permute.xlu1 %1845 }
 0x391   :  { %5193 = vmatmul.mubr.msk.bf16.vlgmr.msra.gmra.mrb[32].mxu0 %vm1214_vm3, %v1309_v6  ;;  %v1901_v34 = vpop.permute.xlu0 %1900 }
 0x392   :  { %5204 = vmatprep.mubr.msk.bf16.mxu0 %vm5834_vm0, %v5833_v29  ;;  %v1906_v37 = vsel %vm845_vm1, %v1901_v34, 0 }
 0x393   :  { %5203 = vmatpush3.bf16.xpose.msra.mxu0 %v1698_v9 }
 0x394   :  { %5199 = vmatmul.mubr.msk.bf16.vlgmr.msra.gmra.mrb[48].mxu1 %vm1214_vm3, %v1310_v11  ;;  %5214 = vmatprep.subr.bf16.mxu0 %v5833_v29  ;;  %v1953_v15 = vpop.permute.xlu1 %1952 }
 0x395   :  { %5210 = vmatprep.mubr.msk.bf16.mxu1 %vm5834_vm0, %v5833_v29  ;;  %v1898_v20 = vpop.permute.xlu0 %1897  ;;  %v1958_v45 = vsel %vm845_vm1, %v1953_v15, 0 }
 0x396   :  { %5209 = vmatpush3.bf16.xpose.msra.mxu1 %v1750_v14 }
 0x397   :  { %5220 = vmatprep.subr.bf16.mxu1 %v5833_v29 }
 0x398   :  { %v1950_v27 = vpop.permute.xlu1 %1949 }
 0x399   :  { %v2005_v39 = vpop.permute.xlu0 %2004 }
 0x39a   :  { %5205 = vmatmul.mubr.msk.bf16.vlgmr.msra.gmra.mrb[36].mxu0 %vm845_vm1, %v1690_v36  ;;  %v2010_v48 = vsel %vm845_vm1, %v2005_v39, 0 }
 0x39b   :  { %5215 = vmatpush3.bf16.xpose.msra.mxu0 %v1802_v60  ;;  %5216 = vmatprep.mubr.msk.bf16.mxu0 %vm5834_vm0, %v5833_v29 }
 0x39c   :  { %5226 = vmatprep.subr.bf16.mxu0 %v5833_v29  ;;  %v2057_v16 = vpop.permute.xlu1 %2056 }
 0x39d   :  { %5211 = vmatmul.mubr.msk.bf16.vlgmr.msra.gmra.mrb[52].mxu1 %vm845_vm1, %v1742_v5  ;;  %v2002_v25 = vpop.permute.xlu0 %2001  ;;  %v2062_v44 = vsel %vm845_vm1, %v2057_v16, 0 }
 0x39e   :  { %5221 = vmatpush3.bf16.xpose.msra.mxu1 %v1854_v19  ;;  %5222 = vmatprep.mubr.msk.bf16.mxu1 %vm5834_vm0, %v5833_v29 }
 0x39f   :  { %5232 = vmatprep.subr.bf16.mxu1 %v5833_v29 }
 0x3a0   :  { %v2054_v13 = vpop.permute.xlu1 %2053 }
 0x3a1   :  { %v2202_v36 = vpop.permute.xlu0 %2201 }
 0x3a2   :  { %5217 = vmatmul.mubr.msk.bf16.vlgmr.msra.gmra.mrb[40].mxu0 %vm845_vm1, %v1794_v10  ;;  %v2207_v40 = vsel %vm1314_vm2, %v2202_v36, 0 }
 0x3a3   :  { %5227 = vmatpush3.bf16.xpose.msra.mxu0 %v1906_v37  ;;  %5228 = vmatprep.mubr.msk.bf16.mxu0 %vm5834_vm0, %v5833_v29 }
 0x3a4   :  { %5238 = vmatprep.subr.bf16.mxu0 %v5833_v29  ;;  %v2251_v52 = vpop.permute.xlu1 %2250 }
 0x3a5   :  { %5223 = vmatmul.mubr.msk.bf16.vlgmr.msra.gmra.mrb[56].mxu1 %vm845_vm1, %v1846_v49  ;;  %v2256_v55 = vsel %vm1314_vm2, %v2251_v52, 0 }
 0x3a6   :  { %5233 = vmatpush3.bf16.xpose.msra.mxu1 %v1958_v45  ;;  %5234 = vmatprep.mubr.msk.bf16.mxu1 %vm5834_vm0, %v5833_v29 }
 0x3a7   :  { %5244 = vmatprep.subr.bf16.mxu1 %v5833_v29 }
 0x3aa   :  { %5229 = vmatmul.mubr.msk.bf16.vlgmr.msra.gmra.mrb[44].mxu0 %vm845_vm1, %v1898_v20 }
 0x3ab   :  { %5239 = vmatpush3.bf16.xpose.msra.mxu0 %v2010_v48  ;;  %5240 = vmatprep.mubr.msk.bf16.mxu0 %vm5834_vm0, %v5833_v29 }
 0x3ac   :  { %5250 = vmatprep.subr.bf16.mxu0 %v5833_v29 }
 0x3ad   :  { %5235 = vmatmul.mubr.msk.bf16.vlgmr.msra.gmra.mrb[60].mxu1 %vm845_vm1, %v1950_v27 }
 0x3ae   :  { %5245 = vmatpush3.bf16.xpose.msra.mxu1 %v2062_v44  ;;  %5246 = vmatprep.mubr.msk.bf16.mxu1 %vm5834_vm0, %v5833_v29 }
 0x3af   :  { %5256 = vmatprep.subr.bf16.mxu1 %v5833_v29 }
 0x3b2   :  { %5241 = vmatmul.mubr.msk.bf16.vlgmr.msra.gmra.mrb[48].mxu0 %vm845_vm1, %v2002_v25 }
 0x3b3   :  { %5251 = vmatpush3.bf16.msra.mxu0 %v2207_v40  ;;  %5252 = vmatprep.mubr.msk.bf16.mxu0 %vm5834_vm0, %v5833_v29 }
 0x3b4   :  { %5262 = vmatprep.subr.bf16.mxu0 %v5833_v29 }
 0x3b5   :  { %5247 = vmatmul.mubr.msk.bf16.vlgmr.msra.gmra.mrb[64].mxu1 %vm845_vm1, %v2054_v13 }
 0x3b6   :  { %5257 = vmatpush3.bf16.msra.mxu1 %v2256_v55  ;;  %5258 = vmatprep.mubr.msk.bf16.mxu1 %vm5834_vm0, %v5833_v29 }
 0x3b7   :  { %5268 = vmatprep.subr.bf16.mxu1 %v5833_v29 }
 0x443   :  { %v6346_v63 = vpop.f32.mrb[20].mxu0 }
 0x444   :  { %v5158_v5 = vpop.f32.mrb[21].mxu0 }
 0x445   :  { %v1355_v17 = vpop.f32.mrb[22].mxu0 }
 0x446   :  { %v5159_v7 = vpop.f32.mrb[23].mxu0 }
 0x44b   :  { %v6348_v42 = vpop.f32.mrb[36].mxu1 }
 0x44c   :  { %v5164_v26 = vpop.f32.mrb[37].mxu1 }
 0x44d   :  { %v1401_v8 = vpop.f32.mrb[38].mxu1 }
 0x44e   :  { %v5165_v18 = vpop.f32.mrb[39].mxu1 }
 0x453   :  { %v6350_v41 = vpop.f32.mrb[24].mxu0 }
 0x454   :  { %v5170_v35 = vpop.f32.mrb[25].mxu0 }
 0x455   :  { %v1447_v6 = vpop.f32.mrb[26].mxu0 }
 0x456   :  { %v5171_v46 = vpop.f32.mrb[27].mxu0 }
 0x457   :  { %v6352_v10 = vpop.f32.mrb[40].mxu1 }
 0x458   :  { %v5176_v9 = vpop.f32.mrb[41].mxu1 }
 0x459   :  { %v1493_v11 = vpop.f32.mrb[42].mxu1 }
 0x45a   :  { %v5177_v49 = vpop.f32.mrb[43].mxu1 }
 0x45c   :  { %v6354_v14 = vpop.f32.mrb[28].mxu0 }
 0x45d   :  { %v5182_v34 = vpop.f32.mrb[29].mxu0 }
 0x45e   :  { %v1539_v60 = vpop.f32.mrb[30].mxu0 }
 0x45f   :  { %v5183_v15 = vpop.f32.mrb[31].mxu0  ;;  %v6356_v19 = vpop.f32.mrb[44].mxu1 }
 0x460   :  { %v5188_v20 = vpop.f32.mrb[45].mxu1 }
 0x461   :  { %v1585_v27 = vpop.f32.mrb[46].mxu1 }
 0x462   :  { %v5189_v37 = vpop.f32.mrb[47].mxu1 }
 0x464   :  { %v6358_v39 = vpop.f32.mrb[32].mxu0 }
 0x465   :  { %v5194_v45 = vpop.f32.mrb[33].mxu0 }
 0x466   :  { %v1631_v16 = vpop.f32.mrb[34].mxu0 }
 0x467   :  { %v5195_v25 = vpop.f32.mrb[35].mxu0  ;;  %v6360_v48 = vpop.f32.mrb[48].mxu1 }
 0x468   :  { %v5200_v13 = vpop.f32.mrb[49].mxu1 }
 0x469   :  { %v1677_v44 = vpop.f32.mrb[50].mxu1 }
 0x46a   :  { %v5201_v36 = vpop.f32.mrb[51].mxu1 }
 0x46d   :  { %v1734_v40 = vpop.f32.mrb[36].mxu0 }
 0x46e   :  { %v5206_v52 = vpop.f32.mrb[37].mxu0  ;;  %v2104_v55 = vsel %vm1214_vm3, %v1734_v40, -inf }
 0x46f   :  { %2105 = vmax.xlane.f32.xlu0 %v2104_v55  ;;  %v1737_v5 = vpop.f32.mrb[38].mxu0 }
 0x470   :  { %v5207_v17 = vpop.f32.mrb[39].mxu0  ;;  %v1786_v7 = vpop.f32.mrb[52].mxu1 }
 0x471   :  { %v5212_v26 = vpop.f32.mrb[53].mxu1  ;;  %v2107_v8 = vsel %vm1214_vm3, %v1786_v7, -inf }
 0x472   :  { %2108 = vmax.xlane.f32.xlu1 %v2107_v8  ;;  %v1789_v18 = vpop.f32.mrb[54].mxu1 }
 0x473   :  { %v5213_v35 = vpop.f32.mrb[55].mxu1 }
 0x475   :  { %v1838_v6 = vpop.f32.mrb[40].mxu0 }
 0x476   :  { %v5218_v46 = vpop.f32.mrb[41].mxu0  ;;  %v2110_v9 = vsel %vm1214_vm3, %v1838_v6, -inf }
 0x477   :  { %2111 = vmax.xlane.f32.xlu0 %v2110_v9  ;;  %v1841_v11 = vpop.f32.mrb[42].mxu0 }
 0x478   :  { %v5219_v49 = vpop.f32.mrb[43].mxu0  ;;  %v1890_v34 = vpop.f32.mrb[56].mxu1 }
 0x479   :  { %v5224_v60 = vpop.f32.mrb[57].mxu1  ;;  %v2113_v15 = vsel %vm1214_vm3, %v1890_v34, -inf }
 0x47a   :  { %v1893_v20 = vpop.f32.mrb[58].mxu1 }
 0x47b   :  { %2114 = vmax.xlane.f32.xlu0 %v2113_v15  ;;  %v5225_v27 = vpop.f32.mrb[59].mxu1  ;;  %v6377_v15 = vpop.permute.xlu1 %2299 }
 0x47d   :  { %v1942_v37 = vpop.f32.mrb[44].mxu0 }
 0x47e   :  { %v5230_v45 = vpop.f32.mrb[45].mxu0  ;;  %v2116_v16 = vsel %vm1214_vm3, %v1942_v37, -inf }
 0x47f   :  { %2117 = vmax.xlane.f32.xlu0 %v2116_v16  ;;  %v1945_v25 = vpop.f32.mrb[46].mxu0  ;;  %v6379_v20 = vpop.permute.xlu1 %2348 }
 0x480   :  { %v5231_v13 = vpop.f32.mrb[47].mxu0  ;;  %v1994_v44 = vpop.f32.mrb[60].mxu1 }
 0x481   :  { %v5236_v36 = vpop.f32.mrb[61].mxu1  ;;  %v2119_v52 = vsel %vm1214_vm3, %v1994_v44, -inf }
 0x482   :  { %2120 = vmax.xlane.f32.xlu1 %v2119_v52  ;;  %v1997_v55 = vpop.f32.mrb[62].mxu1 }
 0x483   :  { %v5237_v5 = vpop.f32.mrb[63].mxu1 }
 0x485   :  { %v2046_v17 = vpop.f32.mrb[48].mxu0 }
 0x486   :  { %v5242_v26 = vpop.f32.mrb[49].mxu0  ;;  %v2122_v8 = vsel %vm1214_vm3, %v2046_v17, -inf }
 0x487   :  { %2123 = vmax.xlane.f32.xlu0 %v2122_v8  ;;  %v2049_v18 = vpop.f32.mrb[50].mxu0 }
 0x488   :  { %v5243_v35 = vpop.f32.mrb[51].mxu0  ;;  %v6369_v46 = vpop.f32.mrb[64].mxu1 }
 0x489   :  { %v5248_v9 = vpop.f32.mrb[65].mxu1  ;;  %v2125_v60 = vsel %vm1214_vm3, %v6369_v46, -inf }
 0x48a   :  { %v2101_v11 = vpop.f32.mrb[66].mxu1 }
 0x48b   :  { %v5249_v49 = vpop.f32.mrb[67].mxu1 }
 0x493   :  { %2446 = vrot.lane.b32.xlu1 %v6257_v28, %s5837_s2 }
 0x49d   :  { %2397 = vrot.lane.b32.xlu0 %v6252_v30, %s5837_s2 }
 0x4b7   :  { %2126 = vmax.xlane.f32.xlu1 %v2125_v60 }
 0x4fc   :  { %v2106_v27 = vpop.xlane.xlu0 %2105 }
 0x4fd   :  { %v2128_v45 = vsub.f32 %v1734_v40, %v2106_v27 }
 0x4ff   :  { %v2136_v16 = vmul.f32 1.442695, %v2128_v45  ;;  %v2109_v25 = vpop.xlane.xlu1 %2108 }
 0x500   :  { %v2129_v13 = vsub.f32 %v1786_v7, %v2109_v25 }
 0x501   :  { %5599 = vpow2.f32 %v2136_v16 }
 0x502   :  { %v2138_v36 = vmul.f32 1.442695, %v2129_v13 }
 0x504   :  { %5601 = vpow2.f32 %v2138_v36  ;;  %v2112_v52 = vpop.xlane.xlu0 %2111 }
 0x505   :  { %v2130_v55 = vsub.f32 %v1838_v6, %v2112_v52 }
 0x507   :  { %v2140_v5 = vmul.f32 1.442695, %v2130_v55 }
 0x508   :  { %v2115_v26 = vpop.xlane.xlu0 %2114 }
 0x509   :  { %5603 = vpow2.f32 %v2140_v5  ;;  %v2131_v8 = vsub.f32 %v1890_v34, %v2115_v26 }
 0x50b   :  { %v6381_v18 = vpop.eup %5599  ;;  %v2142_v35 = vmul.f32 1.442695, %v2131_v8 }
 0x50c   :  { %v2118_v9 = vpop.xlane.xlu0 %2117  ;;  %v2152_v11 = vsel %vm1214_vm3, %v6381_v18, 0.0 }
 0x50d   :  { %5605 = vpow2.f32 %v2142_v35  ;;  %v2132_v40 = vsub.f32 %v1942_v37, %v2118_v9  ;;  %2153 = vadd.xlane.f32.xlu0 %v2152_v11 }
 0x50e   :  { %v6385_v7 = vpop.eup %5601 }
 0x50f   :  { %v2144_v49 = vmul.f32 1.442695, %v2132_v40  ;;  %v2155_v6 = vsel %vm1214_vm3, %v6385_v7, 0.0  ;;  %v2121_v25 = vpop.xlane.xlu1 %2120 }
 0x510   :  { %2156 = vadd.xlane.f32.xlu1 %v2155_v6  ;;  %v2133_v13 = vsub.f32 %v1994_v44, %v2121_v25 }
 0x511   :  { %5607 = vpow2.f32 %v2144_v49 }
 0x512   :  { %v2146_v52 = vmul.f32 1.442695, %v2133_v13 }
 0x513   :  { %v6389_v60 = vpop.eup %5603  ;;  %v6415_v44 = vpop.permute.xlu1 %2446 }
 0x514   :  { %v2158_v34 = vsel %vm1214_vm3, %v6389_v60, 0.0  ;;  %v2124_v36 = vpop.xlane.xlu0 %2123  ;;  %5609 = vpow2.f32 %v2146_v52 }
 0x515   :  { %2159 = vadd.xlane.f32.xlu0 %v2158_v34  ;;  %v2134_v55 = vsub.f32 %v2046_v17, %v2124_v36 }
 0x517   :  { %v6393_v27 = vpop.eup %5605  ;;  %v2148_v5 = vmul.f32 1.442695, %v2134_v55 }
 0x518   :  { %v2161_v37 = vsel %vm1214_vm3, %v6393_v27, 0.0  ;;  %v2398_v6 = vpop.permute.xlu0 %2397 }
 0x519   :  { %2162 = vadd.xlane.f32.xlu1 %v2161_v37  ;;  %5611 = vpow2.f32 %v2148_v5 }
 0x51b   :  { %v6397_v45 = vpop.eup %5607 }
 0x51c   :  { %v2164_v16 = vsel %vm1214_vm3, %v6397_v45, 0.0 }
 0x51d   :  { %2165 = vadd.xlane.f32.xlu0 %v2164_v16 }
 0x51e   :  { %v6405_v26 = vpop.eup %5609 }
 0x51f   :  { %v2167_v8 = vsel %vm1214_vm3, %v6405_v26, 0.0 }
 0x523   :  { %v6409_v35 = vpop.eup %5611 }
 0x524   :  { %v2170_v9 = vsel %vm1214_vm3, %v6409_v35, 0.0 }
 0x52a   :  { %2544 = vrot.lane.b32.xlu1 %v6280_v3, %s5837_s2 }
 0x533   :  { %2495 = vrot.lane.b32.xlu0 %v6271_v47, %s5837_s2 }
 0x544   :  { %v2127_v17 = vpop.xlane.xlu1 %2126 }
 0x545   :  { %v2135_v11 = vsub.f32 %v6369_v46, %v2127_v17 }
 0x547   :  { %v2150_v40 = vmul.f32 1.442695, %v2135_v11 }
 0x549   :  { %5613 = vpow2.f32 %v2150_v40 }
 0x54e   :  { %2168 = vadd.xlane.f32.xlu1 %v2167_v8  ;;  %v2305_v8 = vsel %vm1314_vm2, %v6377_v15, 0 }
 0x552   :  { %2171 = vadd.xlane.f32.xlu0 %v2170_v9 }
 0x553   :  { %v6430_v49 = vpop.eup %5613 }
 0x554   :  { %v2173_v46 = vsel %vm1214_vm3, %v6430_v49, 0.0 }
 0x55f   :  { %2652 = vrot.lane.b32.xlu1 %v6020_v22, %s5827_s1 }
 0x568   :  { %2602 = vrot.lane.b32.xlu0 %v6009_v51, %s5827_s1 }
 0x56c   :  { %2600 = vrot.lane.b32.xlu0 %v6024_v54, %s5827_s1 }
 0x570   :  { %2702 = vrot.lane.b32.xlu0 %v6042_v57, %s5827_s1 }
 0x574   :  { %2700 = vrot.lane.b32.xlu0 %v6066_v62, %s5827_s1 }
 0x578   :  { %2802 = vrot.lane.b32.xlu0 %v6062_v61, %s5827_s1 }
 0x57c   :  { %2800 = vrot.lane.b32.xlu0 %v6083_v2, %s5827_s1 }
 0x580   :  { %2902 = vrot.lane.b32.xlu0 %v6079_v1, %s5827_s1 }
 0x583   :  { %2174 = vadd.xlane.f32.xlu1 %v2173_v46  ;;  %v2403_v46 = vsel %vm1314_vm2, %v2398_v6, 0 }
 0x584   :  { %2900 = vrot.lane.b32.xlu0 %v6094_v4, %s5827_s1 }
 0x588   :  { %3096 = vrot.lane.b32.xlu0 %v6126_v23, %s5827_s1 }
 0x594   :  { %2650 = vrot.lane.b32.xlu1 %v6046_v59, %s5827_s1 }
 0x598   :  { %2752 = vrot.lane.b32.xlu1 %v6007_v50, %s5827_s1 }
 0x59a   :  { %v2154_v34 = vpop.xlane.xlu0 %2153 }
 0x59b   :  { %5615 = vrcp.f32 %v2154_v34 }
 0x59c   :  { %2750 = vrot.lane.b32.xlu1 %v6022_v53, %s5827_s1 }
 0x59d   :  { %v2157_v37 = vpop.xlane.xlu1 %2156 }
 0x59e   :  { %5617 = vrcp.f32 %v2157_v37  ;;  %v2452_v37 = vsel %vm1314_vm2, %v6415_v44, 0 }
 0x5a0   :  { %2852 = vrot.lane.b32.xlu1 %v6018_v12, %s5827_s1 }
 0x5a2   :  { %v2160_v16 = vpop.xlane.xlu0 %2159 }
 0x5a3   :  { %5619 = vrcp.f32 %v2160_v16 }
 0x5a4   :  { %2850 = vrot.lane.b32.xlu1 %v6044_v58, %s5827_s1 }
 0x5a5   :  { %v5616_v25 = vpop.eup %5615 }
 0x5a6   :  { %v2163_v13 = vpop.xlane.xlu1 %2162  ;;  %v2184_v36 = vmul.f32 %v5616_v25, %v6381_v18 }
 0x5a7   :  { %5621 = vrcp.f32 %v2163_v13 }
 0x5a8   :  { %v5618_v52 = vpop.eup %5617  ;;  %2952 = vrot.lane.b32.xlu1 %v6039_v56, %s5827_s1  ;;  %v2192_v55 = vpack.c.bf16 %v2184_v36, %v2184_v36 }
 0x5a9   :  { %v2185_v5 = vmul.f32 %v5618_v52, %v6385_v7  ;;  %v2354_v7 = vsel %vm1314_vm2, %v6379_v20, 0 }
 0x5aa   :  { %5253 = vmatmul.mubr.msk.bf16.vlgmr.msra.gmra.mrb[52].mxu0 %vm1214_vm3, %v2192_v55  ;;  %v2166_v9 = vpop.xlane.xlu0 %2165 }
 0x5ab   :  { %5263 = vmatpush3.bf16.msra.mxu0 %v2305_v8  ;;  %5623 = vrcp.f32 %v2166_v9  ;;  %v2193_v17 = vpack.c.bf16 %v2185_v5, %v2185_v5  ;;  %5264 = vmatprep.mubr.msk.bf16.mxu0 %vm5834_vm0, %v5833_v29 }
 0x5ac   :  { %2950 = vrot.lane.b32.xlu1 %v6064_v43, %s5827_s1  ;;  %5274 = vmatprep.subr.bf16.mxu0 %v5833_v29 }
 0x5ad   :  { %v5620_v18 = vpop.eup %5619  ;;  %5259 = vmatmul.mubr.msk.bf16.vlgmr.msra.gmra.mrb[68].mxu1 %vm1214_vm3, %v2193_v17 }
 0x5ae   :  { %5269 = vmatpush3.bf16.msra.mxu1 %v2354_v7  ;;  %v2186_v15 = vmul.f32 %v5620_v18, %v6389_v60  ;;  %5270 = vmatprep.mubr.msk.bf16.mxu1 %vm5834_vm0, %v5833_v29  ;;  %v2496_v16 = vpop.permute.xlu0 %2495 }
 0x5af   :  { %5280 = vmatprep.subr.bf16.mxu1 %v5833_v29  ;;  %v2501_v25 = vsel %vm1314_vm2, %v2496_v16, 0 }
 0x5b0   :  { %3144 = vrot.lane.b32.xlu1 %v6128_v24, %s5827_s1  ;;  %v2194_v11 = vpack.c.bf16 %v2186_v15, %v2186_v15 }
 0x5b1   :  { %v5622_v40 = vpop.eup %5621 }
 0x5b2   :  { %5265 = vmatmul.mubr.msk.bf16.vlgmr.msra.gmra.mrb[56].mxu0 %vm1214_vm3, %v2194_v11  ;;  %v2187_v20 = vmul.f32 %v5622_v40, %v6393_v27 }
 0x5b3   :  { %5275 = vmatpush3.bf16.msra.mxu0 %v2403_v46  ;;  %5276 = vmatprep.mubr.msk.bf16.mxu0 %vm5834_vm0, %v5833_v29 }
 0x5b4   :  { %3192 = vrot.lane.b32.xlu1 %v6226_v21, %s5827_s1  ;;  %v2195_v60 = vpack.c.bf16 %v2187_v20, %v2187_v20  ;;  %5286 = vmatprep.subr.bf16.mxu0 %v5833_v29 }
 0x5b5   :  { %v5624_v34 = vpop.eup %5623 }
 0x5b6   :  { %5271 = vmatmul.mubr.msk.bf16.vlgmr.msra.gmra.mrb[72].mxu1 %vm1214_vm3, %v2195_v60  ;;  %v2188_v6 = vmul.f32 %v5624_v34, %v6397_v45  ;;  %v2545_v45 = vpop.permute.xlu1 %2544 }
 0x5b7   :  { %5281 = vmatpush3.bf16.msra.mxu1 %v2452_v37  ;;  %5282 = vmatprep.mubr.msk.bf16.mxu1 %vm5834_vm0, %v5833_v29  ;;  %v2550_v17 = vsel %vm1314_vm2, %v2545_v45, 0 }
 0x5b8   :  { %3240 = vrot.lane.b32.xlu1 %v6232_v32, %s5827_s1  ;;  %v2196_v27 = vpack.c.bf16 %v2188_v6, %v2188_v6  ;;  %5292 = vmatprep.subr.bf16.mxu1 %v5833_v29 }
 0x5ba   :  { %5277 = vmatmul.mubr.msk.bf16.vlgmr.msra.gmra.mrb[60].mxu0 %vm1214_vm3, %v2196_v27 }
 0x5bb   :  { %5287 = vmatpush3.bf16.msra.mxu0 %v2501_v25  ;;  %5288 = vmatprep.mubr.msk.bf16.mxu0 %vm5834_vm0, %v5833_v29 }
 0x5bc   :  { %5298 = vmatprep.subr.bf16.mxu0 %v5833_v29 }
 0x5db   :  { %v2169_v44 = vpop.xlane.xlu1 %2168 }
 0x5dc   :  { %5625 = vrcp.f32 %v2169_v44 }
 0x5df   :  { %v2172_v13 = vpop.xlane.xlu0 %2171  ;;  %v2653_v6 = vpop.permute.xlu1 %2652 }
 0x5e0   :  { %5627 = vrcp.f32 %v2172_v13 }
 0x5e3   :  { %v2603_v36 = vpop.permute.xlu0 %2602 }
 0x5e4   :  { %v2608_v11 = vsel %vm845_vm1, %v2603_v36, 0 }
 0x5e6   :  { %v5626_v52 = vpop.eup %5625 }
 0x5e7   :  { %v2601_v55 = vpop.permute.xlu0 %2600  ;;  %v2189_v5 = vmul.f32 %v5626_v52, %v6405_v26 }
 0x5e9   :  { %v2197_v8 = vpack.c.bf16 %v2189_v5, %v2189_v5  ;;  %v2658_v5 = vsel %vm845_vm1, %v2653_v6, 0 }
 0x5ea   :  { %v5628_v9 = vpop.eup %5627 }
 0x5eb   :  { %5283 = vmatmul.mubr.msk.bf16.vlgmr.msra.gmra.mrb[76].mxu1 %vm1214_vm3, %v2197_v8  ;;  %v2703_v18 = vpop.permute.xlu0 %2702  ;;  %v2190_v7 = vmul.f32 %v5628_v9, %v6409_v35 }
 0x5ec   :  { %5293 = vmatpush3.bf16.msra.mxu1 %v2550_v17  ;;  %5294 = vmatprep.mubr.msk.bf16.mxu1 %vm5834_vm0, %v5833_v29  ;;  %v2708_v35 = vsel %vm845_vm1, %v2703_v18, 0 }
 0x5ed   :  { %v2198_v15 = vpack.c.bf16 %v2190_v7, %v2190_v7  ;;  %5304 = vmatprep.subr.bf16.mxu1 %v5833_v29 }
 0x5ef   :  { %5289 = vmatmul.mubr.msk.bf16.vlgmr.msra.gmra.mrb[64].mxu0 %vm1214_vm3, %v2198_v15  ;;  %v2701_v26 = vpop.permute.xlu0 %2700 }
 0x5f0   :  { %5299 = vmatpush3.bf16.xpose.msra.mxu0 %v2608_v11  ;;  %5300 = vmatprep.mubr.msk.bf16.mxu0 %vm5834_vm0, %v5833_v29 }
 0x5f1   :  { %5310 = vmatprep.subr.bf16.mxu0 %v5833_v29 }
 0x5f3   :  { %v2803_v40 = vpop.permute.xlu0 %2802 }
 0x5f4   :  { %v2808_v20 = vsel %vm845_vm1, %v2803_v40, 0 }
 0x5f7   :  { %5301 = vmatmul.mubr.msk.bf16.vlgmr.msra.gmra.mrb[68].mxu0 %vm845_vm1, %v2601_v55  ;;  %v2801_v46 = vpop.permute.xlu0 %2800 }
 0x5f8   :  { %5311 = vmatpush3.bf16.xpose.msra.mxu0 %v2708_v35  ;;  %5312 = vmatprep.mubr.msk.bf16.mxu0 %vm5834_vm0, %v5833_v29 }
 0x5f9   :  { %5322 = vmatprep.subr.bf16.mxu0 %v5833_v29 }
 0x5fb   :  { %v2903_v60 = vpop.permute.xlu0 %2902 }
 0x5fc   :  { %v2908_v37 = vsel %vm845_vm1, %v2903_v60, 0 }
 0x5ff   :  { %5313 = vmatmul.mubr.msk.bf16.vlgmr.msra.gmra.mrb[72].mxu0 %vm845_vm1, %v2701_v26  ;;  %v2901_v34 = vpop.permute.xlu0 %2900 }
 0x600   :  { %5323 = vmatpush3.bf16.xpose.msra.mxu0 %v2808_v20  ;;  %5324 = vmatprep.mubr.msk.bf16.mxu0 %vm5834_vm0, %v5833_v29 }
 0x601   :  { %5334 = vmatprep.subr.bf16.mxu0 %v5833_v29 }
 0x603   :  { %v3097_v16 = vpop.permute.xlu0 %3096 }
 0x604   :  { %v3102_v27 = vsel %vm1314_vm2, %v3097_v16, 0 }
 0x607   :  { %5325 = vmatmul.mubr.msk.bf16.vlgmr.msra.gmra.mrb[76].mxu0 %vm845_vm1, %v2801_v46 }
 0x608   :  { %5335 = vmatpush3.bf16.xpose.msra.mxu0 %v2908_v37  ;;  %5336 = vmatprep.mubr.msk.bf16.mxu0 %vm5834_vm0, %v5833_v29 }
 0x609   :  { %5346 = vmatprep.subr.bf16.mxu0 %v5833_v29 }
 0x60f   :  { %5337 = vmatmul.mubr.msk.bf16.vlgmr.msra.gmra.mrb[80].mxu0 %vm845_vm1, %v2901_v34 }
 0x610   :  { %5347 = vmatpush3.bf16.msra.mxu0 %v3102_v27  ;;  %v2175_v25 = vpop.xlane.xlu1 %2174  ;;  %5348 = vmatprep.mubr.msk.bf16.mxu0 %vm5834_vm0, %v5833_v29 }
 0x611   :  { %5629 = vrcp.f32 %v2175_v25  ;;  %5358 = vmatprep.subr.bf16.mxu0 %v5833_v29 }
 0x614   :  { %v2651_v45 = vpop.permute.xlu1 %2650 }
 0x618   :  { %v2753_v44 = vpop.permute.xlu1 %2752 }
 0x619   :  { %v2758_v9 = vsel %vm845_vm1, %v2753_v44, 0 }
 0x61b   :  { %v5630_v13 = vpop.eup %5629 }
 0x61c   :  { %v2191_v36 = vmul.f32 %v5630_v13, %v6430_v49  ;;  %v2751_v55 = vpop.permute.xlu1 %2750 }
 0x61e   :  { %v2199_v52 = vpack.c.bf16 %v2191_v36, %v2191_v36 }
 0x620   :  { %5295 = vmatmul.mubr.msk.bf16.vlgmr.msra.gmra.mrb[80].mxu1 %vm1214_vm3, %v2199_v52  ;;  %v2853_v8 = vpop.permute.xlu1 %2852 }
 0x621   :  { %5305 = vmatpush3.bf16.xpose.msra.mxu1 %v2658_v5  ;;  %5306 = vmatprep.mubr.msk.bf16.mxu1 %vm5834_vm0, %v5833_v29  ;;  %v2858_v17 = vsel %vm845_vm1, %v2853_v8, 0 }
 0x622   :  { %5316 = vmatprep.subr.bf16.mxu1 %v5833_v29 }
 0x624   :  { %v2851_v49 = vpop.permute.xlu1 %2850 }
 0x628   :  { %5307 = vmatmul.mubr.msk.bf16.vlgmr.msra.gmra.mrb[84].mxu1 %vm845_vm1, %v2651_v45  ;;  %v2953_v18 = vpop.permute.xlu1 %2952 }
 0x629   :  { %5317 = vmatpush3.bf16.xpose.msra.mxu1 %v2758_v9  ;;  %5318 = vmatprep.mubr.msk.bf16.mxu1 %vm5834_vm0, %v5833_v29  ;;  %v2958_v15 = vsel %vm845_vm1, %v2953_v18, 0 }
 0x62a   :  { %5328 = vmatprep.subr.bf16.mxu1 %v5833_v29 }
 0x62c   :  { %v2951_v7 = vpop.permute.xlu1 %2950 }
 0x630   :  { %5319 = vmatmul.mubr.msk.bf16.vlgmr.msra.gmra.mrb[88].mxu1 %vm845_vm1, %v2751_v55  ;;  %v3145_v11 = vpop.permute.xlu1 %3144 }
 0x631   :  { %5329 = vmatpush3.bf16.xpose.msra.mxu1 %v2858_v17  ;;  %5330 = vmatprep.mubr.msk.bf16.mxu1 %vm5834_vm0, %v5833_v29  ;;  %v3150_v26 = vsel %vm1314_vm2, %v3145_v11, 0 }
 0x632   :  { %5340 = vmatprep.subr.bf16.mxu1 %v5833_v29 }
 0x638   :  { %5331 = vmatmul.mubr.msk.bf16.vlgmr.msra.gmra.mrb[92].mxu1 %vm845_vm1, %v2851_v49 }
 0x639   :  { %5341 = vmatpush3.bf16.xpose.msra.mxu1 %v2958_v15  ;;  %5342 = vmatprep.mubr.msk.bf16.mxu1 %vm5834_vm0, %v5833_v29 }
 0x63a   :  { %5352 = vmatprep.subr.bf16.mxu1 %v5833_v29 }
 0x640   :  { %5343 = vmatmul.mubr.msk.bf16.vlgmr.msra.gmra.mrb[96].mxu1 %vm845_vm1, %v2951_v7 }
 0x641   :  { %5353 = vmatpush3.bf16.msra.mxu1 %v3150_v26  ;;  %5354 = vmatprep.mubr.msk.bf16.mxu1 %vm5834_vm0, %v5833_v29 }
 0x642   :  { %5364 = vmatprep.subr.bf16.mxu1 %v5833_v29 }
 0x67d   :  { %v6551_v40 = vpop.f32.mrb[52].mxu0 }
 0x67e   :  { %v5254_v35 = vpop.f32.mrb[53].mxu0 }
 0x67f   :  { %v2246_v46 = vpop.f32.mrb[54].mxu0 }
 0x680   :  { %v5255_v20 = vpop.f32.mrb[55].mxu0  ;;  %v6553_v60 = vpop.f32.mrb[68].mxu1 }
 0x681   :  { %v5260_v34 = vpop.f32.mrb[69].mxu1 }
 0x682   :  { %v2295_v37 = vpop.f32.mrb[70].mxu1 }
 0x683   :  { %v5261_v6 = vpop.f32.mrb[71].mxu1 }
 0x685   :  { %v6555_v16 = vpop.f32.mrb[56].mxu0 }
 0x686   :  { %v5266_v27 = vpop.f32.mrb[57].mxu0 }
 0x687   :  { %v2344_v25 = vpop.f32.mrb[58].mxu0 }
 0x688   :  { %v5267_v45 = vpop.f32.mrb[59].mxu0 }
 0x689   :  { %v6557_v44 = vpop.f32.mrb[72].mxu1 }
 0x68a   :  { %v5272_v13 = vpop.f32.mrb[73].mxu1 }
 0x68b   :  { %v2393_v36 = vpop.f32.mrb[74].mxu1 }
 0x68c   :  { %v5273_v52 = vpop.f32.mrb[75].mxu1 }
 0x68d   :  { %v6559_v55 = vpop.f32.mrb[60].mxu0 }
 0x68e   :  { %v5278_v5 = vpop.f32.mrb[61].mxu0 }
 0x68f   :  { %v2442_v8 = vpop.f32.mrb[62].mxu0 }
 0x690   :  { %v5279_v9 = vpop.f32.mrb[63].mxu0 }
 0x6be   :  { %v6561_v49 = vpop.f32.mrb[76].mxu1 }
 0x6bf   :  { %v5284_v17 = vpop.f32.mrb[77].mxu1 }
 0x6c0   :  { %v2491_v18 = vpop.f32.mrb[78].mxu1 }
 0x6c1   :  { %v5285_v7 = vpop.f32.mrb[79].mxu1 }
 0x6c2   :  { %v6563_v15 = vpop.f32.mrb[64].mxu0 }
 0x6c3   :  { %v5290_v11 = vpop.f32.mrb[65].mxu0 }
 0x6c4   :  { %v2540_v26 = vpop.f32.mrb[66].mxu0 }
 0x6c5   :  { %v5291_v35 = vpop.f32.mrb[67].mxu0 }
 0x6ca   :  { %v2644_v46 = vpop.f32.mrb[68].mxu0 }
 0x6cb   :  { %v5302_v20 = vpop.f32.mrb[69].mxu0  ;;  %v3000_v34 = vsel %vm1214_vm3, %v2644_v46, -inf }
 0x6cc   :  { %3001 = vmax.xlane.f32.xlu0 %v3000_v34  ;;  %v2647_v37 = vpop.f32.mrb[70].mxu0 }
 0x6cd   :  { %v5303_v6 = vpop.f32.mrb[71].mxu0 }
 0x6d2   :  { %v2744_v27 = vpop.f32.mrb[72].mxu0 }
 0x6d3   :  { %v5314_v25 = vpop.f32.mrb[73].mxu0  ;;  %v3006_v45 = vsel %vm1214_vm3, %v2744_v27, -inf }
 0x6d4   :  { %3007 = vmax.xlane.f32.xlu0 %v3006_v45  ;;  %v2747_v13 = vpop.f32.mrb[74].mxu0 }
 0x6d5   :  { %v5315_v36 = vpop.f32.mrb[75].mxu0 }
 0x6da   :  { %v6567_v52 = vpop.f32.mrb[76].mxu0 }
 0x6db   :  { %v5326_v5 = vpop.f32.mrb[77].mxu0 }
 0x6dc   :  { %v2847_v8 = vpop.f32.mrb[78].mxu0 }
 0x6dd   :  { %v5327_v9 = vpop.f32.mrb[79].mxu0 }
 0x6e2   :  { %v6569_v17 = vpop.f32.mrb[80].mxu0 }
 0x6e3   :  { %v5338_v18 = vpop.f32.mrb[81].mxu0 }
 0x6e4   :  { %v2947_v7 = vpop.f32.mrb[82].mxu0 }
 0x6e5   :  { %v5339_v11 = vpop.f32.mrb[83].mxu0  ;;  %v3012_v7 = vsel %vm1214_vm3, %v6567_v52, -inf }
 0x6f3   :  { %v6571_v26 = vpop.f32.mrb[80].mxu1 }
 0x6f4   :  { %v5296_v35 = vpop.f32.mrb[81].mxu1 }
 0x6f5   :  { %v2589_v20 = vpop.f32.mrb[82].mxu1 }
 0x6f6   :  { %v5297_v34 = vpop.f32.mrb[83].mxu1 }
 0x6f7   :  { %v3018_v34 = vsel %vm1214_vm3, %v6569_v17, -inf }
 0x6fb   :  { %v2694_v37 = vpop.f32.mrb[84].mxu1 }
 0x6fc   :  { %v5308_v6 = vpop.f32.mrb[85].mxu1  ;;  %v3003_v25 = vsel %vm1214_vm3, %v2694_v37, -inf }
 0x6fd   :  { %3004 = vmax.xlane.f32.xlu1 %v3003_v25  ;;  %v2697_v45 = vpop.f32.mrb[86].mxu1 }
 0x6fe   :  { %v5309_v13 = vpop.f32.mrb[87].mxu1 }
 0x703   :  { %v2794_v36 = vpop.f32.mrb[88].mxu1 }
 0x704   :  { %v5320_v5 = vpop.f32.mrb[89].mxu1  ;;  %v3009_v8 = vsel %vm1214_vm3, %v2794_v36, -inf }
 0x705   :  { %v2797_v9 = vpop.f32.mrb[90].mxu1  ;;  %3010 = vmax.xlane.f32.xlu0 %v3009_v8 }
 0x706   :  { %v5321_v18 = vpop.f32.mrb[91].mxu1 }
 0x709   :  { %3013 = vmax.xlane.f32.xlu0 %v3012_v7 }
 0x70b   :  { %v2894_v11 = vpop.f32.mrb[92].mxu1 }
 0x70c   :  { %v5332_v35 = vpop.f32.mrb[93].mxu1  ;;  %v3015_v20 = vsel %vm1214_vm3, %v2894_v11, -inf }
 0x70d   :  { %3016 = vmax.xlane.f32.xlu1 %v3015_v20  ;;  %v2897_v6 = vpop.f32.mrb[94].mxu1  ;;  %3019 = vmax.xlane.f32.xlu0 %v3018_v34 }
 0x70e   :  { %v5333_v25 = vpop.f32.mrb[95].mxu1 }
 0x713   :  { %v6580_v45 = vpop.f32.mrb[96].mxu1 }
 0x714   :  { %v5344_v13 = vpop.f32.mrb[97].mxu1  ;;  %v3021_v9 = vsel %vm1214_vm3, %v6580_v45, -inf }
 0x715   :  { %v2997_v5 = vpop.f32.mrb[98].mxu1 }
 0x716   :  { %v5345_v8 = vpop.f32.mrb[99].mxu1 }
 0x71e   :  { %3336 = vrot.lane.b32.xlu1 %v6257_v28, %s5827_s1 }
 0x723   :  { %3288 = vrot.lane.b32.xlu0 %v6252_v30, %s5827_s1 }
 0x742   :  { %3022 = vmax.xlane.f32.xlu1 %v3021_v9  ;;  %v3193_v9 = vpop.permute.xlu1 %3192 }
 0x759   :  { %v3002_v18 = vpop.xlane.xlu0 %3001 }
 0x75a   :  { %v3024_v7 = vsub.f32 %v2644_v46, %v3002_v18  ;;  %v6596_v46 = vpop.permute.xlu1 %3240 }
 0x75c   :  { %v3032_v35 = vmul.f32 1.442695, %v3024_v7 }
 0x75e   :  { %5631 = vpow2.f32 %v3032_v35 }
 0x761   :  { %v3008_v20 = vpop.xlane.xlu0 %3007 }
 0x762   :  { %v3026_v34 = vsub.f32 %v2744_v27, %v3008_v20 }
 0x764   :  { %v3036_v6 = vmul.f32 1.442695, %v3026_v34 }
 0x766   :  { %5633 = vpow2.f32 %v3036_v6 }
 0x768   :  { %v6588_v25 = vpop.eup %5631 }
 0x769   :  { %v3048_v13 = vsel %vm1214_vm3, %v6588_v25, 0.0 }
 0x76a   :  { %3049 = vadd.xlane.f32.xlu0 %v3048_v13 }
 0x770   :  { %v6592_v5 = vpop.eup %5633 }
 0x771   :  { %v3054_v8 = vsel %vm1214_vm3, %v6592_v5, 0.0 }
 0x772   :  { %3055 = vadd.xlane.f32.xlu0 %v3054_v8 }
 0x78a   :  { %v3005_v18 = vpop.xlane.xlu1 %3004 }
 0x78b   :  { %v3025_v7 = vsub.f32 %v2694_v37, %v3005_v18 }
 0x78d   :  { %v3034_v27 = vmul.f32 1.442695, %v3025_v7 }
 0x78f   :  { %5635 = vpow2.f32 %v3034_v27 }
 0x792   :  { %v3011_v35 = vpop.xlane.xlu0 %3010 }
 0x793   :  { %v3027_v20 = vsub.f32 %v2794_v36, %v3011_v35 }
 0x795   :  { %v3038_v34 = vmul.f32 1.442695, %v3027_v20 }
 0x796   :  { %v3014_v6 = vpop.xlane.xlu0 %3013 }
 0x797   :  { %5637 = vpow2.f32 %v3038_v34  ;;  %v3028_v13 = vsub.f32 %v6567_v52, %v3014_v6 }
 0x799   :  { %v6599_v33 = vpop.eup %5635  ;;  %v3040_v38 = vmul.f32 1.442695, %v3028_v13 }
 0x79a   :  { %v3051_v8 = vsel %vm1214_vm3, %v6599_v33, 0.0  ;;  %v3020_v7 = vpop.xlane.xlu0 %3019 }
 0x79b   :  { %5639 = vpow2.f32 %v3040_v38  ;;  %3052 = vadd.xlane.f32.xlu1 %v3051_v8  ;;  %v3017_v38 = vpop.xlane.xlu1 %3016  ;;  %v3030_v35 = vsub.f32 %v6569_v17, %v3020_v7 }
 0x79c   :  { %v3029_v52 = vsub.f32 %v2894_v11, %v3017_v38 }
 0x79d   :  { %v3044_v20 = vmul.f32 1.442695, %v3030_v35 }
 0x79e   :  { %v3042_v27 = vmul.f32 1.442695, %v3029_v52  ;;  %v3289_v11 = vpop.permute.xlu0 %3288 }
 0x79f   :  { %v3337_v17 = vpop.permute.xlu1 %3336 }
 0x7a0   :  { %5641 = vpow2.f32 %v3042_v27  ;;  %v3342_v35 = vsel %vm1314_vm2, %v3337_v17, 0 }
 0x7a1   :  { %v6603_v0 = vpop.eup %5637  ;;  %5643 = vpow2.f32 %v3044_v20 }
 0x7a2   :  { %v3057_v37 = vsel %vm1214_vm3, %v6603_v0, 0.0 }
 0x7a3   :  { %3058 = vadd.xlane.f32.xlu1 %v3057_v37 }
 0x7a5   :  { %v6607_v36 = vpop.eup %5639 }
 0x7a6   :  { %v3060_v18 = vsel %vm1214_vm3, %v6607_v36, 0.0 }
 0x7a7   :  { %3061 = vadd.xlane.f32.xlu0 %v3060_v18 }
 0x7aa   :  { %v6616_v34 = vpop.eup %5641 }
 0x7ab   :  { %v3063_v6 = vsel %vm1214_vm3, %v6616_v34, 0.0  ;;  %v6620_v13 = vpop.eup %5643 }
 0x7ac   :  { %v3066_v8 = vsel %vm1214_vm3, %v6620_v13, 0.0 }
 0x7b4   :  { %3432 = vrot.lane.b32.xlu1 %v6280_v3, %s5827_s1 }
 0x7bd   :  { %3384 = vrot.lane.b32.xlu0 %v6271_v47, %s5827_s1 }
 0x7cf   :  { %v3023_v37 = vpop.xlane.xlu1 %3022 }
 0x7d0   :  { %v3031_v18 = vsub.f32 %v6580_v45, %v3023_v37  ;;  %v3198_v45 = vsel %vm1314_vm2, %v3193_v9, 0  ;;  %v3294_v9 = vsel %vm1314_vm2, %v3289_v11, 0 }
 0x7d2   :  { %v3046_v52 = vmul.f32 1.442695, %v3031_v18 }
 0x7d8   :  { %3064 = vadd.xlane.f32.xlu1 %v3063_v6 }
 0x7dc   :  { %3067 = vadd.xlane.f32.xlu0 %v3066_v8 }
 0x7e9   :  { %3540 = vrot.lane.b32.xlu1 %v6020_v22, %s5838_s14 }
 0x7f2   :  { %3490 = vrot.lane.b32.xlu0 %v6009_v51, %s5838_s14 }
 0x7f6   :  { %3488 = vrot.lane.b32.xlu0 %v6024_v54, %s5838_s14 }
 0x7f7   :  { %v3050_v38 = vpop.xlane.xlu0 %3049 }
 0x7f8   :  { %5645 = vrcp.f32 %v3050_v38 }
 0x7f9   :  { %5647 = vpow2.f32 %v3046_v52 }
 0x7fa   :  { %3590 = vrot.lane.b32.xlu0 %v6042_v57, %s5838_s14 }
 0x7fe   :  { %3588 = vrot.lane.b32.xlu0 %v6066_v62, %s5838_s14 }
 0x7ff   :  { %v3056_v22 = vpop.xlane.xlu0 %3055 }
 0x800   :  { %5649 = vrcp.f32 %v3056_v22 }
 0x802   :  { %v5646_v51 = vpop.eup %5645  ;;  %3690 = vrot.lane.b32.xlu0 %v6062_v61, %s5838_s14 }
 0x803   :  { %v3080_v54 = vmul.f32 %v5646_v51, %v6588_v25  ;;  %v6644_v57 = vpop.eup %5647 }
 0x805   :  { %v3088_v7 = vpack.c.bf16 %v3080_v54, %v3080_v54 }
 0x806   :  { %3688 = vrot.lane.b32.xlu0 %v6083_v2, %s5838_s14  ;;  %v3069_v2 = vsel %vm1214_vm3, %v6644_v57, 0.0 }
 0x807   :  { %5349 = vmatmul.mubr.msk.bf16.vlgmr.msra.gmra.mrb[84].mxu0 %vm1214_vm3, %v3088_v7 }
 0x808   :  { %5359 = vmatpush3.bf16.msra.mxu0 %v3198_v45  ;;  %5360 = vmatprep.mubr.msk.bf16.mxu0 %vm5834_vm0, %v5833_v29 }
 0x809   :  { %5370 = vmatprep.subr.bf16.mxu0 %v5833_v29 }
 0x80a   :  { %v5650_v62 = vpop.eup %5649  ;;  %3790 = vrot.lane.b32.xlu0 %v6079_v1, %s5838_s14 }
 0x80b   :  { %v3082_v61 = vmul.f32 %v5650_v62, %v6592_v5 }
 0x80d   :  { %3070 = vadd.xlane.f32.xlu1 %v3069_v2  ;;  %v3090_v25 = vpack.c.bf16 %v3082_v61, %v3082_v61 }
 0x80e   :  { %3788 = vrot.lane.b32.xlu0 %v6094_v4, %s5838_s14 }
 0x80f   :  { %5361 = vmatmul.mubr.msk.bf16.vlgmr.msra.gmra.mrb[88].mxu0 %vm1214_vm3, %v3090_v25 }
 0x810   :  { %5371 = vmatpush3.bf16.msra.mxu0 %v3294_v9  ;;  %5372 = vmatprep.mubr.msk.bf16.mxu0 %vm5834_vm0, %v5833_v29 }
 0x811   :  { %5382 = vmatprep.subr.bf16.mxu0 %v5833_v29 }
 0x81e   :  { %3538 = vrot.lane.b32.xlu1 %v6046_v59, %s5838_s14 }
 0x822   :  { %3640 = vrot.lane.b32.xlu1 %v6007_v50, %s5838_s14 }
 0x826   :  { %3638 = vrot.lane.b32.xlu1 %v6022_v53, %s5838_s14 }
 0x828   :  { %v3053_v1 = vpop.xlane.xlu1 %3052 }
 0x829   :  { %5651 = vrcp.f32 %v3053_v1 }
 0x82a   :  { %3740 = vrot.lane.b32.xlu1 %v6018_v12, %s5838_s14  ;;  %v3246_v12 = vsel %vm1314_vm2, %v6596_v46, 0 }
 0x82e   :  { %3738 = vrot.lane.b32.xlu1 %v6044_v58, %s5838_s14 }
 0x830   :  { %v3059_v4 = vpop.xlane.xlu1 %3058 }
 0x831   :  { %5653 = vrcp.f32 %v3059_v4 }
 0x832   :  { %3840 = vrot.lane.b32.xlu1 %v6039_v56, %s5838_s14 }
 0x833   :  { %v5652_v59 = vpop.eup %5651 }
 0x834   :  { %v3081_v5 = vmul.f32 %v5652_v59, %v6599_v33  ;;  %v3062_v50 = vpop.xlane.xlu0 %3061 }
 0x835   :  { %5655 = vrcp.f32 %v3062_v50 }
 0x836   :  { %3838 = vrot.lane.b32.xlu1 %v6064_v43, %s5838_s14  ;;  %v3089_v53 = vpack.c.bf16 %v3081_v5, %v3081_v5 }
 0x838   :  { %5355 = vmatmul.mubr.msk.bf16.vlgmr.msra.gmra.mrb[100].mxu1 %vm1214_vm3, %v3089_v53  ;;  %v3385_v46 = vpop.permute.xlu0 %3384 }
 0x839   :  { %5365 = vmatpush3.bf16.msra.mxu1 %v3246_v12  ;;  %5366 = vmatprep.mubr.msk.bf16.mxu1 %vm5834_vm0, %v5833_v29  ;;  %v3390_v6 = vsel %vm1314_vm2, %v3385_v46, 0 }
 0x83a   :  { %5376 = vmatprep.subr.bf16.mxu1 %v5833_v29 }
 0x83b   :  { %v5654_v56 = vpop.eup %5653 }
 0x83c   :  { %v3083_v33 = vmul.f32 %v5654_v56, %v6603_v0  ;;  %v3433_v0 = vpop.permute.xlu1 %3432 }
 0x83d   :  { %v3438_v22 = vsel %vm1314_vm2, %v3433_v0, 0 }
 0x83e   :  { %v3091_v58 = vpack.c.bf16 %v3083_v33, %v3083_v33 }
 0x83f   :  { %v5656_v27 = vpop.eup %5655 }
 0x840   :  { %v3084_v43 = vmul.f32 %v5656_v27, %v6607_v36  ;;  %5367 = vmatmul.mubr.msk.bf16.vlgmr.msra.gmra.mrb[104].mxu1 %vm1214_vm3, %v3091_v58 }
 0x841   :  { %5377 = vmatpush3.bf16.msra.mxu1 %v3342_v35  ;;  %5378 = vmatprep.mubr.msk.bf16.mxu1 %vm5834_vm0, %v5833_v29 }
 0x842   :  { %v3092_v20 = vpack.c.bf16 %v3084_v43, %v3084_v43  ;;  %5388 = vmatprep.subr.bf16.mxu1 %v5833_v29 }
 0x844   :  { %5373 = vmatmul.mubr.msk.bf16.vlgmr.msra.gmra.mrb[92].mxu0 %vm1214_vm3, %v3092_v20 }
 0x845   :  { %5383 = vmatpush3.bf16.msra.mxu0 %v3390_v6  ;;  %5384 = vmatprep.mubr.msk.bf16.mxu0 %vm5834_vm0, %v5833_v29 }
 0x846   :  { %5394 = vmatprep.subr.bf16.mxu0 %v5833_v29 }
 0x865   :  { %v3065_v36 = vpop.xlane.xlu1 %3064 }
 0x866   :  { %5657 = vrcp.f32 %v3065_v36 }
 0x869   :  { %v3068_v8 = vpop.xlane.xlu0 %3067  ;;  %v3541_v1 = vpop.permute.xlu1 %3540 }
 0x86a   :  { %5659 = vrcp.f32 %v3068_v8  ;;  %v3546_v33 = vsel %vm845_vm1, %v3541_v1, 0 }
 0x86d   :  { %v3491_v17 = vpop.permute.xlu0 %3490 }
 0x86e   :  { %v3496_v45 = vsel %vm845_vm1, %v3491_v17, 0 }
 0x870   :  { %v5658_v11 = vpop.eup %5657 }
 0x871   :  { %v3085_v37 = vmul.f32 %v5658_v11, %v6616_v34  ;;  %v3489_v18 = vpop.permute.xlu0 %3488 }
 0x873   :  { %v3093_v38 = vpack.c.bf16 %v3085_v37, %v3085_v37 }
 0x874   :  { %v5660_v52 = vpop.eup %5659 }
 0x875   :  { %v3086_v51 = vmul.f32 %v5660_v52, %v6620_v13  ;;  %5379 = vmatmul.mubr.msk.bf16.vlgmr.msra.gmra.mrb[108].mxu1 %vm1214_vm3, %v3093_v38  ;;  %v3591_v54 = vpop.permute.xlu0 %3590 }
 0x876   :  { %5389 = vmatpush3.bf16.msra.mxu1 %v3438_v22  ;;  %5390 = vmatprep.mubr.msk.bf16.mxu1 %vm5834_vm0, %v5833_v29  ;;  %v3596_v13 = vsel %vm845_vm1, %v3591_v54, 0 }
 0x877   :  { %v3094_v7 = vpack.c.bf16 %v3086_v51, %v3086_v51  ;;  %5400 = vmatprep.subr.bf16.mxu1 %v5833_v29 }
 0x879   :  { %5385 = vmatmul.mubr.msk.bf16.vlgmr.msra.gmra.mrb[96].mxu0 %vm1214_vm3, %v3094_v7  ;;  %v3589_v34 = vpop.permute.xlu0 %3588 }
 0x87a   :  { %5395 = vmatpush3.bf16.xpose.msra.mxu0 %v3496_v45  ;;  %5396 = vmatprep.mubr.msk.bf16.mxu0 %vm5834_vm0, %v5833_v29 }
 0x87b   :  { %5406 = vmatprep.subr.bf16.mxu0 %v5833_v29 }
 0x87d   :  { %v3691_v62 = vpop.permute.xlu0 %3690 }
 0x87e   :  { %v3696_v2 = vsel %vm845_vm1, %v3691_v62, 0 }
 0x881   :  { %5397 = vmatmul.mubr.msk.bf16.vlgmr.msra.gmra.mrb[100].mxu0 %vm845_vm1, %v3489_v18  ;;  %v3689_v61 = vpop.permute.xlu0 %3688 }
 0x882   :  { %5407 = vmatpush3.bf16.xpose.msra.mxu0 %v3596_v13  ;;  %5408 = vmatprep.mubr.msk.bf16.mxu0 %vm5834_vm0, %v5833_v29 }
 0x883   :  { %5418 = vmatprep.subr.bf16.mxu0 %v5833_v29 }
 0x885   :  { %v3791_v25 = vpop.permute.xlu0 %3790 }
 0x886   :  { %v3796_v9 = vsel %vm845_vm1, %v3791_v25, 0 }
 0x889   :  { %5409 = vmatmul.mubr.msk.bf16.vlgmr.msra.gmra.mrb[104].mxu0 %vm845_vm1, %v3589_v34  ;;  %v3789_v4 = vpop.permute.xlu0 %3788 }
 0x88a   :  { %5419 = vmatpush3.bf16.xpose.msra.mxu0 %v3696_v2  ;;  %5420 = vmatprep.mubr.msk.bf16.mxu0 %vm5834_vm0, %v5833_v29 }
 0x88b   :  { %5430 = vmatprep.subr.bf16.mxu0 %v5833_v29 }
 0x891   :  { %5421 = vmatmul.mubr.msk.bf16.vlgmr.msra.gmra.mrb[108].mxu0 %vm845_vm1, %v3689_v61 }
 0x892   :  { %5431 = vmatpush3.bf16.xpose.msra.mxu0 %v3796_v9  ;;  %5432 = vmatprep.mubr.msk.bf16.mxu0 %vm5834_vm0, %v5833_v29 }
 0x893   :  { %5442 = vmatprep.subr.bf16.mxu0 %v5833_v29 }
 0x899   :  { %5433 = vmatmul.mubr.msk.bf16.vlgmr.msra.gmra.mrb[112].mxu0 %vm845_vm1, %v3789_v4 }
 0x89a   :  { %v3071_v59 = vpop.xlane.xlu1 %3070  ;;  %5444 = vmatprep.mubr.msk.bf16.mxu0 %vm5834_vm0, %v5833_v29 }
 0x89b   :  { %5661 = vrcp.f32 %v3071_v59 }
 0x89e   :  { %v3539_v5 = vpop.permute.xlu1 %3538 }
 0x8a2   :  { %v3641_v12 = vpop.permute.xlu1 %3640 }
 0x8a3   :  { %v3646_v27 = vsel %vm845_vm1, %v3641_v12, 0 }
 0x8a5   :  { %v5662_v50 = vpop.eup %5661 }
 0x8a6   :  { %v3087_v53 = vmul.f32 %v5662_v50, %v6644_v57  ;;  %v3639_v58 = vpop.permute.xlu1 %3638 }
 0x8a8   :  { %v3095_v56 = vpack.c.bf16 %v3087_v53, %v3087_v53 }
 0x8aa   :  { %5391 = vmatmul.mubr.msk.bf16.vlgmr.msra.gmra.mrb[112].mxu1 %vm1214_vm3, %v3095_v56  ;;  %v3741_v35 = vpop.permute.xlu1 %3740 }
 0x8ab   :  { %5401 = vmatpush3.bf16.xpose.msra.mxu1 %v3546_v33  ;;  %5402 = vmatprep.mubr.msk.bf16.mxu1 %vm5834_vm0, %v5833_v29  ;;  %v3746_v43 = vsel %vm845_vm1, %v3741_v35, 0 }
 0x8ac   :  { %5412 = vmatprep.subr.bf16.mxu1 %v5833_v29 }
 0x8ae   :  { %v3739_v57 = vpop.permute.xlu1 %3738 }
 0x8b2   :  { %5403 = vmatmul.mubr.msk.bf16.vlgmr.msra.gmra.mrb[116].mxu1 %vm845_vm1, %v3539_v5  ;;  %v3841_v46 = vpop.permute.xlu1 %3840 }
 0x8b3   :  { %5413 = vmatpush3.bf16.xpose.msra.mxu1 %v3646_v27  ;;  %5414 = vmatprep.mubr.msk.bf16.mxu1 %vm5834_vm0, %v5833_v29  ;;  %v3846_v20 = vsel %vm845_vm1, %v3841_v46, 0 }
 0x8b4   :  { %5424 = vmatprep.subr.bf16.mxu1 %v5833_v29 }
 0x8b6   :  { %v3839_v6 = vpop.permute.xlu1 %3838 }
 0x8ba   :  { %5415 = vmatmul.mubr.msk.bf16.vlgmr.msra.gmra.mrb[120].mxu1 %vm845_vm1, %v3639_v58 }
 0x8bb   :  { %5425 = vmatpush3.bf16.xpose.msra.mxu1 %v3746_v43  ;;  %5426 = vmatprep.mubr.msk.bf16.mxu1 %vm5834_vm0, %v5833_v29 }
 0x8bc   :  { %5436 = vmatprep.subr.bf16.mxu1 %v5833_v29 }
 0x8c2   :  { %5427 = vmatmul.mubr.msk.bf16.vlgmr.msra.gmra.mrb[124].mxu1 %vm845_vm1, %v3739_v57 }
 0x8c3   :  { %5437 = vmatpush3.bf16.xpose.msra.mxu1 %v3846_v20  ;;  %5438 = vmatprep.mubr.msk.bf16.mxu1 %vm5834_vm0, %v5833_v29 }
 0x8c4   :  { %5448 = vmatprep.subr.bf16.mxu1 %v5833_v29 }
 0x8ca   :  { %5439 = vmatmul.mubr.msk.bf16.vlgmr.msra.gmra.mrb[128].mxu1 %vm845_vm1, %v3839_v6 }
 0x8cb   :  { %5450 = vmatprep.mubr.msk.bf16.mxu1 %vm5834_vm0, %v5833_v29 }
 0x8da   :  { %v6746_v0 = vpop.f32.mrb[84].mxu0 }
 0x8db   :  { %v5350_v36 = vpop.f32.mrb[85].mxu0 }
 0x8dc   :  { %v3141_v8 = vpop.f32.mrb[86].mxu0 }
 0x8dd   :  { %v5351_v17 = vpop.f32.mrb[87].mxu0 }
 0x8e2   :  { %v6748_v11 = vpop.f32.mrb[88].mxu0 }
 0x8e3   :  { %v5362_v37 = vpop.f32.mrb[89].mxu0 }
 0x8e4   :  { %v3237_v18 = vpop.f32.mrb[90].mxu0 }
 0x8e5   :  { %v5363_v38 = vpop.f32.mrb[91].mxu0 }
 0x90b   :  { %v6750_v52 = vpop.f32.mrb[100].mxu1 }
 0x90c   :  { %v5356_v22 = vpop.f32.mrb[101].mxu1 }
 0x90d   :  { %v3189_v51 = vpop.f32.mrb[102].mxu1 }
 0x90e   :  { %v5357_v54 = vpop.f32.mrb[103].mxu1 }
 0x913   :  { %v6752_v7 = vpop.f32.mrb[104].mxu1 }
 0x914   :  { %v5368_v45 = vpop.f32.mrb[105].mxu1 }
 0x915   :  { %v3285_v34 = vpop.f32.mrb[106].mxu1 }
 0x916   :  { %v5369_v13 = vpop.f32.mrb[107].mxu1 }
 0x917   :  { %v6754_v62 = vpop.f32.mrb[92].mxu0 }
 0x918   :  { %v5374_v61 = vpop.f32.mrb[93].mxu0 }
 0x919   :  { %v3333_v2 = vpop.f32.mrb[94].mxu0 }
 0x91a   :  { %v5375_v25 = vpop.f32.mrb[95].mxu0 }
 0x948   :  { %v6756_v9 = vpop.f32.mrb[108].mxu1 }
 0x949   :  { %v5380_v1 = vpop.f32.mrb[109].mxu1 }
 0x94a   :  { %v3381_v4 = vpop.f32.mrb[110].mxu1 }
 0x94b   :  { %v5381_v59 = vpop.f32.mrb[111].mxu1 }
 0x94c   :  { %v6758_v5 = vpop.f32.mrb[96].mxu0 }
 0x94d   :  { %v5386_v50 = vpop.f32.mrb[97].mxu0 }
 0x94e   :  { %v3429_v53 = vpop.f32.mrb[98].mxu0 }
 0x94f   :  { %v5387_v12 = vpop.f32.mrb[99].mxu0 }
 0x954   :  { %v3532_v56 = vpop.f32.mrb[100].mxu0 }
 0x955   :  { %v5398_v33 = vpop.f32.mrb[101].mxu0  ;;  %v3888_v58 = vsel %vm1214_vm3, %v3532_v56, -inf }
 0x956   :  { %3889 = vmax.xlane.f32.xlu0 %v3888_v58  ;;  %v3535_v27 = vpop.f32.mrb[102].mxu0 }
 0x957   :  { %v5399_v35 = vpop.f32.mrb[103].mxu0 }
 0x95c   :  { %v3632_v57 = vpop.f32.mrb[104].mxu0 }
 0x95d   :  { %v5410_v43 = vpop.f32.mrb[105].mxu0  ;;  %v3894_v46 = vsel %vm1214_vm3, %v3632_v57, -inf }
 0x95e   :  { %3895 = vmax.xlane.f32.xlu0 %v3894_v46  ;;  %v3635_v20 = vpop.f32.mrb[106].mxu0 }
 0x95f   :  { %v5411_v6 = vpop.f32.mrb[107].mxu0 }
 0x964   :  { %v6762_v36 = vpop.f32.mrb[108].mxu0 }
 0x965   :  { %v5422_v8 = vpop.f32.mrb[109].mxu0  ;;  %v3900_v58 = vsel %vm1214_vm3, %v6762_v36, -inf }
 0x966   :  { %v3735_v17 = vpop.f32.mrb[110].mxu0 }
 0x967   :  { %v5423_v37 = vpop.f32.mrb[111].mxu0 }
 0x96c   :  { %v6764_v18 = vpop.f32.mrb[112].mxu0 }
 0x96d   :  { %v5434_v38 = vpop.f32.mrb[113].mxu0  ;;  %v3906_v46 = vsel %vm1214_vm3, %v6764_v18, -inf }
 0x96e   :  { %v3835_v22 = vpop.f32.mrb[114].mxu0 }
 0x96f   :  { %v5435_v51 = vpop.f32.mrb[115].mxu0 }
 0x97d   :  { %v6766_v54 = vpop.f32.mrb[112].mxu1 }
 0x97e   :  { %v5392_v45 = vpop.f32.mrb[113].mxu1 }
 0x97f   :  { %v3477_v34 = vpop.f32.mrb[114].mxu1 }
 0x980   :  { %v5393_v13 = vpop.f32.mrb[115].mxu1 }
 0x985   :  { %v3582_v61 = vpop.f32.mrb[116].mxu1 }
 0x986   :  { %v5404_v2 = vpop.f32.mrb[117].mxu1  ;;  %v3891_v25 = vsel %vm1214_vm3, %v3582_v61, -inf }
 0x987   :  { %3892 = vmax.xlane.f32.xlu1 %v3891_v25  ;;  %v3585_v1 = vpop.f32.mrb[118].mxu1 }
 0x988   :  { %v5405_v4 = vpop.f32.mrb[119].mxu1 }
 0x98d   :  { %v6769_v59 = vpop.f32.mrb[120].mxu1 }
 0x98e   :  { %v5416_v50 = vpop.f32.mrb[121].mxu1  ;;  %v3897_v53 = vsel %vm1214_vm3, %v6769_v59, -inf }
 0x98f   :  { %v3685_v12 = vpop.f32.mrb[122].mxu1  ;;  %3898 = vmax.xlane.f32.xlu0 %v3897_v53 }
 0x990   :  { %v5417_v33 = vpop.f32.mrb[123].mxu1 }
 0x993   :  { %3901 = vmax.xlane.f32.xlu0 %v3900_v58 }
 0x995   :  { %v6775_v27 = vpop.f32.mrb[124].mxu1 }
 0x996   :  { %v5428_v35 = vpop.f32.mrb[125].mxu1  ;;  %v3903_v43 = vsel %vm1214_vm3, %v6775_v27, -inf }
 0x997   :  { %3904 = vmax.xlane.f32.xlu1 %v3903_v43  ;;  %v3785_v20 = vpop.f32.mrb[126].mxu1  ;;  %3907 = vmax.xlane.f32.xlu0 %v3906_v46 }
 0x998   :  { %v5429_v6 = vpop.f32.mrb[127].mxu1 }
 0x99d   :  { %v6781_v8 = vpop.f32.mrb[128].mxu1 }
 0x99e   :  { %v5440_v17 = vpop.f32.mrb[129].mxu1  ;;  %v3909_v22 = vsel %vm1214_vm3, %v6781_v8, -inf }
 0x99f   :  { %v3885_v37 = vpop.f32.mrb[130].mxu1 }
 0x9a0   :  { %v5441_v38 = vpop.f32.mrb[131].mxu1 }
 0x9a8   :  { %4032 = vrot.lane.b32.xlu1 %v6128_v24, %s5838_s14 }
 0x9ac   :  { %4080 = vrot.lane.b32.xlu1 %v6226_v21, %s5838_s14 }
 0x9ad   :  { %3984 = vrot.lane.b32.xlu0 %v6126_v23, %s5838_s14 }
 0x9d0   :  { %3910 = vmax.xlane.f32.xlu1 %v3909_v22 }
 0x9e1   :  { %4128 = vrot.lane.b32.xlu1 %v6232_v32, %s5838_s14 }
 0x9e3   :  { %v3890_v51 = vpop.xlane.xlu0 %3889 }
 0x9e4   :  { %v3912_v45 = vsub.f32 %v3532_v56, %v3890_v51 }
 0x9e6   :  { %v3920_v34 = vmul.f32 1.442695, %v3912_v45 }
 0x9e8   :  { %5663 = vpow2.f32 %v3920_v34 }
 0x9eb   :  { %v3896_v13 = vpop.xlane.xlu0 %3895 }
 0x9ec   :  { %v3914_v2 = vsub.f32 %v3632_v57, %v3896_v13  ;;  %v2592_v13 = vpack.c.bf16 %v6551_v40, %v6551_v40 }
 0x9ee   :  { %v3924_v24 = vmul.f32 1.442695, %v3914_v2  ;;  %v3480_v2 = vpack.c.bf16 %v6746_v0, %v6746_v0 }
 0x9f0   :  { %5665 = vpow2.f32 %v3924_v24  ;;  %v3482_v24 = vpack.c.bf16 %v6748_v11, %v6748_v11 }
 0x9f2   :  { %v6793_v25 = vpop.eup %5663 }
 0x9f3   :  { %v3936_v23 = vsel %vm1214_vm3, %v6793_v25, 0.0 }
 0x9f4   :  { %3937 = vadd.xlane.f32.xlu0 %v3936_v23 }
 0x9fa   :  { %v6797_v21 = vpop.eup %5665 }
 0x9fb   :  { %v3942_v1 = vsel %vm1214_vm3, %v6797_v21, 0.0 }
 0x9fc   :  { %3943 = vadd.xlane.f32.xlu0 %v3942_v1 }
 0xa12   :  { %4176 = vrot.lane.b32.xlu0 %v6252_v30, %s5838_s14 }
 0xa14   :  { %v3893_v32 = vpop.xlane.xlu1 %3892 }
 0xa15   :  { %v3913_v56 = vsub.f32 %v3582_v61, %v3893_v32 }
 0xa17   :  { %v3922_v57 = vmul.f32 1.442695, %v3913_v56 }
 0xa19   :  { %5667 = vpow2.f32 %v3922_v57  ;;  %v2593_v57 = vpack.c.bf16 %v6553_v60, %v6553_v60  ;;  %v3483_v60 = vpack.c.bf16 %v6752_v7, %v6752_v7 }
 0xa1c   :  { %v3899_v4 = vpop.xlane.xlu0 %3898 }
 0xa1d   :  { %v3915_v22 = vsub.f32 %v6769_v59, %v3899_v4  ;;  %v2594_v59 = vpack.c.bf16 %v6555_v16, %v6555_v16  ;;  %v2596_v16 = vpack.c.bf16 %v6559_v55, %v6559_v55  ;;  %v2595_v4 = vpack.c.bf16 %v6557_v44, %v6557_v44 }
 0xa1f   :  { %v3926_v51 = vmul.f32 1.442695, %v3915_v22 }
 0xa20   :  { %v3902_v50 = vpop.xlane.xlu0 %3901 }
 0xa21   :  { %v3916_v53 = vsub.f32 %v6762_v36, %v3902_v50 }
 0xa23   :  { %v6804_v12 = vpop.eup %5667  ;;  %v3928_v33 = vmul.f32 1.442695, %v3916_v53 }
 0xa24   :  { %v3905_v58 = vpop.xlane.xlu1 %3904  ;;  %v3908_v35 = vpop.xlane.xlu0 %3907  ;;  %v3939_v43 = vsel %vm1214_vm3, %v6804_v12, 0.0 }
 0xa25   :  { %5669 = vpow2.f32 %v3928_v33  ;;  %v3918_v46 = vsub.f32 %v6764_v18, %v3908_v35  ;;  %3940 = vadd.xlane.f32.xlu1 %v3939_v43  ;;  %v3917_v45 = vsub.f32 %v6775_v27, %v3905_v58 }
 0xa27   :  { %v3932_v30 = vmul.f32 1.442695, %v3918_v46  ;;  %v3930_v34 = vmul.f32 1.442695, %v3917_v45 }
 0xa28   :  { %v4033_v61 = vpop.permute.xlu1 %4032  ;;  %v3985_v20 = vpop.permute.xlu0 %3984 }
 0xa29   :  { %v4038_v6 = vsel %vm1314_vm2, %v4033_v61, 0  ;;  %v3990_v17 = vsel %vm1314_vm2, %v3985_v20, 0  ;;  %5671 = vpow2.f32 %v3932_v30 }
 0xa2a   :  { %5443 = vmatpush3.bf16.msra.mxu0 %v3990_v17  ;;  %5449 = vmatpush3.bf16.msra.mxu1 %v4038_v6  ;;  %5673 = vpow2.f32 %v3926_v51 }
 0xa2b   :  { %5454 = vmatprep.subr.bf16.mxu0 %v5833_v29  ;;  %5460 = vmatprep.subr.bf16.mxu1 %v5833_v29  ;;  %5675 = vpow2.f32 %v3930_v34 }
 0xa2c   :  { %v4081_v27 = vpop.permute.xlu1 %4080 }
 0xa2d   :  { %v4086_v58 = vsel %vm1314_vm2, %v4081_v27, 0 }
 0xa2f   :  { %v6813_v36 = vpop.eup %5669 }
 0xa30   :  { %v3948_v18 = vsel %vm1214_vm3, %v6813_v36, 0.0 }
 0xa31   :  { %3949 = vadd.xlane.f32.xlu0 %v3948_v18 }
 0xa33   :  { %v6817_v37 = vpop.eup %5671 }
 0xa34   :  { %v3954_v38 = vsel %vm1214_vm3, %v6817_v37, 0.0 }
 0xa35   :  { %3955 = vadd.xlane.f32.xlu0 %v3954_v38 }
 0xa36   :  { %4224 = vrot.lane.b32.xlu1 %v6257_v28, %s5838_s14  ;;  %v6833_v28 = vpop.eup %5673 }
 0xa37   :  { %v6840_v40 = vpop.eup %5675 }
 0xa38   :  { %v3951_v23 = vsel %vm1214_vm3, %v6840_v40, 0.0 }
 0xa4b   :  { %4272 = vrot.lane.b32.xlu0 %v6271_v47, %s5838_s14  ;;  %v3945_v47 = vsel %vm1214_vm3, %v6833_v28, 0.0 }
 0xa4f   :  { %4384 = vrot.lane.b32.xlu0 %v2592_v13, %s5838_s14 }
 0xa53   :  { %4408 = vrot.lane.b32.xlu0 %v3480_v2, %s5827_s1  ;;  %v7041_v2 = vmov 0  }
 0xa57   :  { %4388 = vrot.lane.b32.xlu0 %v2594_v59, %s5838_s14 }
 0xa5a   :  { %3946 = vadd.xlane.f32.xlu1 %v3945_v47 }
 0xa5b   :  { %4412 = vrot.lane.b32.xlu0 %v3482_v24, %s5827_s1 }
 0xa5d   :  { %v3911_v0 = vpop.xlane.xlu1 %3910 }
 0xa5e   :  { %v3919_v1 = vsub.f32 %v6781_v8, %v3911_v0  ;;  %3952 = vadd.xlane.f32.xlu1 %v3951_v23  ;;  %v3481_v8 = vpack.c.bf16 %v6750_v52, %v6750_v52  ;;  %v2597_v52 = vpack.c.bf16 %v6561_v49, %v6561_v49 }
 0xa5f   :  { %4392 = vrot.lane.b32.xlu0 %v2596_v16, %s5838_s14 }
 0xa60   :  { %v3934_v32 = vmul.f32 1.442695, %v3919_v1 }
 0xa61   :  { %v4129_v49 = vpop.permute.xlu1 %4128 }
 0xa62   :  { %5677 = vpow2.f32 %v3934_v32  ;;  %v4134_v6 = vsel %vm1314_vm2, %v4129_v49, 0  ;;  %v5554_v49 = vld [vmem:[#allocation7 + $0x34] ss:$8 sps:$4 sm:$0xff]  }
 0xa6c   :  { %v6851_v56 = vpop.eup %5677 }
 0xa6d   :  { %v3957_v11 = vsel %vm1214_vm3, %v6851_v56, 0.0 }
 0xa6e   :  { %3958 = vadd.xlane.f32.xlu1 %v3957_v11 }
 0xa7f   :  { %4320 = vrot.lane.b32.xlu1 %v6280_v3, %s5838_s14 }
 0xa81   :  { %v3938_v55 = vpop.xlane.xlu0 %3937 }
 0xa82   :  { %5679 = vrcp.f32 %v3938_v55 }
 0xa83   :  { %4386 = vrot.lane.b32.xlu1 %v2593_v57, %s5838_s14 }
 0xa87   :  { %4410 = vrot.lane.b32.xlu1 %v3481_v8, %s5827_s1 }
 0xa89   :  { %v3944_v50 = vpop.xlane.xlu0 %3943 }
 0xa8a   :  { %5681 = vrcp.f32 %v3944_v50 }
 0xa8b   :  { %4390 = vrot.lane.b32.xlu1 %v2595_v4, %s5838_s14 }
 0xa8c   :  { %v5680_v3 = vpop.eup %5679 }
 0xa8d   :  { %v3968_v53 = vmul.f32 %v5680_v3, %v6793_v25  ;;  %v4177_v25 = vpop.permute.xlu0 %4176 }
 0xa8e   :  { %v4182_v43 = vsel %vm1314_vm2, %v4177_v25, 0 }
 0xa8f   :  { %4414 = vrot.lane.b32.xlu1 %v3483_v60, %s5827_s1  ;;  %v3976_v33 = vpack.c.bf16 %v3968_v53, %v3968_v53  ;;  %v5543_v60 = vld [vmem:[#allocation7] ss:$8 sps:$4 sm:$0xff]   ;;  %v5545_v53 = vld [vmem:[#allocation7 + $0x4] ss:$8 sps:$4 sm:$0xff]  }
 0xa91   :  { %5445 = vmatmul.mubr.msk.bf16.vlgmr.msra.gmra.mrb[116].mxu0 %vm1214_vm3, %v3976_v33 }
 0xa92   :  { %5455 = vmatpush3.bf16.msra.mxu0 %v4086_v58  ;;  %5456 = vmatprep.mubr.msk.bf16.mxu0 %vm5834_vm0, %v5833_v29  ;;  %v5546_v58 = vld [vmem:[#allocation7 + $0x10] ss:$8 sps:$4 sm:$0xff]  }
 0xa93   :  { %4394 = vrot.lane.b32.xlu1 %v2597_v52, %s5838_s14  ;;  %5466 = vmatprep.subr.bf16.mxu0 %v5833_v29  ;;  %v5548_v52 = vld [vmem:[#allocation7 + $0x14] ss:$8 sps:$4 sm:$0xff]  }
 0xa94   :  { %v5682_v44 = vpop.eup %5681 }
 0xa95   :  { %v3970_v7 = vmul.f32 %v5682_v44, %v6797_v21 }
 0xa97   :  { %v3978_v35 = vpack.c.bf16 %v3970_v7, %v3970_v7 }
 0xa99   :  { %5457 = vmatmul.mubr.msk.bf16.vlgmr.msra.gmra.mrb[120].mxu0 %vm1214_vm3, %v3978_v35  ;;  %v5549_v35 = vld [vmem:[#allocation7 + $0x20] ss:$8 sps:$4 sm:$0xff]  }
 0xa9a   :  { %5467 = vmatpush3.bf16.msra.mxu0 %v4182_v43  ;;  %5468 = vmatprep.mubr.msk.bf16.mxu0 %vm5834_vm0, %v5833_v29 }
 0xa9b   :  { %5478 = vmatprep.subr.bf16.mxu0 %v5833_v29 }
 0xab2   :  { %v3941_v46 = vpop.xlane.xlu1 %3940 }
 0xab3   :  { %5683 = vrcp.f32 %v3941_v46 }
 0xab6   :  { %v4225_v59 = vpop.permute.xlu1 %4224 }
 0xab7   :  { %v4230_v16 = vsel %vm1314_vm2, %v4225_v59, 0 }
 0xabd   :  { %v5684_v30 = vpop.eup %5683 }
 0xabe   :  { %v3969_v61 = vmul.f32 %v5684_v30, %v6804_v12  ;;  %v3950_v20 = vpop.xlane.xlu0 %3949  ;;  %v5552_v30 = vld [vmem:[#allocation7 + $0x30] ss:$8 sps:$4 sm:$0xff]  }
 0xabf   :  { %5685 = vrcp.f32 %v3950_v20  ;;  %v5555_v20 = vld [vmem:[#allocation7 + $0x40] ss:$8 sps:$4 sm:$0xff]  }
 0xac0   :  { %v3977_v21 = vpack.c.bf16 %v3969_v61, %v3969_v61  ;;  %v5557_v61 = vld [vmem:[#allocation7 + $0x44] ss:$8 sps:$4 sm:$0xff]  }
 0xac2   :  { %5451 = vmatmul.mubr.msk.bf16.vlgmr.msra.gmra.mrb[132].mxu1 %vm1214_vm3, %v3977_v21  ;;  %v3956_v17 = vpop.xlane.xlu0 %3955  ;;  %v5560_v21 = vld [vmem:[#allocation7 + $0x54] ss:$8 sps:$4 sm:$0xff]  }
 0xac3   :  { %5461 = vmatpush3.bf16.msra.mxu1 %v4134_v6  ;;  %5462 = vmatprep.mubr.msk.bf16.mxu1 %vm5834_vm0, %v5833_v29  ;;  %5687 = vrcp.f32 %v3956_v17  ;;  %v5558_v6 = vld [vmem:[#allocation7 + $0x50] ss:$8 sps:$4 sm:$0xff]   ;;  %v5563_v17 = vld [vmem:[#allocation7 + $0x64] ss:$8 sps:$4 sm:$0xff]  }
 0xac4   :  { %5472 = vmatprep.subr.bf16.mxu1 %v5833_v29 }
 0xac6   :  { %v4273_v22 = vpop.permute.xlu0 %4272 }
 0xac7   :  { %v4278_v45 = vsel %vm1314_vm2, %v4273_v22, 0 }
 0xac9   :  { %v5686_v18 = vpop.eup %5685 }
 0xaca   :  { %v3972_v38 = vmul.f32 %v5686_v18, %v6813_v36  ;;  %v5561_v18 = vld [vmem:[#allocation7 + $0x60] ss:$8 sps:$4 sm:$0xff]  }
 0xacc   :  { %v3980_v12 = vpack.c.bf16 %v3972_v38, %v3972_v38  ;;  %v5566_v38 = vld [vmem:[#allocation7 + $0x74] ss:$8 sps:$4 sm:$0xff]  }
 0xacd   :  { %v5688_v51 = vpop.eup %5687 }
 0xace   :  { %5469 = vmatmul.mubr.msk.bf16.vlgmr.msra.gmra.mrb[124].mxu0 %vm1214_vm3, %v3980_v12  ;;  %v3974_v34 = vmul.f32 %v5688_v51, %v6817_v37 }
 0xacf   :  { %5479 = vmatpush3.bf16.msra.mxu0 %v4278_v45  ;;  %5480 = vmatprep.mubr.msk.bf16.mxu0 %vm5834_vm0, %v5833_v29 }
 0xad0   :  { %v3982_v13 = vpack.c.bf16 %v3974_v34, %v3974_v34  ;;  %4638 = vmatprep.subr.bf16.mxu0 %v5545_v53 }
 0xad6   :  { %5481 = vmatmul.mubr.msk.bf16.vlgmr.msra.gmra.mrb[128].mxu0 %vm1214_vm3, %v3982_v13  ;;  %v3485_v13 = vpack.c.bf16 %v6756_v9, %v6756_v9 }
 0xad7   :  { %4670 = vmatprep.mubr.bf16.mxu0 %v7041_v2  ;;  %4639 = vmatpush1.bf16.msra.mxu0 %v5543_v60  ;;  %v3487_v60 = vpack.c.bf16 %v6766_v54, %v6766_v54  ;;  %v1680_v54 = vpack.c.bf16 %v6346_v63, %v6346_v63 }
 0xad8   :  { %4640 = vmatprep.subr.bf16.mxu0 %v5548_v52 }
 0xadb   :  { %4641 = vmatpush1.bf16.msra.mxu0 %v5546_v58  ;;  %v4385_v58 = vpop.permute.xlu0 %4384 }
 0xae7   :  { %v3947_v36 = vpop.xlane.xlu1 %3946 }
 0xae8   :  { %5689 = vrcp.f32 %v3947_v36 }
 0xaeb   :  { %v3953_v27 = vpop.xlane.xlu1 %3952 }
 0xaec   :  { %5691 = vrcp.f32 %v3953_v27 }
 0xaf2   :  { %v5690_v47 = vpop.eup %5689 }
 0xaf3   :  { %v3971_v24 = vmul.f32 %v5690_v47, %v6833_v28 }
 0xaf5   :  { %v3979_v0 = vpack.c.bf16 %v3971_v24, %v3971_v24 }
 0xaf6   :  { %v5692_v23 = vpop.eup %5691 }
 0xaf7   :  { %5463 = vmatmul.mubr.msk.bf16.vlgmr.msra.gmra.mrb[136].mxu1 %vm1214_vm3, %v3979_v0  ;;  %v3973_v37 = vmul.f32 %v5692_v23, %v6840_v40  ;;  %v3486_v0 = vpack.c.bf16 %v6758_v5, %v6758_v5 }
 0xaf8   :  { %5473 = vmatpush3.bf16.msra.mxu1 %v4230_v16  ;;  %5474 = vmatprep.mubr.msk.bf16.mxu1 %vm5834_vm0, %v5833_v29 }
 0xaf9   :  { %5484 = vmatprep.subr.bf16.mxu1 %v5833_v29  ;;  %v3981_v32 = vpack.c.bf16 %v3973_v37, %v3973_v37 }
 0xafb   :  { %v3959_v1 = vpop.xlane.xlu1 %3958 }
 0xafc   :  { %5693 = vrcp.f32 %v3959_v1 }
 0xaff   :  { %5475 = vmatmul.mubr.msk.bf16.vlgmr.msra.gmra.mrb[140].mxu1 %vm1214_vm3, %v3981_v32  ;;  %v4321_v28 = vpop.permute.xlu1 %4320 }
 0xb00   :  { %v4326_v11 = vsel %vm1314_vm2, %v4321_v28, 0  ;;  %5486 = vmatprep.mubr.msk.bf16.mxu1 %vm5834_vm0, %v5833_v29  ;;  %v3484_v29 = vpack.c.bf16 %v6754_v62, %v6754_v62  ;;  %v2598_v62 = vpack.c.bf16 %v6563_v15, %v6563_v15  ;;  %v5564_v15 = vld [vmem:[#allocation7 + $0x70] ss:$8 sps:$4 sm:$0xff]  }
 0xb01   :  { %5485 = vmatpush3.bf16.msra.mxu1 %v4326_v11 }
 0xb06   :  { %v5694_v57 = vpop.eup %5693 }
 0xb07   :  { %v3975_v55 = vmul.f32 %v5694_v57, %v6851_v56  ;;  %v5551_v56 = vld [vmem:[#allocation7 + $0x24] ss:$8 sps:$4 sm:$0xff]  }
 0xb08   :  { %4642 = vmatprep.subr.bf16.mxu0 %v5551_v56  ;;  %v4387_v56 = vpop.permute.xlu1 %4386 }
 0xb09   :  { %v3983_v8 = vpack.c.bf16 %v3975_v55, %v3975_v55  ;;  %4643 = vmatpush1.bf16.msra.mxu0 %v5549_v35 }
 0xb0a   :  { %4644 = vmatprep.subr.bf16.mxu0 %v5554_v49 }
 0xb0b   :  { %5487 = vmatmul.mubr.msk.bf16.vlgmr.msra.gmra.mrb[144].mxu1 %vm1214_vm3, %v3983_v8  ;;  %v2599_v8 = vpack.c.bf16 %v6571_v26, %v6571_v26 }
 0xb0d   :  { %4645 = vmatpush1.bf16.msra.mxu0 %v5552_v30  ;;  %v1681_v30 = vpack.c.bf16 %v6348_v42, %v6348_v42 }
 0xb0e   :  { %4646 = vmatprep.subr.bf16.mxu0 %v5557_v61 }
 0xb11   :  { %4647 = vmatpush1.bf16.msra.mxu0 %v5555_v20  ;;  %v4450_v20 = vsel %vm845_vm1, %v1680_v54, %v4385_v58 }
 0xb12   :  { %4648 = vmatprep.subr.bf16.mxu0 %v5560_v21  ;;  %v4453_v21 = vsel %vm845_vm1, %v1681_v30, %v4387_v56 }
 0xb15   :  { %4649 = vmatpush1.bf16.msra.mxu0 %v5558_v6 }
 0xb16   :  { %4650 = vmatprep.subr.bf16.mxu0 %v5563_v17 }
 0xb19   :  { %4651 = vmatpush1.bf16.msra.mxu0 %v5561_v18 }
 0xb1a   :  { %4652 = vmatprep.subr.bf16.mxu0 %v5566_v38 }
 0xb1d   :  { %4653 = vmatpush1.bf16.msra.mxu0 %v5564_v15 }
 0xb64   :  { %v4026_v40 = vpop.f32.mrb[116].mxu0 }
 0xb65   :  { %v4368_v4 = vpack.c.bf16 %v4026_v40, %v4026_v40  ;;  %v5446_v50 = vpop.f32.mrb[117].mxu0 }
 0xb66   :  { %v4029_v3 = vpop.f32.mrb[118].mxu0 }
 0xb67   :  { %4432 = vrot.lane.b32.xlu0 %v4368_v4, %s5837_s2  ;;  %v5447_v33 = vpop.f32.mrb[119].mxu0 }
 0xb6b   :  { %4416 = vrot.lane.b32.xlu0 %v3484_v29, %s5827_s1 }
 0xb6c   :  { %v4122_v44 = vpop.f32.mrb[120].mxu0 }
 0xb6d   :  { %v4370_v7 = vpack.c.bf16 %v4122_v44, %v4122_v44  ;;  %v5458_v25 = vpop.f32.mrb[121].mxu0  ;;  %v4409_v44 = vpop.permute.xlu0 %4408 }
 0xb6e   :  { %v4125_v43 = vpop.f32.mrb[122].mxu0  ;;  %v4474_v6 = vsel %vm4472_vm4, %v4450_v20, %v4409_v44 }
 0xb6f   :  { %4436 = vrot.lane.b32.xlu0 %v4370_v7, %s5837_s2  ;;  %v5459_v46 = vpop.f32.mrb[123].mxu0  ;;  %v4411_v7 = vpop.permute.xlu1 %4410 }
 0xb70   :  { %v4476_v17 = vsel %vm4472_vm4, %v4453_v21, %v4411_v7 }
 0xb71   :  { %v4389_v25 = vpop.permute.xlu0 %4388 }
 0xb73   :  { %4396 = vrot.lane.b32.xlu0 %v2598_v62, %s5838_s14  ;;  %v4391_v35 = vpop.permute.xlu1 %4390 }
 0xb75   :  { %v4413_v43 = vpop.permute.xlu0 %4412 }
 0xb77   :  { %v4415_v49 = vpop.permute.xlu1 %4414 }
 0xb79   :  { %v4393_v46 = vpop.permute.xlu0 %4392 }
 0xb7b   :  { %v4395_v62 = vpop.permute.xlu1 %4394 }
 0xb95   :  { %v4074_v22 = vpop.f32.mrb[132].mxu1 }
 0xb96   :  { %v4369_v12 = vpack.c.bf16 %v4074_v22, %v4074_v22  ;;  %v5452_v51 = vpop.f32.mrb[133].mxu1 }
 0xb97   :  { %v4077_v45 = vpop.f32.mrb[134].mxu1  ;;  %v1682_v51 = vpack.c.bf16 %v6350_v41, %v6350_v41  ;;  %v1684_v41 = vpack.c.bf16 %v6354_v14, %v6354_v14 }
 0xb98   :  { %v5453_v34 = vpop.f32.mrb[135].mxu1  ;;  %4434 = vrot.lane.b32.xlu1 %v4369_v12, %s5837_s2  ;;  %v1683_v45 = vpack.c.bf16 %v6352_v10, %v6352_v10  ;;  %v1685_v10 = vpack.c.bf16 %v6356_v19, %v6356_v19 }
 0xb99   :  { %v4456_v34 = vsel %vm845_vm1, %v1682_v51, %v4389_v25 }
 0xb9c   :  { %4418 = vrot.lane.b32.xlu1 %v3485_v13, %s5827_s1  ;;  %v4459_v13 = vsel %vm845_vm1, %v1683_v45, %v4391_v35 }
 0xba1   :  { %v4218_v59 = vpop.f32.mrb[124].mxu0 }
 0xba2   :  { %v4372_v36 = vpack.c.bf16 %v4218_v59, %v4218_v59  ;;  %v5470_v27 = vpop.f32.mrb[125].mxu0  ;;  %v4478_v59 = vsel %vm4472_vm4, %v4456_v34, %v4413_v43  ;;  %v4941_v43 = vld [vmem:[%s7035_s5] ss:$0 sm:$0xff] }
 0xba3   :  { %v4221_v47 = vpop.f32.mrb[126].mxu0 }
 0xba4   :  { %4440 = vrot.lane.b32.xlu0 %v4372_v36, %s5837_s2  ;;  %v5471_v24 = vpop.f32.mrb[127].mxu0  ;;  %v4480_v36 = vsel %vm4472_vm4, %v4459_v13, %v4415_v49 }
 0xba8   :  { %4420 = vrot.lane.b32.xlu0 %v3486_v0, %s5827_s1 }
 0xba9   :  { %v4314_v23 = vpop.f32.mrb[128].mxu0 }
 0xbaa   :  { %v4374_v16 = vpack.c.bf16 %v4314_v23, %v4314_v23  ;;  %v5482_v37 = vpop.f32.mrb[129].mxu0 }
 0xbab   :  { %v4317_v1 = vpop.f32.mrb[130].mxu0 }
 0xbac   :  { %4444 = vrot.lane.b32.xlu0 %v4374_v16, %s5837_s2  ;;  %v5483_v9 = vpop.f32.mrb[131].mxu0  ;;  %v4462_v1 = vsel %vm845_vm1, %v1684_v41, %v4393_v46 }
 0xbad   :  { %v4465_v9 = vsel %vm845_vm1, %v1685_v10, %v4395_v62 }
 0xbca   :  { %v4170_v32 = vpop.f32.mrb[136].mxu1 }
 0xbcb   :  { %v4371_v28 = vpack.c.bf16 %v4170_v32, %v4170_v32  ;;  %v5464_v11 = vpop.f32.mrb[137].mxu1 }
 0xbcc   :  { %v4173_v57 = vpop.f32.mrb[138].mxu1 }
 0xbcd   :  { %4438 = vrot.lane.b32.xlu1 %v4371_v28, %s5837_s2  ;;  %v5465_v55 = vpop.f32.mrb[139].mxu1 }
 0xbd1   :  { %4398 = vrot.lane.b32.xlu1 %v2599_v8, %s5838_s14 }
 0xbd2   :  { %v4266_v5 = vpop.f32.mrb[140].mxu1 }
 0xbd3   :  { %v4373_v40 = vpack.c.bf16 %v4266_v5, %v4266_v5  ;;  %v5476_v4 = vpop.f32.mrb[141].mxu1  ;;  %v1686_v5 = vpack.c.bf16 %v6358_v39, %v6358_v39  ;;  %v6983_v39 = vld [vmem:[%s7034_s4] sm:$0x3]  ;;  %s5839_s4 = smov [#allocation8]  }
 0xbd4   :  { %v4269_v50 = vpop.f32.mrb[142].mxu1  ;;  %s4819_s5 = sshll.u32 %s5839_s4, 4  ;;  %s4820_s5 = int_to_ptr.vmem [resolvable:$true] %s4819_s5 }
 0xbd5   :  { %4442 = vrot.lane.b32.xlu1 %v4373_v40, %s5837_s2  ;;  %v5477_v3 = vpop.f32.mrb[143].mxu1  ;;  %v1687_v40 = vpack.c.bf16 %v6360_v48, %v6360_v48  ;;  %v7042_v48 = vsub.s32 1, %v5923_v31  ;;  %s5795_s19 = scalar_lea.vmem %s4820_s5, 128  ;;  %p5800_p11 = scmp.lt.s32.totalorder %s4820_s5, %s4820_s5 }
 0xbd6   :  { %p5796_p10 = scmp.ne.s32.totalorder %s4820_s5, %s5795_s19  ;;  %p5801_p12 = scmp.lt.s32.totalorder %s5795_s19, %s5795_s19 }
 0xbd8   :  { %p5802_p13 = por %p5801_p12, %p5800_p11 }
 0xbd9   :  { %4422 = vrot.lane.b32.xlu1 %v3487_v60, %s5827_s1  ;;  %v4433_v61 = vpop.permute.xlu0 %4432 }
 0xbda   :  { %v4491_v38 = vsel %vm4489_vm5, %v4474_v6, %v4433_v61  ;;  %p5803_p0 = pnand %p5802_p13, %p5796_p10 }
 0xbdd   :  { %v4417_v42 = vpop.permute.xlu0 %4416 }
 0xbde   :  { %v4362_v53 = vpop.f32.mrb[144].mxu1  ;;  %v4482_v32 = vsel %vm4472_vm4, %v4462_v1, %v4417_v42 }
 0xbdf   :  { %v4375_v33 = vpack.c.bf16 %v4362_v53, %v4362_v53  ;;  %v5488_v52 = vpop.f32.mrb[145].mxu1 }
 0xbe0   :  { %v4365_v29 = vpop.f32.mrb[146].mxu1 }
 0xbe1   :  { %4446 = vrot.lane.b32.xlu1 %v4375_v33, %s5837_s2  ;;  %v5489_v26 = vpop.f32.mrb[147].mxu1  ;;  %v4437_v22 = vpop.permute.xlu0 %4436 }
 0xbe2   :  { %v4495_v47 = vsel %vm4489_vm5, %v4478_v59, %v4437_v22  ;;  %v4531_v26 = vrot.slane %v6983_v39, %v7042_v48 }
 0xbe5   :  { %v4397_v0 = vpop.permute.xlu0 %4396 }
 0xbe6   :  { %v4468_v50 = vsel %vm845_vm1, %v1686_v5, %v4397_v0 }
 0xc0a   :  { %v4435_v18 = vpop.permute.xlu1 %4434 }
 0xc0b   :  { %v4493_v15 = vsel %vm4489_vm5, %v4476_v17, %v4435_v18 }
 0xc0c   :  { %v4921_v63 = vcombine.low %v4491_v38, %v4493_v15 }
 0xc0e   :  { %4671 = vmatmul.mubr.bf16.vlgmr.msra.gmra.mrb[132].mxu0 %v4921_v63  ;;  %v4419_v12 = vpop.permute.xlu1 %4418 }
 0xc0f   :  { %4680 = vmatprep.mubr.bf16.mxu0 %v7041_v2  ;;  %v4484_v28 = vsel %vm4472_vm4, %v4465_v9, %v4419_v12 }
 0xc16   :  { %v4441_v37 = vpop.permute.xlu0 %4440 }
 0xc17   :  { %v4499_v57 = vsel %vm4489_vm5, %v4482_v32, %v4441_v37 }
 0xc1a   :  { %v4421_v8 = vpop.permute.xlu0 %4420 }
 0xc1b   :  { %v4486_v60 = vsel %vm4472_vm4, %v4468_v50, %v4421_v8 }
 0xc1e   :  { %v4445_v4 = vpop.permute.xlu0 %4444 }
 0xc1f   :  { %v4503_v52 = vsel %vm4489_vm5, %v4486_v60, %v4445_v4 }
 0xc3f   :  { %v4439_v27 = vpop.permute.xlu1 %4438 }
 0xc40   :  { %v4497_v24 = vsel %vm4489_vm5, %v4480_v36, %v4439_v27 }
 0xc41   :  { %v4922_v23 = vcombine.low %v4495_v47, %v4497_v24 }
 0xc43   :  { %v4399_v16 = vpop.permute.xlu1 %4398  ;;  %4681 = vmatmul.mubr.bf16.gmra.mrb[136].mxu0 %v4922_v23 }
 0xc44   :  { %4690 = vmatprep.mubr.bf16.mxu0 %v7041_v2  ;;  %v4471_v3 = vsel %vm845_vm1, %v1687_v40, %v4399_v16 }
 0xc47   :  { %v4443_v11 = vpop.permute.xlu1 %4442 }
 0xc48   :  { %v4501_v55 = vsel %vm4489_vm5, %v4484_v28, %v4443_v11 }
 0xc49   :  { %v4923_v14 = vcombine.low %v4499_v57, %v4501_v55 }
 0xc4b   :  { %4691 = vmatmul.mubr.bf16.gmra.mrb[140].mxu0 %v4923_v14  ;;  %v4423_v19 = vpop.permute.xlu1 %4422 }
 0xc4c   :  { %4700 = vmatprep.mubr.bf16.mxu0 %v7041_v2  ;;  %v4488_v53 = vsel %vm4472_vm4, %v4471_v3, %v4423_v19 }
 0xc53   :  { %v4447_v33 = vpop.permute.xlu1 %4446 }
 0xc54   :  { %v4505_v2 = vsel %vm4489_vm5, %v4488_v53, %v4447_v33 }
 0xc55   :  { %v4924_v29 = vcombine.low %v4503_v52, %v4505_v2 }
 0xc57   :  { %4701 = vmatmul.mubr.bf16.gmra.mrb[144].mxu0 %v4924_v29 }
 0xce1   :  { %v6988_v58 = vpop.f32.mrb[132].mxu0 }
 0xce2   :  { %v4674_v56 = vpop.f32.mrb[133].mxu0 }
 0xce3   :  { %v4675_v44 = vadd.f32 %v4674_v56, %v4531_v26  ;;  %v6990_v7 = vpop.f32.mrb[134].mxu0 }
 0xce4   :  { %v4678_v25 = vpop.f32.mrb[135].mxu0 }
 0xce5   :  { %5695 = vtanh.f32 %v4675_v44  ;;  %v4679_v35 = vadd.f32 %v4678_v25, %v4531_v26 }
 0xce7   :  { %5697 = vtanh.f32 %v4679_v35 }
 0xcef   :  { %v5696_v49 = vpop.eup %5695 }
 0xcf0   :  { %v4726_v46 = vmul.f32 %v5696_v49, %v4941_v43 }
 0xcf1   :  { %v5698_v62 = vpop.eup %5697 }
 0xcf2   :  { %4734 = vadd.xlane.f32.xlu0 %v4726_v46  ;;  %v4727_v54 = vmul.f32 %v5698_v62, %v4941_v43 }
 0xcf4   :  { %4736 = vadd.xlane.f32.xlu1 %v4727_v54 }
 0xd16   :  { %v6995_v30 = vpop.f32.mrb[136].mxu0 }
 0xd17   :  { %v4684_v61 = vpop.f32.mrb[137].mxu0 }
 0xd18   :  { %v4685_v20 = vadd.f32 %v4684_v61, %v4531_v26  ;;  %v6997_v21 = vpop.f32.mrb[138].mxu0 }
 0xd19   :  { %v4688_v6 = vpop.f32.mrb[139].mxu0 }
 0xd1a   :  { %5699 = vtanh.f32 %v4685_v20  ;;  %v4689_v17 = vadd.f32 %v4688_v6, %v4531_v26 }
 0xd1c   :  { %5701 = vtanh.f32 %v4689_v17 }
 0xd1e   :  { %v6999_v18 = vpop.f32.mrb[140].mxu0 }
 0xd1f   :  { %v4694_v38 = vpop.f32.mrb[141].mxu0 }
 0xd20   :  { %v4695_v15 = vadd.f32 %v4694_v38, %v4531_v26  ;;  %v7001_v63 = vpop.f32.mrb[142].mxu0 }
 0xd21   :  { %v4698_v42 = vpop.f32.mrb[143].mxu0 }
 0xd22   :  { %5703 = vtanh.f32 %v4695_v15  ;;  %v4699_v22 = vadd.f32 %v4698_v42, %v4531_v26 }
 0xd24   :  { %v5700_v12 = vpop.eup %5699  ;;  %5705 = vtanh.f32 %v4699_v22 }
 0xd25   :  { %v4728_v51 = vmul.f32 %v5700_v12, %v4941_v43 }
 0xd26   :  { %v5702_v45 = vpop.eup %5701 }
 0xd27   :  { %4738 = vadd.xlane.f32.xlu0 %v4728_v51  ;;  %v4729_v34 = vmul.f32 %v5702_v45, %v4941_v43 }
 0xd2a   :  { %v7003_v13 = vpop.f32.mrb[144].mxu0 }
 0xd2b   :  { %v4704_v59 = vpop.f32.mrb[145].mxu0  ;;  %4740 = vadd.xlane.f32.xlu0 %v4729_v34 }
 0xd2c   :  { %v5704_v36 = vpop.eup %5703  ;;  %v4705_v27 = vadd.f32 %v4704_v59, %v4531_v26  ;;  %v7005_v47 = vpop.f32.mrb[146].mxu0 }
 0xd2d   :  { %v4708_v24 = vpop.f32.mrb[147].mxu0  ;;  %v4730_v0 = vmul.f32 %v5704_v36, %v4941_v43 }
 0xd2e   :  { %v5706_v23 = vpop.eup %5705  ;;  %5707 = vtanh.f32 %v4705_v27  ;;  %v4709_v16 = vadd.f32 %v4708_v24, %v4531_v26 }
 0xd2f   :  { %4742 = vadd.xlane.f32.xlu0 %v4730_v0  ;;  %v4731_v41 = vmul.f32 %v5706_v23, %v4941_v43  ;;  %v7043_v0 = vsub.s32 0, %v5923_v31 }
 0xd30   :  { %5709 = vtanh.f32 %v4709_v16 }
 0xd31   :  { %4744 = vadd.xlane.f32.xlu1 %v4731_v41  ;;  %v4527_v23 = vrot.slane %v6983_v39, %v7043_v0 }
 0xd33   :  { %v4673_v41 = vadd.f32 %v6988_v58, %v4527_v23  ;;  %v4693_v39 = vadd.f32 %v6999_v18, %v4527_v23 }
 0xd38   :  { %v5708_v10 = vpop.eup %5707 }
 0xd39   :  { %v4732_v37 = vmul.f32 %v5708_v10, %v4941_v43  ;;  %v4677_v10 = vadd.f32 %v6990_v7, %v4527_v23  ;;  %v4697_v7 = vadd.f32 %v7001_v63, %v4527_v23 }
 0xd3a   :  { %v5710_v1 = vpop.eup %5709 }
 0xd3b   :  { %4746 = vadd.xlane.f32.xlu0 %v4732_v37  ;;  %v4733_v9 = vmul.f32 %v5710_v1, %v4941_v43 }
 0xd3d   :  { %4748 = vadd.xlane.f32.xlu1 %v4733_v9 }
 0xd7f   :  { %v4735_v32 = vpop.xlane.xlu0 %4734 }
 0xd81   :  { %v4737_v57 = vpop.xlane.xlu1 %4736 }
 0xdb4   :  { %v4739_v28 = vpop.xlane.xlu0 %4738 }
 0xdb8   :  { %v4741_v11 = vpop.xlane.xlu0 %4740 }
 0xdbc   :  { %v4743_v55 = vpop.xlane.xlu0 %4742 }
 0xdbd   :  { %v4750_v40 = vmax.f32 %v4735_v32, %v4743_v55 }
 0xdbe   :  { %v4745_v14 = vpop.xlane.xlu1 %4744 }
 0xdbf   :  { %v4751_v19 = vmax.f32 %v4737_v57, %v4745_v14 }
 0xdc1   :  { %v4754_v3 = vmax.f32 %v4750_v40, %v4751_v19 }
 0xdc8   :  { %v4747_v8 = vpop.xlane.xlu0 %4746 }
 0xdc9   :  { %v4752_v4 = vmax.f32 %v4739_v28, %v4747_v8 }
 0xdca   :  { %v4749_v5 = vpop.xlane.xlu1 %4748 }
 0xdcb   :  { %v4753_v50 = vmax.f32 %v4741_v11, %v4749_v5 }
 0xdcd   :  { %v4755_v60 = vmax.f32 %v4752_v4, %v4753_v50 }
 0xdcf   :  { %v4756_v53 = vmax.f32 %v4754_v3, %v4755_v60 }
 0xdd1   :  { %v4757_v33 = vsub.f32 %v4735_v32, %v4756_v53  ;;  %v4758_v52 = vsub.f32 %v4737_v57, %v4756_v53  ;;  %v4759_v2 = vsub.f32 %v4739_v28, %v4756_v53  ;;  %v4760_v29 = vsub.f32 %v4741_v11, %v4756_v53 }
 0xdd2   :  { %v4761_v56 = vsub.f32 %v4743_v55, %v4756_v53  ;;  %v4762_v25 = vsub.f32 %v4745_v14, %v4756_v53  ;;  %v4763_v43 = vsub.f32 %v4747_v8, %v4756_v53  ;;  %v4764_v46 = vsub.f32 %v4749_v5, %v4756_v53 }
 0xdd3   :  { %v4765_v48 = vmul.f32 1.442695, %v4757_v33  ;;  %v4767_v26 = vmul.f32 1.442695, %v4758_v52  ;;  %v4769_v44 = vmul.f32 1.442695, %v4759_v2  ;;  %v4683_v32 = vadd.f32 %v6995_v30, %v4527_v23 }
 0xdd4   :  { %v4771_v35 = vmul.f32 1.442695, %v4760_v29  ;;  %v4773_v49 = vmul.f32 1.442695, %v4761_v56  ;;  %v4775_v62 = vmul.f32 1.442695, %v4762_v25  ;;  %v4687_v55 = vadd.f32 %v6997_v21, %v4527_v23 }
 0xdd5   :  { %5711 = vpow2.f32 %v4765_v48  ;;  %v4777_v54 = vmul.f32 1.442695, %v4763_v43  ;;  %v4779_v61 = vmul.f32 1.442695, %v4764_v46  ;;  %v4703_v30 = vadd.f32 %v7003_v13, %v4527_v23 }
 0xdd6   :  { %5713 = vpow2.f32 %v4767_v26  ;;  %v4707_v21 = vadd.f32 %v7005_v47, %v4527_v23 }
 0xdd7   :  { %5715 = vpow2.f32 %v4769_v44 }
 0xdd8   :  { %5717 = vpow2.f32 %v4771_v35 }
 0xdd9   :  { %5719 = vpow2.f32 %v4773_v49 }
 0xdda   :  { %5721 = vpow2.f32 %v4775_v62 }
 0xddb   :  { %5723 = vpow2.f32 %v4777_v54 }
 0xddc   :  { %5725 = vpow2.f32 %v4779_v61 }
 0xddf   :  { %v5712_v20 = vpop.eup %5711 }
 0xde0   :  { %v5714_v6 = vpop.eup %5713 }
 0xde1   :  { %v4781_v17 = vadd.f32 %v5714_v6, %v5712_v20  ;;  %v5716_v38 = vpop.eup %5715 }
 0xde2   :  { %v5718_v42 = vpop.eup %5717 }
 0xde3   :  { %v4782_v15 = vadd.f32 %v5716_v38, %v4781_v17  ;;  %v5720_v12 = vpop.eup %5719 }
 0xde4   :  { %v5722_v45 = vpop.eup %5721 }
 0xde5   :  { %v4783_v22 = vadd.f32 %v5718_v42, %v4782_v15  ;;  %v5724_v59 = vpop.eup %5723 }
 0xde6   :  { %v5726_v27 = vpop.eup %5725 }
 0xde7   :  { %v4784_v51 = vadd.f32 %v5720_v12, %v4783_v22 }
 0xde9   :  { %v4785_v34 = vadd.f32 %v5722_v45, %v4784_v51 }
 0xdeb   :  { %v4786_v36 = vadd.f32 %v5724_v59, %v4785_v34 }
 0xded   :  { %v4787_v24 = vadd.f32 %v5726_v27, %v4786_v36 }
 0xdef   :  { %5727 = vrcp.f32 %v4787_v24 }
 0xdf9   :  { %v5728_v16 = vpop.eup %5727 }
 0xdfa   :  { %v4789_v37 = vmul.f32 %v5728_v16, %v5712_v20  ;;  %v4790_v1 = vmul.f32 %v5728_v16, %v5714_v6  ;;  %v4791_v9 = vmul.f32 %v5728_v16, %v5716_v38  ;;  %v4792_v28 = vmul.f32 %v5728_v16, %v5718_v42 }
 0xdfb   :  { %v4793_v14 = vmul.f32 %v5728_v16, %v5720_v12  ;;  %v4794_v19 = vmul.f32 %v5728_v16, %v5722_v45  ;;  %v4795_v40 = vmul.f32 %v5728_v16, %v5724_v59  ;;  %v4796_v3 = vmul.f32 %v5728_v16, %v5726_v27 }
 0xdfc   :  { %v4797_v11 = vmul.f32 %v4789_v37, %v4673_v41  ;;  %v4798_v57 = vmul.f32 %v4790_v1, %v4677_v10  ;;  %v4799_v8 = vmul.f32 %v4791_v9, %v4683_v32  ;;  %v4800_v5 = vmul.f32 %v4792_v28, %v4687_v55 }
 0xdfd   :  { %v4801_v4 = vmul.f32 %v4793_v14, %v4693_v39  ;;  %v4802_v60 = vmul.f32 %v4794_v19, %v4697_v7  ;;  %v4803_v33 = vmul.f32 %v4795_v40, %v4703_v30  ;;  %v4804_v18 = vmul.f32 %v4796_v3, %v4707_v21 }
 0xdfe   :  { %v4805_v31 = vadd.f32 %v4798_v57, %v4797_v11 }
 0xe00   :  { %v4806_v58 = vadd.f32 %v4805_v31, %v4799_v8 }
 0xe02   :  { %v4807_v50 = vadd.f32 %v4806_v58, %v4800_v5 }
 0xe04   :  { %v4808_v53 = vadd.f32 %v4807_v50, %v4801_v4 }
 0xe06   :  { %v4809_v52 = vadd.f32 %v4808_v53, %v4802_v60 }
 0xe08   :  { %v4810_v2 = vadd.f32 %v4809_v52, %v4803_v33 }
 0xe0a   :  { %v4811_v29 = vadd.f32 %v4810_v2, %v4804_v18 }
 0xe0c   :  { %4812 = vst [vmem:[#allocation8] sm:$0xff] %v4811_v29 }
 0xe0d   :  { %5806 = shalt.err (!%p5803_p0)
}
 0xe0e   :  { %s5807_s21 = scalar_lea.hbm %s7036_s6, 128 }
 0xe0f   :  { %p5808_p1 = scmp.ne.s32.totalorder %s7036_s6, %s5807_s21  ;;  %p5811_p2 = scmp.lt.u32.totalorder %s5807_s21, %s7036_s6 }
 0xe11   :  { %p5813_p3 = pnand %p5811_p2, %p5808_p1 }
 0xe13   :  { %5816 = shalt.err (!%p5813_p3)
}
 0xe14   :  { %4822 = dma.vmem_to_hbm [thread:$0]  %s4820_s5, 128, %s7036_s6, [#allocation4]  }
 0xe15   :  { %5821 = dma.done.wait [#allocation4], 128  }
 0xe16   :  { %5822 = vsyncadd [#allocation4], 4294967168 }
 0xe17   :  { %4826 = vsyncpa [#allocation3], 1 }
 0xe18   :  { %4827 = vsyncpa [#allocation6], 1 }
 0xe19   :  { %4828 = vsyncpa [#allocation4], 1 }

</bundles_post_ra>
